<compile_context>
chip_gen: v6e
topology: v6e:2x2x1
jax: 0.10.0
libtpu: 0.0.40
codegen_flags: <defaults>
</compile_context>

<pallas_src>
import jax
import jax.numpy as jnp
from jax import lax
from jax.experimental import pallas as pl
from jax.experimental.pallas import tpu as pltpu

HIDDEN_SIZE = 512

# Resolved on first call: whether pipeline_mode=pl.Buffered(1) lowers cleanly.
_SINGLE_BUFFER_WEIGHTS_OK = True


def _round_up(x, m):
    return ((x + m - 1) // m) * m


def _cdiv(a, b):
    return -(-a // b)


def _pick_tiling(batch, cap=1024, split_threshold=64):
    """Pick (tile_rows, padded_batch).

    - tile rows are always a multiple of 8 (sublane constraint);
    - >= 2 grid steps once the batch is big enough, so v7x megacore shards the
      batch across both TensorCores (below the threshold the kernel is pure
      weight-DMA latency and splitting would only duplicate the weight fetch);
    - tiles are derived from the batch so padding waste is < 8 rows.
    """
    b8 = _round_up(max(batch, 1), 8)
    if b8 < split_threshold:
        tb = b8
    else:
        n_tiles = max(2, _cdiv(b8, cap))
        tb = _round_up(_cdiv(b8, n_tiles), 8)
    b_pad = _round_up(b8, tb)
    return tb, b_pad


def actor_kernel(x_ref, w1_ref, b1_ref, w2_ref, b2_ref, w3_ref, b3_ref,
                 whs_ref, bhs_ref, out_ref):
    bf16 = jnp.bfloat16
    a2 = out_ref.shape[-1]
    a = a2 // 2

    # Backbone: Linear -> ReLU, three times. bf16 MXU operands, f32 accumulate,
    # f32 elementwise (required on v5e; free filler elsewhere).
    x = x_ref[...].astype(bf16)
    h = jnp.dot(x, w1_ref[...], preferred_element_type=jnp.float32) + b1_ref[...]
    h = jnp.maximum(h, 0.0)
    h = jnp.dot(h.astype(bf16), w2_ref[...],
                preferred_element_type=jnp.float32) + b2_ref[...]
    h = jnp.maximum(h, 0.0)
    h = jnp.dot(h.astype(bf16), w3_ref[...],
                preferred_element_type=jnp.float32) + b3_ref[...]
    h = jnp.maximum(h, 0.0)

    # Fused heads: one (tile_b, 2A) matmul. Columns [0, A) = mean,
    # columns [A, 2A) = log_std -> clamp(-20, 2) -> exp.
    heads = jnp.dot(h.astype(bf16), whs_ref[...],
                    preferred_element_type=jnp.float32) + bhs_ref[...]
    col = lax.broadcasted_iota(jnp.int32, heads.shape, 1)
    std = jnp.exp(jnp.clip(heads, -20.0, 2.0))  # clip makes exp overflow-safe
    out_ref[...] = jnp.where(col < a, heads, std)


def actor_forward(state, packed, tile_cap=1024):
    """state: (B, state_size) float32. packed: kernel-layout params (pack_params).

    Returns (mean, std), each (B, action_size) float32.
    """
    global _SINGLE_BUFFER_WEIGHTS_OK

    B, S = state.shape
    H = packed["w1"].shape[1]
    A2 = packed["whs"].shape[1]
    A = A2 // 2

    tb, b_pad = _pick_tiling(B, cap=tile_cap)
    if b_pad != B:
        state = jnp.pad(state, ((0, b_pad - B), (0, 0)))
    grid = (b_pad // tb,)

    args = (
        state,
        packed["w1"], packed["b1"],
        packed["w2"], packed["b2"],
        packed["w3"], packed["b3"],
        packed["whs"], packed["bhs"],
    )

    # Advisory cost estimate so XLA can overlap the call with surrounding ops.
    flops = 2 * b_pad * (S * H + 2 * H * H + H * A2)
    transcendentals = b_pad * A
    weight_bytes = 2 * (S * H + 2 * H * H + H * A2) + 4 * (3 * H + A2)
    bytes_accessed = weight_bytes + 4 * b_pad * (S + A2)
    cost = pl.CostEstimate(flops=flops, transcendentals=transcendentals,
                           bytes_accessed=bytes_accessed)

    def build(single_buffer_weights):
        # Weights/biases: full-array blocks with a constant index_map -> DMA'd
        # once, resident in VMEM across all batch tiles. Single-buffered when
        # supported (constant block => double-buffering is pure VMEM waste).
        def resident(shape):
            if single_buffer_weights:
                return pl.BlockSpec(shape, lambda i: (0, 0),
                                    pipeline_mode=pl.Buffered(1))
            return pl.BlockSpec(shape, lambda i: (0, 0))

        in_specs = [
            pl.BlockSpec((tb, S), lambda i: (i, 0)),   # state (streamed)
            resident((S, H)), resident((1, H)),        # w1, b1
            resident((H, H)), resident((1, H)),        # w2, b2
            resident((H, H)), resident((1, H)),        # w3, b3
            resident((H, A2)), resident((1, A2)),      # fused heads
        ]
        out_specs = pl.BlockSpec((tb, A2), lambda i: (i, 0))

        return pl.pallas_call(
            actor_kernel,
            grid=grid,
            in_specs=in_specs,
            out_specs=out_specs,
            out_shape=jax.ShapeDtypeStruct((b_pad, A2), jnp.float32),
            compiler_params=pltpu.CompilerParams(
                dimension_semantics=("parallel",)),
            cost_estimate=cost,
        )

    fused = None
    if _SINGLE_BUFFER_WEIGHTS_OK:
        try:
            fused = jax.block_until_ready(build(True)(*args))
        except Exception:
            # Installed jax rejected pipeline_mode / Buffered(1); fall back to
            # default (double-buffered) resident weights.
            _SINGLE_BUFFER_WEIGHTS_OK = False
            fused = None
    if fused is None:
        fused = build(False)(*args)

    mean = fused[:B, :A]
    std = fused[:B, A:]
    return mean, std


def init_params(key, state_size, action_size):
    """Deterministic synthetic init mirroring torch.nn.Linear default init.

    Weights stored as (in, out) f32; biases as (1, out) f32.
    """
    ks = jax.random.split(key, 10)

    def lin(kw, kb, fan_in, fan_out):
        bound = 1.0 / jnp.sqrt(fan_in)
        w = jax.random.uniform(kw, (fan_in, fan_out), jnp.float32, -bound, bound)
        b = jax.random.uniform(kb, (1, fan_out), jnp.float32, -bound, bound)
        return w, b

    w1, b1 = lin(ks[0], ks[1], state_size, HIDDEN_SIZE)
    w2, b2 = lin(ks[2], ks[3], HIDDEN_SIZE, HIDDEN_SIZE)
    w3, b3 = lin(ks[4], ks[5], HIDDEN_SIZE, HIDDEN_SIZE)
    wm, bm = lin(ks[6], ks[7], HIDDEN_SIZE, action_size)
    ws, bs = lin(ks[8], ks[9], HIDDEN_SIZE, action_size)
    return dict(w1=w1, b1=b1, w2=w2, b2=b2, w3=w3, b3=b3,
                wm=wm, bm=bm, ws=ws, bs=bs)


def pack_params(p):
    """Torch-like f32 params -> kernel layout: bf16 weights, f32 biases,
    mean/log_std head weights fused into one (H, 2A) matrix."""
    bf16 = jnp.bfloat16
    return dict(
        w1=p["w1"].astype(bf16), b1=p["b1"],
        w2=p["w2"].astype(bf16), b2=p["b2"],
        w3=p["w3"].astype(bf16), b3=p["b3"],
        whs=jnp.concatenate([p["wm"], p["ws"]], axis=1).astype(bf16),
        bhs=jnp.concatenate([p["bm"], p["bs"]], axis=1),
    )


def reference_forward_bf16(state, packed):
    """Plain-JAX reference using the same bf16-operand / f32-accumulate math."""
    bf16 = jnp.bfloat16
    A = packed["whs"].shape[1] // 2
    h = jnp.maximum(jnp.dot(state.astype(bf16), packed["w1"],
                            preferred_element_type=jnp.float32) + packed["b1"], 0.0)
    h = jnp.maximum(jnp.dot(h.astype(bf16), packed["w2"],
                            preferred_element_type=jnp.float32) + packed["b2"], 0.0)
    h = jnp.maximum(jnp.dot(h.astype(bf16), packed["w3"],
                            preferred_element_type=jnp.float32) + packed["b3"], 0.0)
    heads = jnp.dot(h.astype(bf16), packed["whs"],
                    preferred_element_type=jnp.float32) + packed["bhs"]
    mean = heads[:, :A]
    log_std = jnp.clip(heads[:, A:], -20.0, 2.0)
    return mean, jnp.exp(log_std)


def reference_forward_f32(state, p):
    """Full-precision reference matching the PyTorch forward semantics."""
    h = jnp.maximum(state @ p["w1"] + p["b1"], 0.0)
    h = jnp.maximum(h @ p["w2"] + p["b2"], 0.0)
    h = jnp.maximum(h @ p["w3"] + p["b3"], 0.0)
    mean = h @ p["wm"] + p["bm"]
    log_std = jnp.clip(h @ p["ws"] + p["bs"], -20.0, 2.0)
    return mean, jnp.exp(log_std)


if __name__ == "__main__":
    key = jax.random.PRNGKey(0)
    k_state, k_params, k_big = jax.random.split(key, 3)

    state_size = 32
    action_size = 8

    params = init_params(k_params, state_size, action_size)
    packed = pack_params(params)

    # --- Small-batch / latency path: grid=(1,), single 8-row tile. ---
    batch = 2
    state = jax.random.normal(k_state, (batch, state_size), jnp.float32)
    mean, std = actor_forward(state, packed)
    jax.block_until_ready((mean, std))

    assert mean.shape == (batch, action_size) and std.shape == (batch, action_size)
    assert bool(jnp.all(std > 0.0))

    # Tight check vs. the same bf16-operand math in plain JAX.
    mean_b, std_b = reference_forward_bf16(state, packed)
    assert jnp.allclose(mean, mean_b, atol=2e-2, rtol=2e-2)
    assert jnp.allclose(std, std_b, atol=2e-2, rtol=2e-2)

    # Loose check vs. the full-f32 PyTorch-equivalent forward
    # (bf16 weight quantization error only).
    mean_f, std_f = reference_forward_f32(state, params)
    assert jnp.allclose(mean, mean_f, atol=5e-2, rtol=5e-2)
    assert jnp.allclose(std, std_f, atol=5e-2, rtol=5e-2)

    # --- Multi-tile path: non-multiple-of-8 batch, >=2 grid steps (megacore),
    #     padded rows computed then sliced off. ---
    big_batch = 300
    state_big = jax.random.normal(k_big, (big_batch, state_size), jnp.float32)
    mean2, std2 = actor_forward(state_big, packed)
    jax.block_until_ready((mean2, std2))
    assert mean2.shape == (big_batch, action_size)
    assert std2.shape == (big_batch, action_size)
    mean2_f, std2_f = reference_forward_f32(state_big, params)
    assert jnp.allclose(mean2, mean2_f, atol=5e-2, rtol=5e-2)
    assert jnp.allclose(std2, std2_f, atol=5e-2, rtol=5e-2)
    assert bool(jnp.all(std2 > 0.0))

    print("KERNEL_OK")
</pallas_src>

<mosaic_0001>
module attributes {stable_mosaic.version = 11 : i64} {
  func.func @actor_kernel(%arg0: i32, %arg1: memref<8x32xf32, #tpu.memory_space<vmem>>, %arg2: memref<32x512xbf16, #tpu.memory_space<vmem>>, %arg3: memref<1x512xf32, #tpu.memory_space<vmem>>, %arg4: memref<512x512xbf16, #tpu.memory_space<vmem>>, %arg5: memref<1x512xf32, #tpu.memory_space<vmem>>, %arg6: memref<512x512xbf16, #tpu.memory_space<vmem>>, %arg7: memref<1x512xf32, #tpu.memory_space<vmem>>, %arg8: memref<512x16xbf16, #tpu.memory_space<vmem>>, %arg9: memref<1x16xf32, #tpu.memory_space<vmem>>, %arg10: memref<8x16xf32, #tpu.memory_space<vmem>>) attributes {dimension_semantics = [#tpu.dimension_semantics<parallel>], iteration_bounds = array<i64: 1>, scalar_prefetch = 0 : i64, scratch_operands = 0 : i64, tpu.core_type = #tpu.core_type<tc>, window_params = [{transform_indices = @transform_0, window_bounds = array<i64: 8, 32>}, {pipeline_mode = #tpu.pipeline_mode<synchronous>, transform_indices = @transform_1, window_bounds = array<i64: 32, 512>}, {pipeline_mode = #tpu.pipeline_mode<synchronous>, transform_indices = @transform_2, window_bounds = array<i64: 1, 512>}, {pipeline_mode = #tpu.pipeline_mode<synchronous>, transform_indices = @transform_3, window_bounds = array<i64: 512, 512>}, {pipeline_mode = #tpu.pipeline_mode<synchronous>, transform_indices = @transform_4, window_bounds = array<i64: 1, 512>}, {pipeline_mode = #tpu.pipeline_mode<synchronous>, transform_indices = @transform_5, window_bounds = array<i64: 512, 512>}, {pipeline_mode = #tpu.pipeline_mode<synchronous>, transform_indices = @transform_6, window_bounds = array<i64: 1, 512>}, {pipeline_mode = #tpu.pipeline_mode<synchronous>, transform_indices = @transform_7, window_bounds = array<i64: 512, 16>}, {pipeline_mode = #tpu.pipeline_mode<synchronous>, transform_indices = @transform_8, window_bounds = array<i64: 1, 16>}, {transform_indices = @transform_9, window_bounds = array<i64: 8, 16>}]} {
    %c0 = arith.constant 0 : index
    %c0_0 = arith.constant 0 : index
    %0 = vector.load %arg1[%c0, %c0_0] : memref<8x32xf32, #tpu.memory_space<vmem>>, vector<8x32xf32>
    %1 = arith.truncf %0 : vector<8x32xf32> to vector<8x32xbf16>
    %c0_1 = arith.constant 0 : index
    %c0_2 = arith.constant 0 : index
    %2 = vector.load %arg2[%c0_1, %c0_2] : memref<32x512xbf16, #tpu.memory_space<vmem>>, vector<32x512xbf16>
    %cst = arith.constant dense<0.000000e+00> : vector<8x512xf32>
    %3 = tpu.matmul %1, %2, %cst {dimension_numbers = #tpu.dot_dimension_numbers<[1], [0], [0], [1], [0, 0, 1, 1], [], []>} : vector<8x32xbf16>, vector<32x512xbf16>, vector<8x512xf32> -> vector<8x512xf32>
    %c0_3 = arith.constant 0 : index
    %c0_4 = arith.constant 0 : index
    %4 = vector.load %arg3[%c0_3, %c0_4] : memref<1x512xf32, #tpu.memory_space<vmem>>, vector<1x512xf32>
    %5 = vector.broadcast %4 : vector<1x512xf32> to vector<8x512xf32>
    %6 = arith.addf %3, %5 : vector<8x512xf32>
    %cst_5 = arith.constant 0.000000e+00 : f32
    %7 = vector.broadcast %cst_5 : f32 to vector<8x512xf32>
    %8 = arith.maximumf %6, %7 : vector<8x512xf32>
    %9 = arith.truncf %8 : vector<8x512xf32> to vector<8x512xbf16>
    %c0_6 = arith.constant 0 : index
    %c0_7 = arith.constant 0 : index
    %10 = vector.load %arg4[%c0_6, %c0_7] : memref<512x512xbf16, #tpu.memory_space<vmem>>, vector<512x512xbf16>
    %cst_8 = arith.constant dense<0.000000e+00> : vector<8x512xf32>
    %11 = tpu.matmul %9, %10, %cst_8 {dimension_numbers = #tpu.dot_dimension_numbers<[1], [0], [0], [1], [0, 0, 1, 1], [], []>} : vector<8x512xbf16>, vector<512x512xbf16>, vector<8x512xf32> -> vector<8x512xf32>
    %c0_9 = arith.constant 0 : index
    %c0_10 = arith.constant 0 : index
    %12 = vector.load %arg5[%c0_9, %c0_10] : memref<1x512xf32, #tpu.memory_space<vmem>>, vector<1x512xf32>
    %13 = vector.broadcast %12 : vector<1x512xf32> to vector<8x512xf32>
    %14 = arith.addf %11, %13 : vector<8x512xf32>
    %cst_11 = arith.constant 0.000000e+00 : f32
    %15 = vector.broadcast %cst_11 : f32 to vector<8x512xf32>
    %16 = arith.maximumf %14, %15 : vector<8x512xf32>
    %17 = arith.truncf %16 : vector<8x512xf32> to vector<8x512xbf16>
    %c0_12 = arith.constant 0 : index
    %c0_13 = arith.constant 0 : index
    %18 = vector.load %arg6[%c0_12, %c0_13] : memref<512x512xbf16, #tpu.memory_space<vmem>>, vector<512x512xbf16>
    %cst_14 = arith.constant dense<0.000000e+00> : vector<8x512xf32>
    %19 = tpu.matmul %17, %18, %cst_14 {dimension_numbers = #tpu.dot_dimension_numbers<[1], [0], [0], [1], [0, 0, 1, 1], [], []>} : vector<8x512xbf16>, vector<512x512xbf16>, vector<8x512xf32> -> vector<8x512xf32>
    %c0_15 = arith.constant 0 : index
    %c0_16 = arith.constant 0 : index
    %20 = vector.load %arg7[%c0_15, %c0_16] : memref<1x512xf32, #tpu.memory_space<vmem>>, vector<1x512xf32>
    %21 = vector.broadcast %20 : vector<1x512xf32> to vector<8x512xf32>
    %22 = arith.addf %19, %21 : vector<8x512xf32>
    %cst_17 = arith.constant 0.000000e+00 : f32
    %23 = vector.broadcast %cst_17 : f32 to vector<8x512xf32>
    %24 = arith.maximumf %22, %23 : vector<8x512xf32>
    %25 = arith.truncf %24 : vector<8x512xf32> to vector<8x512xbf16>
    %c0_18 = arith.constant 0 : index
    %c0_19 = arith.constant 0 : index
    %26 = vector.load %arg8[%c0_18, %c0_19] : memref<512x16xbf16, #tpu.memory_space<vmem>>, vector<512x16xbf16>
    %cst_20 = arith.constant dense<0.000000e+00> : vector<8x16xf32>
    %27 = tpu.matmul %25, %26, %cst_20 {dimension_numbers = #tpu.dot_dimension_numbers<[1], [0], [0], [1], [0, 0, 1, 1], [], []>} : vector<8x512xbf16>, vector<512x16xbf16>, vector<8x16xf32> -> vector<8x16xf32>
    %c0_21 = arith.constant 0 : index
    %c0_22 = arith.constant 0 : index
    %28 = vector.load %arg9[%c0_21, %c0_22] : memref<1x16xf32, #tpu.memory_space<vmem>>, vector<1x16xf32>
    %29 = vector.broadcast %28 : vector<1x16xf32> to vector<8x16xf32>
    %30 = arith.addf %27, %29 : vector<8x16xf32>
    %31 = tpu.iota {dimensions = array<i32: 1>} : vector<8x16xi32>
    %cst_23 = arith.constant -2.000000e+01 : f32
    %cst_24 = arith.constant 2.000000e+00 : f32
    %32 = vector.broadcast %cst_23 : f32 to vector<8x16xf32>
    %33 = arith.maximumf %32, %30 : vector<8x16xf32>
    %34 = vector.broadcast %cst_24 : f32 to vector<8x16xf32>
    %35 = arith.minimumf %34, %33 : vector<8x16xf32>
    %36 = math.exp %35 : vector<8x16xf32>
    %c8_i32 = arith.constant 8 : i32
    %37 = vector.broadcast %c8_i32 : i32 to vector<8x16xi32>
    %38 = arith.cmpi slt, %31, %37 : vector<8x16xi32>
    %39 = arith.select %38, %30, %36 : vector<8x16xi1>, vector<8x16xf32>
    %c0_25 = arith.constant 0 : index
    %c0_26 = arith.constant 0 : index
    %40 = vector.load %arg10[%c0_25, %c0_26] : memref<8x16xf32, #tpu.memory_space<vmem>>, vector<8x16xf32>
    tpu.vector_store %arg10[%c0_25, %c0_26], %39 {strides = array<i32>} : memref<8x16xf32, #tpu.memory_space<vmem>>, vector<8x16xf32>,
    return
  }
  func.func @transform_0(%arg0: i32) -> (i32, i32) {
    %c0_i32 = arith.constant 0 : i32
    %c0_i32_0 = arith.constant 0 : i32
    return %arg0, %c0_i32 : i32, i32
  }
  func.func @transform_1(%arg0: i32) -> (i32, i32) {
    %c0_i32 = arith.constant 0 : i32
    %c0_i32_0 = arith.constant 0 : i32
    %c0_i32_1 = arith.constant 0 : i32
    return %c0_i32, %c0_i32_0 : i32, i32
  }
  func.func @transform_2(%arg0: i32) -> (i32, i32) {
    %c0_i32 = arith.constant 0 : i32
    %c0_i32_0 = arith.constant 0 : i32
    %c0_i32_1 = arith.constant 0 : i32
    return %c0_i32, %c0_i32_0 : i32, i32
  }
  func.func @transform_3(%arg0: i32) -> (i32, i32) {
    %c0_i32 = arith.constant 0 : i32
    %c0_i32_0 = arith.constant 0 : i32
    %c0_i32_1 = arith.constant 0 : i32
    return %c0_i32, %c0_i32_0 : i32, i32
  }
  func.func @transform_4(%arg0: i32) -> (i32, i32) {
    %c0_i32 = arith.constant 0 : i32
    %c0_i32_0 = arith.constant 0 : i32
    %c0_i32_1 = arith.constant 0 : i32
    return %c0_i32, %c0_i32_0 : i32, i32
  }
  func.func @transform_5(%arg0: i32) -> (i32, i32) {
    %c0_i32 = arith.constant 0 : i32
    %c0_i32_0 = arith.constant 0 : i32
    %c0_i32_1 = arith.constant 0 : i32
    return %c0_i32, %c0_i32_0 : i32, i32
  }
  func.func @transform_6(%arg0: i32) -> (i32, i32) {
    %c0_i32 = arith.constant 0 : i32
    %c0_i32_0 = arith.constant 0 : i32
    %c0_i32_1 = arith.constant 0 : i32
    return %c0_i32, %c0_i32_0 : i32, i32
  }
  func.func @transform_7(%arg0: i32) -> (i32, i32) {
    %c0_i32 = arith.constant 0 : i32
    %c0_i32_0 = arith.constant 0 : i32
    %c0_i32_1 = arith.constant 0 : i32
    return %c0_i32, %c0_i32_0 : i32, i32
  }
  func.func @transform_8(%arg0: i32) -> (i32, i32) {
    %c0_i32 = arith.constant 0 : i32
    %c0_i32_0 = arith.constant 0 : i32
    %c0_i32_1 = arith.constant 0 : i32
    return %c0_i32, %c0_i32_0 : i32, i32
  }
  func.func @transform_9(%arg0: i32) -> (i32, i32) {
    %c0_i32 = arith.constant 0 : i32
    %c0_i32_0 = arith.constant 0 : i32
    return %arg0, %c0_i32 : i32, i32
  }
}

module attributes {stable_mosaic.version = 11 : i64} {
  func.func @actor_kernel(%arg0: i32, %arg1: memref<8x32xf32, #tpu.memory_space<vmem>>, %arg2: memref<32x512xbf16, #tpu.memory_space<vmem>>, %arg3: memref<1x512xf32, #tpu.memory_space<vmem>>, %arg4: memref<512x512xbf16, #tpu.memory_space<vmem>>, %arg5: memref<1x512xf32, #tpu.memory_space<vmem>>, %arg6: memref<512x512xbf16, #tpu.memory_space<vmem>>, %arg7: memref<1x512xf32, #tpu.memory_space<vmem>>, %arg8: memref<512x16xbf16, #tpu.memory_space<vmem>>, %arg9: memref<1x16xf32, #tpu.memory_space<vmem>>, %arg10: memref<8x16xf32, #tpu.memory_space<vmem>>) attributes {dimension_semantics = [#tpu.dimension_semantics<parallel>], iteration_bounds = array<i64: 1>, scalar_prefetch = 0 : i64, scratch_operands = 0 : i64, tpu.core_type = #tpu.core_type<tc>, window_params = [{transform_indices = @transform_0, window_bounds = array<i64: 8, 32>}, {pipeline_mode = #tpu.pipeline_mode<synchronous>, transform_indices = @transform_1, window_bounds = array<i64: 32, 512>}, {pipeline_mode = #tpu.pipeline_mode<synchronous>, transform_indices = @transform_2, window_bounds = array<i64: 1, 512>}, {pipeline_mode = #tpu.pipeline_mode<synchronous>, transform_indices = @transform_3, window_bounds = array<i64: 512, 512>}, {pipeline_mode = #tpu.pipeline_mode<synchronous>, transform_indices = @transform_4, window_bounds = array<i64: 1, 512>}, {pipeline_mode = #tpu.pipeline_mode<synchronous>, transform_indices = @transform_5, window_bounds = array<i64: 512, 512>}, {pipeline_mode = #tpu.pipeline_mode<synchronous>, transform_indices = @transform_6, window_bounds = array<i64: 1, 512>}, {pipeline_mode = #tpu.pipeline_mode<synchronous>, transform_indices = @transform_7, window_bounds = array<i64: 512, 16>}, {pipeline_mode = #tpu.pipeline_mode<synchronous>, transform_indices = @transform_8, window_bounds = array<i64: 1, 16>}, {transform_indices = @transform_9, window_bounds = array<i64: 8, 16>}]} {
    %c0 = arith.constant 0 : index
    %c0_0 = arith.constant 0 : index
    %0 = vector.load %arg1[%c0, %c0_0] : memref<8x32xf32, #tpu.memory_space<vmem>>, vector<8x32xf32>
    %1 = arith.truncf %0 : vector<8x32xf32> to vector<8x32xbf16>
    %c0_1 = arith.constant 0 : index
    %c0_2 = arith.constant 0 : index
    %2 = vector.load %arg2[%c0_1, %c0_2] : memref<32x512xbf16, #tpu.memory_space<vmem>>, vector<32x512xbf16>
    %cst = arith.constant dense<0.000000e+00> : vector<8x512xf32>
    %3 = tpu.matmul %1, %2, %cst {dimension_numbers = #tpu.dot_dimension_numbers<[1], [0], [0], [1], [0, 0, 1, 1], [], []>} : vector<8x32xbf16>, vector<32x512xbf16>, vector<8x512xf32> -> vector<8x512xf32>
    %c0_3 = arith.constant 0 : index
    %c0_4 = arith.constant 0 : index
    %4 = vector.load %arg3[%c0_3, %c0_4] : memref<1x512xf32, #tpu.memory_space<vmem>>, vector<1x512xf32>
    %5 = vector.broadcast %4 : vector<1x512xf32> to vector<8x512xf32>
    %6 = arith.addf %3, %5 : vector<8x512xf32>
    %cst_5 = arith.constant 0.000000e+00 : f32
    %7 = vector.broadcast %cst_5 : f32 to vector<8x512xf32>
    %8 = arith.maximumf %6, %7 : vector<8x512xf32>
    %9 = arith.truncf %8 : vector<8x512xf32> to vector<8x512xbf16>
    %c0_6 = arith.constant 0 : index
    %c0_7 = arith.constant 0 : index
    %10 = vector.load %arg4[%c0_6, %c0_7] : memref<512x512xbf16, #tpu.memory_space<vmem>>, vector<512x512xbf16>
    %cst_8 = arith.constant dense<0.000000e+00> : vector<8x512xf32>
    %11 = tpu.matmul %9, %10, %cst_8 {dimension_numbers = #tpu.dot_dimension_numbers<[1], [0], [0], [1], [0, 0, 1, 1], [], []>} : vector<8x512xbf16>, vector<512x512xbf16>, vector<8x512xf32> -> vector<8x512xf32>
    %c0_9 = arith.constant 0 : index
    %c0_10 = arith.constant 0 : index
    %12 = vector.load %arg5[%c0_9, %c0_10] : memref<1x512xf32, #tpu.memory_space<vmem>>, vector<1x512xf32>
    %13 = vector.broadcast %12 : vector<1x512xf32> to vector<8x512xf32>
    %14 = arith.addf %11, %13 : vector<8x512xf32>
    %cst_11 = arith.constant 0.000000e+00 : f32
    %15 = vector.broadcast %cst_11 : f32 to vector<8x512xf32>
    %16 = arith.maximumf %14, %15 : vector<8x512xf32>
    %17 = arith.truncf %16 : vector<8x512xf32> to vector<8x512xbf16>
    %c0_12 = arith.constant 0 : index
    %c0_13 = arith.constant 0 : index
    %18 = vector.load %arg6[%c0_12, %c0_13] : memref<512x512xbf16, #tpu.memory_space<vmem>>, vector<512x512xbf16>
    %cst_14 = arith.constant dense<0.000000e+00> : vector<8x512xf32>
    %19 = tpu.matmul %17, %18, %cst_14 {dimension_numbers = #tpu.dot_dimension_numbers<[1], [0], [0], [1], [0, 0, 1, 1], [], []>} : vector<8x512xbf16>, vector<512x512xbf16>, vector<8x512xf32> -> vector<8x512xf32>
    %c0_15 = arith.constant 0 : index
    %c0_16 = arith.constant 0 : index
    %20 = vector.load %arg7[%c0_15, %c0_16] : memref<1x512xf32, #tpu.memory_space<vmem>>, vector<1x512xf32>
    %21 = vector.broadcast %20 : vector<1x512xf32> to vector<8x512xf32>
    %22 = arith.addf %19, %21 : vector<8x512xf32>
    %cst_17 = arith.constant 0.000000e+00 : f32
    %23 = vector.broadcast %cst_17 : f32 to vector<8x512xf32>
    %24 = arith.maximumf %22, %23 : vector<8x512xf32>
    %25 = arith.truncf %24 : vector<8x512xf32> to vector<8x512xbf16>
    %c0_18 = arith.constant 0 : index
    %c0_19 = arith.constant 0 : index
    %26 = vector.load %arg8[%c0_18, %c0_19] : memref<512x16xbf16, #tpu.memory_space<vmem>>, vector<512x16xbf16>
    %cst_20 = arith.constant dense<0.000000e+00> : vector<8x16xf32>
    %27 = tpu.matmul %25, %26, %cst_20 {dimension_numbers = #tpu.dot_dimension_numbers<[1], [0], [0], [1], [0, 0, 1, 1], [], []>} : vector<8x512xbf16>, vector<512x16xbf16>, vector<8x16xf32> -> vector<8x16xf32>
    %c0_21 = arith.constant 0 : index
    %c0_22 = arith.constant 0 : index
    %28 = vector.load %arg9[%c0_21, %c0_22] : memref<1x16xf32, #tpu.memory_space<vmem>>, vector<1x16xf32>
    %29 = vector.broadcast %28 : vector<1x16xf32> to vector<8x16xf32>
    %30 = arith.addf %27, %29 : vector<8x16xf32>
    %31 = tpu.iota {dimensions = array<i32: 1>} : vector<8x16xi32>
    %cst_23 = arith.constant -2.000000e+01 : f32
    %cst_24 = arith.constant 2.000000e+00 : f32
    %32 = vector.broadcast %cst_23 : f32 to vector<8x16xf32>
    %33 = arith.maximumf %32, %30 : vector<8x16xf32>
    %34 = vector.broadcast %cst_24 : f32 to vector<8x16xf32>
    %35 = arith.minimumf %34, %33 : vector<8x16xf32>
    %36 = math.exp %35 : vector<8x16xf32>
    %c8_i32 = arith.constant 8 : i32
    %37 = vector.broadcast %c8_i32 : i32 to vector<8x16xi32>
    %38 = arith.cmpi slt, %31, %37 : vector<8x16xi32>
    %39 = arith.select %38, %30, %36 : vector<8x16xi1>, vector<8x16xf32>
    %c0_25 = arith.constant 0 : index
    %c0_26 = arith.constant 0 : index
    %40 = vector.load %arg10[%c0_25, %c0_26] : memref<8x16xf32, #tpu.memory_space<vmem>>, vector<8x16xf32>
    tpu.vector_store %arg10[%c0_25, %c0_26], %39 {strides = array<i32>} : memref<8x16xf32, #tpu.memory_space<vmem>>, vector<8x16xf32>,
    return
  }
  func.func @transform_0(%arg0: i32) -> (i32, i32) {
    %c0_i32 = arith.constant 0 : i32
    %c0_i32_0 = arith.constant 0 : i32
    return %arg0, %c0_i32 : i32, i32
  }
  func.func @transform_1(%arg0: i32) -> (i32, i32) {
    %c0_i32 = arith.constant 0 : i32
    %c0_i32_0 = arith.constant 0 : i32
    %c0_i32_1 = arith.constant 0 : i32
    return %c0_i32, %c0_i32_0 : i32, i32
  }
  func.func @transform_2(%arg0: i32) -> (i32, i32) {
    %c0_i32 = arith.constant 0 : i32
    %c0_i32_0 = arith.constant 0 : i32
    %c0_i32_1 = arith.constant 0 : i32
    return %c0_i32, %c0_i32_0 : i32, i32
  }
  func.func @transform_3(%arg0: i32) -> (i32, i32) {
    %c0_i32 = arith.constant 0 : i32
    %c0_i32_0 = arith.constant 0 : i32
    %c0_i32_1 = arith.constant 0 : i32
    return %c0_i32, %c0_i32_0 : i32, i32
  }
  func.func @transform_4(%arg0: i32) -> (i32, i32) {
    %c0_i32 = arith.constant 0 : i32
    %c0_i32_0 = arith.constant 0 : i32
    %c0_i32_1 = arith.constant 0 : i32
    return %c0_i32, %c0_i32_0 : i32, i32
  }
  func.func @transform_5(%arg0: i32) -> (i32, i32) {
    %c0_i32 = arith.constant 0 : i32
    %c0_i32_0 = arith.constant 0 : i32
    %c0_i32_1 = arith.constant 0 : i32
    return %c0_i32, %c0_i32_0 : i32, i32
  }
  func.func @transform_6(%arg0: i32) -> (i32, i32) {
    %c0_i32 = arith.constant 0 : i32
    %c0_i32_0 = arith.constant 0 : i32
    %c0_i32_1 = arith.constant 0 : i32
    return %c0_i32, %c0_i32_0 : i32, i32
  }
  func.func @transform_7(%arg0: i32) -> (i32, i32) {
    %c0_i32 = arith.constant 0 : i32
    %c0_i32_0 = arith.constant 0 : i32
    %c0_i32_1 = arith.constant 0 : i32
    return %c0_i32, %c0_i32_0 : i32, i32
  }
  func.func @transform_8(%arg0: i32) -> (i32, i32) {
    %c0_i32 = arith.constant 0 : i32
    %c0_i32_0 = arith.constant 0 : i32
    %c0_i32_1 = arith.constant 0 : i32
    return %c0_i32, %c0_i32_0 : i32, i32
  }
  func.func @transform_9(%arg0: i32) -> (i32, i32) {
    %c0_i32 = arith.constant 0 : i32
    %c0_i32_0 = arith.constant 0 : i32
    return %arg0, %c0_i32 : i32, i32
  }
}

</mosaic_0001>

<bundles_post_ra>
// kernel: tpu_custom_call.1
= control target key start
LH: loop header
LB: loop body
LE: loop exit
PB: predicated region body
PF: predicated region fallthrough
CT: control target
= control target key end

     0   :  { %14 = vsyncpa [#allocation3], 0  ;;  %s3610_s0 = inlined_call_operand.vmem [shape: f32[8,32], index: 0, kind: input, shape index: {}]   ;;  %s3611_s1 = inlined_call_operand.vmem [shape: bf16[32,512], index: 1, kind: input, shape index: {}]   ;;  %s3612_s2 = inlined_call_operand.vmem [shape: f32[1,512], index: 2, kind: input, shape index: {}]   ;;  %s3613_s3 = inlined_call_operand.hbm [shape: bf16[512,512], index: 3, kind: input, shape index: {}]   ;;  %s3614_s4 = inlined_call_operand.vmem [shape: f32[1,512], index: 4, kind: input, shape index: {}]   ;;  %s3615_s5 = inlined_call_operand.hbm [shape: bf16[512,512], index: 5, kind: input, shape index: {}]   ;;  %s3616_s6 = inlined_call_operand.vmem [shape: f32[1,512], index: 6, kind: input, shape index: {}]   ;;  %s3617_s7 = inlined_call_operand.vmem [shape: bf16[512,16], index: 7, kind: input, shape index: {}]   ;;  %s3618_s8 = inlined_call_operand.vmem [shape: f32[1,16], index: 8, kind: input, shape index: {}]   ;;  %s3619_s9 = inlined_call_operand.hbm [shape: f32[8,16], index: 9, kind: output, shape index: {}]  }
   0x1   :  { %15 = vsyncpa [#allocation6], 0 }
   0x2   :  { %16 = vsyncpa [#allocation4], 0  ;;  %s3366_s30 = smov [#allocation2]  }
   0x3   :  { %s28_s10 = sshll.u32 %s3366_s30, 4  ;;  %s29_s10 = int_to_ptr.vmem [resolvable:$true] %s28_s10 }
   0x4   :  { %s3308_s11 = scalar_lea.vmem %s29_s10, 16384  ;;  %p3313_p1 = scmp.lt.s32.totalorder %s29_s10, %s29_s10 }
   0x5   :  { %p3309_p0 = scmp.ne.s32.totalorder %s29_s10, %s3308_s11  ;;  %p3314_p2 = scmp.lt.s32.totalorder %s3308_s11, %s3308_s11 }
   0x7   :  { %p3315_p3 = por %p3314_p2, %p3313_p1 }
   0x9   :  { %p3316_p4 = pnand %p3315_p3, %p3309_p0 }
   0xb   :  { %3319 = shalt.err (!%p3316_p4)
}
   0xc   :  { %s3367_s12 = smov 256   ;;  %s3368_s13 = smov 16  }
   0xd   :  { %34 = dma.hbm_to_vmem [thread:$0]  %s3613_s3, 16384, %s29_s10, [#allocation3], %s3367_s12, %s3367_s12, %s3368_s13  }
   0xe   :  { %s3369_s16 = smov [#allocation5]  }
   0xf   :  { %s42_s17 = sshll.u32 %s3369_s16, 4  ;;  %s43_s17 = int_to_ptr.vmem [resolvable:$true] %s42_s17 }
  0x10   :  { %s3328_s18 = scalar_lea.vmem %s43_s17, 16384  ;;  %p3333_p6 = scmp.lt.s32.totalorder %s43_s17, %s43_s17 }
  0x11   :  { %p3329_p5 = scmp.ne.s32.totalorder %s43_s17, %s3328_s18  ;;  %p3334_p7 = scmp.lt.s32.totalorder %s3328_s18, %s3328_s18 }
  0x13   :  { %p3335_p8 = por %p3334_p7, %p3333_p6 }
  0x15   :  { %p3336_p9 = pnand %p3335_p8, %p3329_p5 }
  0x17   :  { %3339 = shalt.err (!%p3336_p9)
}
  0x18   :  { %48 = dma.hbm_to_vmem [thread:$0]  %s3615_s5, 16384, %s43_s17, [#allocation6], %s3367_s12, %s3367_s12, %s3368_s13  }
  0x19   :  { %3360 = dma.done.wait [#allocation3], 16384  }
  0x1a   :  { %3361 = vsyncadd [#allocation3], 4294950912 }
  0x1b   :  { %3362 = dma.done.wait [#allocation6], 16384  }
  0x1c   :  { %3363 = vsyncadd [#allocation6], 4294950912  ;;  %v3370_v0 = vmov 0   ;;  %v2870_v1 = vld [vmem:[%s3611_s1 + $0x24] ss:$16 sps:$4 sm:$0xff]   ;;  %vm134_vm0 = vcmask 261120  }
  0x1d   :  { %170 = vmatprep.mubr.bf16.mxu0 %v3370_v0  ;;  %211 = vmatprep.mubr.bf16.mxu1 %v3370_v0  ;;  %v2872_v2 = vld [vmem:[%s3611_s1 + $0x2c] ss:$16 sps:$4 sm:$0xff]   ;;  %v2874_v3 = vld [vmem:[%s3611_s1 + $0x20] ss:$16 sps:$4 sm:$0xff]   ;;  %v2875_v4 = vld [vmem:[%s3611_s1 + $0x28] ss:$16 sps:$4 sm:$0xff]  }
  0x1e   :  { %150 = vmatprep.subr.bf16.mxu0 %v2870_v1  ;;  %191 = vmatprep.subr.bf16.mxu1 %v2872_v2  ;;  %v2876_v5 = vld [vmem:[%s3611_s1 + $0x4] ss:$16 sps:$4 sm:$0xff]   ;;  %v2878_v6 = vld [vmem:[%s3611_s1 + $0xc] ss:$16 sps:$4 sm:$0xff]   ;;  %v2880_v7 = vld [vmem:[%s3611_s1] ss:$16 sps:$4 sm:$0xff]  }
  0x1f   :  { %151 = vmatpush1.bf16.msra.mxu0 %v2874_v3  ;;  %192 = vmatpush1.bf16.msra.mxu1 %v2875_v4  ;;  %v2881_v8 = vld [vmem:[%s3611_s1 + $0x8] ss:$16 sps:$4 sm:$0xff]   ;;  %v62_v9 = vld [vmem:[%s3610_s0] sm:$0xff]  ;;  %s3371_s26 = smov [#allocation7]   ;;  %vm2503_vm2 = vcmask 130048  }
  0x20   :  { %152 = vmatprep.subr.bf16.mxu0 %v2876_v5  ;;  %193 = vmatprep.subr.bf16.mxu1 %v2878_v6  ;;  %v2882_v10 = vld [vmem:[#allocation2 + $0xe0] ss:$16 sps:$4 sm:$0xff]   ;;  %v2884_v11 = vld [vmem:[#allocation2 + $0xe4] ss:$16 sps:$4 sm:$0xff]   ;;  %v63_v12 = vpack.c.bf16 %v62_v9, %v62_v9  ;;  %s2511_s27 = sshll.u32 %s3371_s26, 4  ;;  %s2512_s27 = int_to_ptr.vmem [resolvable:$true] %s2511_s27 }
  0x21   :  { %v2885_v13 = vld [vmem:[#allocation2 + $0x2e0] ss:$16 sps:$4 sm:$0xff]   ;;  %v2887_v14 = vld [vmem:[#allocation2 + $0x2e4] ss:$16 sps:$4 sm:$0xff]   ;;  %p3345_p11 = scmp.lt.s32.totalorder %s2512_s27, %s2512_s27 }
  0x22   :  { %v2890_v15 = vld [vmem:[#allocation2 + $0xc4] ss:$16 sps:$4 sm:$0xff]   ;;  %v2888_v17 = vld [vmem:[#allocation2 + $0xc0] ss:$16 sps:$4 sm:$0xff]  }
  0x23   :  { %153 = vmatpush1.bf16.msra.mxu0 %v2880_v7  ;;  %194 = vmatpush1.bf16.msra.mxu1 %v2881_v8  ;;  %v2893_v16 = vld [vmem:[#allocation2 + $0x2c4] ss:$16 sps:$4 sm:$0xff]   ;;  %v2891_v18 = vld [vmem:[#allocation2 + $0x2c0] ss:$16 sps:$4 sm:$0xff]  }
  0x24   :  { %1018 = vmatprep.subr.bf16.mxu0 %v2884_v11  ;;  %1059 = vmatprep.subr.bf16.mxu1 %v2887_v14  ;;  %v2896_v19 = vld [vmem:[#allocation2 + $0xa4] ss:$16 sps:$4 sm:$0xff]   ;;  %v2894_v21 = vld [vmem:[#allocation2 + $0xa0] ss:$16 sps:$4 sm:$0xff]   ;;  %v2980_v11 = vld [vmem:[#allocation2 + $0xec] ss:$16 sps:$4 sm:$0xff]  }
  0x25   :  { %v2899_v20 = vld [vmem:[#allocation2 + $0x2a4] ss:$16 sps:$4 sm:$0xff]   ;;  %v2897_v22 = vld [vmem:[#allocation2 + $0x2a0] ss:$16 sps:$4 sm:$0xff]  }
  0x26   :  { %2529 = vmatmul.mubr.msk.bf16.vlgmr.msra.gmra.mxu0 %vm134_vm0, %v63_v12  ;;  %2530 = vmatmul.mubr.msk.bf16.vlgmr.msra.gmra.mxu1 %vm134_vm0, %v63_v12  ;;  %v2902_v23 = vld [vmem:[#allocation2 + $0x84] ss:$16 sps:$4 sm:$0xff]   ;;  %v2900_v25 = vld [vmem:[#allocation2 + $0x80] ss:$16 sps:$4 sm:$0xff]   ;;  %v2983_v12 = vld [vmem:[#allocation2 + $0x2ec] ss:$16 sps:$4 sm:$0xff]  }
  0x27   :  { %1019 = vmatpush1.bf16.msra.mxu0 %v2882_v10  ;;  %1060 = vmatpush1.bf16.msra.mxu1 %v2885_v13  ;;  %v2905_v24 = vld [vmem:[#allocation2 + $0x284] ss:$16 sps:$4 sm:$0xff]   ;;  %v2903_v26 = vld [vmem:[#allocation2 + $0x280] ss:$16 sps:$4 sm:$0xff]   ;;  %v74_v13 = vlaneseq }
  0x28   :  { %1020 = vmatprep.subr.bf16.mxu0 %v2890_v15  ;;  %1061 = vmatprep.subr.bf16.mxu1 %v2893_v16  ;;  %v2908_v27 = vld [vmem:[#allocation2 + $0x64] ss:$16 sps:$4 sm:$0xff]   ;;  %v2906_v29 = vld [vmem:[#allocation2 + $0x60] ss:$16 sps:$4 sm:$0xff]  }
  0x29   :  { %v2911_v28 = vld [vmem:[#allocation2 + $0x264] ss:$16 sps:$4 sm:$0xff]   ;;  %v2909_v30 = vld [vmem:[#allocation2 + $0x260] ss:$16 sps:$4 sm:$0xff]   ;;  %v75_v14 = vshrl.u32 %v74_v13, 7 }
  0x2a   :  { %v2914_v31 = vld [vmem:[#allocation2 + $0x44] ss:$16 sps:$4 sm:$0xff]   ;;  %v2912_v33 = vld [vmem:[#allocation2 + $0x40] ss:$16 sps:$4 sm:$0xff]  }
  0x2b   :  { %1021 = vmatpush1.bf16.msra.mxu0 %v2888_v17  ;;  %1062 = vmatpush1.bf16.msra.mxu1 %v2891_v18  ;;  %v2917_v32 = vld [vmem:[#allocation2 + $0x244] ss:$16 sps:$4 sm:$0xff]   ;;  %v2915_v34 = vld [vmem:[#allocation2 + $0x240] ss:$16 sps:$4 sm:$0xff]   ;;  %v3456_v15 = vsub.s32 0, %v75_v14  ;;  %v3458_v16 = vsub.s32 2, %v75_v14 }
  0x2c   :  { %1022 = vmatprep.subr.bf16.mxu0 %v2896_v19  ;;  %1063 = vmatprep.subr.bf16.mxu1 %v2899_v20  ;;  %v2920_v35 = vld [vmem:[#allocation2 + $0x24] ss:$16 sps:$4 sm:$0xff]   ;;  %v2918_v37 = vld [vmem:[#allocation2 + $0x20] ss:$16 sps:$4 sm:$0xff]   ;;  %v3463_v18 = vsub.s32 1, %v75_v14  ;;  %v3465_v19 = vsub.s32 3, %v75_v14 }
  0x2d   :  { %v2923_v36 = vld [vmem:[#allocation2 + $0x224] ss:$16 sps:$4 sm:$0xff]   ;;  %v2921_v38 = vld [vmem:[#allocation2 + $0x220] ss:$16 sps:$4 sm:$0xff]   ;;  %v3029_v14 = vld [vmem:[#allocation2 + $0x3e8] ss:$16 sps:$4 sm:$0xff]  }
  0x2e   :  { %v2926_v39 = vld [vmem:[#allocation2 + $0x4] ss:$16 sps:$4 sm:$0xff]   ;;  %v2924_v41 = vld [vmem:[#allocation2] ss:$16 sps:$4 sm:$0xff]  }
  0x2f   :  { %1023 = vmatpush1.bf16.msra.mxu0 %v2894_v21  ;;  %1064 = vmatpush1.bf16.msra.mxu1 %v2897_v22  ;;  %v2929_v40 = vld [vmem:[#allocation2 + $0x204] ss:$16 sps:$4 sm:$0xff]   ;;  %v2927_v42 = vld [vmem:[#allocation2 + $0x200] ss:$16 sps:$4 sm:$0xff]  }
  0x30   :  { %1024 = vmatprep.subr.bf16.mxu0 %v2902_v23  ;;  %1065 = vmatprep.subr.bf16.mxu1 %v2905_v24  ;;  %v2932_v43 = vld [vmem:[#allocation2 + $0x1e4] ss:$16 sps:$4 sm:$0xff]   ;;  %v2930_v45 = vld [vmem:[#allocation2 + $0x1e0] ss:$16 sps:$4 sm:$0xff]  }
  0x31   :  { %v2935_v44 = vld [vmem:[#allocation2 + $0x3e4] ss:$16 sps:$4 sm:$0xff]   ;;  %v2933_v46 = vld [vmem:[#allocation2 + $0x3e0] ss:$16 sps:$4 sm:$0xff]  }
  0x32   :  { %v2938_v47 = vld [vmem:[#allocation2 + $0x1c4] ss:$16 sps:$4 sm:$0xff]   ;;  %v2936_v49 = vld [vmem:[#allocation2 + $0x1c0] ss:$16 sps:$4 sm:$0xff]  }
  0x33   :  { %1025 = vmatpush1.bf16.msra.mxu0 %v2900_v25  ;;  %1066 = vmatpush1.bf16.msra.mxu1 %v2903_v26  ;;  %v2941_v48 = vld [vmem:[#allocation2 + $0x3c4] ss:$16 sps:$4 sm:$0xff]   ;;  %v2939_v50 = vld [vmem:[#allocation2 + $0x3c0] ss:$16 sps:$4 sm:$0xff]  }
  0x34   :  { %1026 = vmatprep.subr.bf16.mxu0 %v2908_v27  ;;  %1067 = vmatprep.subr.bf16.mxu1 %v2911_v28  ;;  %v2944_v51 = vld [vmem:[#allocation2 + $0x1a4] ss:$16 sps:$4 sm:$0xff]   ;;  %v2942_v53 = vld [vmem:[#allocation2 + $0x1a0] ss:$16 sps:$4 sm:$0xff]  }
  0x35   :  { %v2947_v52 = vld [vmem:[#allocation2 + $0x3a4] ss:$16 sps:$4 sm:$0xff]   ;;  %v2945_v54 = vld [vmem:[#allocation2 + $0x3a0] ss:$16 sps:$4 sm:$0xff]  }
  0x36   :  { %v2950_v55 = vld [vmem:[#allocation2 + $0x184] ss:$16 sps:$4 sm:$0xff]   ;;  %v2948_v57 = vld [vmem:[#allocation2 + $0x180] ss:$16 sps:$4 sm:$0xff]  }
  0x37   :  { %1027 = vmatpush1.bf16.msra.mxu0 %v2906_v29  ;;  %1068 = vmatpush1.bf16.msra.mxu1 %v2909_v30  ;;  %v2953_v56 = vld [vmem:[#allocation2 + $0x384] ss:$16 sps:$4 sm:$0xff]   ;;  %v2951_v58 = vld [vmem:[#allocation2 + $0x380] ss:$16 sps:$4 sm:$0xff]  }
  0x38   :  { %1028 = vmatprep.subr.bf16.mxu0 %v2914_v31  ;;  %1069 = vmatprep.subr.bf16.mxu1 %v2917_v32  ;;  %v2956_v59 = vld [vmem:[#allocation2 + $0x164] ss:$16 sps:$4 sm:$0xff]   ;;  %v2954_v61 = vld [vmem:[#allocation2 + $0x160] ss:$16 sps:$4 sm:$0xff]  }
  0x39   :  { %v2959_v60 = vld [vmem:[#allocation2 + $0x364] ss:$16 sps:$4 sm:$0xff]   ;;  %v2957_v62 = vld [vmem:[#allocation2 + $0x360] ss:$16 sps:$4 sm:$0xff]  }
  0x3a   :  { %v2962_v63 = vld [vmem:[#allocation2 + $0x144] ss:$16 sps:$4 sm:$0xff]   ;;  %v2960_v1 = vld [vmem:[#allocation2 + $0x140] ss:$16 sps:$4 sm:$0xff]  }
  0x3b   :  { %1029 = vmatpush1.bf16.msra.mxu0 %v2912_v33  ;;  %1070 = vmatpush1.bf16.msra.mxu1 %v2915_v34  ;;  %v2965_v0 = vld [vmem:[#allocation2 + $0x344] ss:$16 sps:$4 sm:$0xff]   ;;  %v2963_v2 = vld [vmem:[#allocation2 + $0x340] ss:$16 sps:$4 sm:$0xff]  }
  0x3c   :  { %1030 = vmatprep.subr.bf16.mxu0 %v2920_v35  ;;  %1071 = vmatprep.subr.bf16.mxu1 %v2923_v36  ;;  %v2968_v3 = vld [vmem:[#allocation2 + $0x124] ss:$16 sps:$4 sm:$0xff]   ;;  %v2966_v5 = vld [vmem:[#allocation2 + $0x120] ss:$16 sps:$4 sm:$0xff]  }
  0x3d   :  { %v2971_v4 = vld [vmem:[#allocation2 + $0x324] ss:$16 sps:$4 sm:$0xff]   ;;  %v2969_v6 = vld [vmem:[#allocation2 + $0x320] ss:$16 sps:$4 sm:$0xff]  }
  0x3e   :  { %v2974_v7 = vld [vmem:[#allocation2 + $0x104] ss:$16 sps:$4 sm:$0xff]   ;;  %v2972_v9 = vld [vmem:[#allocation2 + $0x100] ss:$16 sps:$4 sm:$0xff]  }
  0x3f   :  { %1031 = vmatpush1.bf16.msra.mxu0 %v2918_v37  ;;  %1072 = vmatpush1.bf16.msra.mxu1 %v2921_v38  ;;  %v2977_v8 = vld [vmem:[#allocation2 + $0x304] ss:$16 sps:$4 sm:$0xff]   ;;  %v2975_v10 = vld [vmem:[#allocation2 + $0x300] ss:$16 sps:$4 sm:$0xff]  }
  0x40   :  { %1032 = vmatprep.subr.bf16.mxu0 %v2926_v39  ;;  %1073 = vmatprep.subr.bf16.mxu1 %v2929_v40  ;;  %v72_v17 = vld [vmem:[%s3612_s2] sm:$0xf] }
  0x41   :  { %v77_v20 = vrot.slane %v72_v17, %v3456_v15  ;;  %v85_v21 = vrot.slane %v72_v17, %v3458_v16  ;;  %v81_v22 = vrot.slane %v72_v17, %v3463_v18  ;;  %v89_v23 = vrot.slane %v72_v17, %v3465_v19  ;;  %v3034_v17 = vld [vmem:[#allocation2 + $0x1cc] ss:$16 sps:$4 sm:$0xff]  }
  0x43   :  { %1033 = vmatpush1.bf16.msra.mxu0 %v2924_v41  ;;  %1074 = vmatpush1.bf16.msra.mxu1 %v2927_v42 }
  0x44   :  { %1034 = vmatprep.subr.bf16.mxu0 %v2932_v43  ;;  %1075 = vmatprep.subr.bf16.mxu1 %v2935_v44  ;;  %v2978_v43 = vld [vmem:[#allocation2 + $0xe8] ss:$16 sps:$4 sm:$0xff]  }
  0x45   :  { %v2981_v44 = vld [vmem:[#allocation2 + $0x2e8] ss:$16 sps:$4 sm:$0xff]  }
  0x47   :  { %1035 = vmatpush2.bf16.msra.mxu0 %v2930_v45  ;;  %1076 = vmatpush2.bf16.msra.mxu1 %v2933_v46  ;;  %v2986_v46 = vld [vmem:[#allocation2 + $0xcc] ss:$16 sps:$4 sm:$0xff]  }
  0x48   :  { %1036 = vmatprep.subr.bf16.mxu0 %v2938_v47  ;;  %1077 = vmatprep.subr.bf16.mxu1 %v2941_v48  ;;  %v2989_v47 = vld [vmem:[#allocation2 + $0x2cc] ss:$16 sps:$4 sm:$0xff]   ;;  %v2984_v48 = vld [vmem:[#allocation2 + $0xc8] ss:$16 sps:$4 sm:$0xff]  }
  0x4b   :  { %1037 = vmatpush2.bf16.msra.mxu0 %v2936_v49  ;;  %1078 = vmatpush2.bf16.msra.mxu1 %v2939_v50  ;;  %v2987_v49 = vld [vmem:[#allocation2 + $0x2c8] ss:$16 sps:$4 sm:$0xff]   ;;  %v2992_v50 = vld [vmem:[#allocation2 + $0xac] ss:$16 sps:$4 sm:$0xff]  }
  0x4c   :  { %1038 = vmatprep.subr.bf16.mxu0 %v2944_v51  ;;  %1079 = vmatprep.subr.bf16.mxu1 %v2947_v52  ;;  %v2995_v51 = vld [vmem:[#allocation2 + $0x2ac] ss:$16 sps:$4 sm:$0xff]   ;;  %v2990_v52 = vld [vmem:[#allocation2 + $0xa8] ss:$16 sps:$4 sm:$0xff]  }
  0x4f   :  { %1039 = vmatpush2.bf16.msra.mxu0 %v2942_v53  ;;  %1080 = vmatpush2.bf16.msra.mxu1 %v2945_v54  ;;  %v2993_v53 = vld [vmem:[#allocation2 + $0x2a8] ss:$16 sps:$4 sm:$0xff]   ;;  %v2998_v54 = vld [vmem:[#allocation2 + $0x8c] ss:$16 sps:$4 sm:$0xff]  }
  0x50   :  { %1040 = vmatprep.subr.bf16.mxu0 %v2950_v55  ;;  %1081 = vmatprep.subr.bf16.mxu1 %v2953_v56  ;;  %v3001_v55 = vld [vmem:[#allocation2 + $0x28c] ss:$16 sps:$4 sm:$0xff]   ;;  %v2996_v56 = vld [vmem:[#allocation2 + $0x88] ss:$16 sps:$4 sm:$0xff]  }
  0x53   :  { %1041 = vmatpush2.bf16.msra.mxu0 %v2948_v57  ;;  %1082 = vmatpush2.bf16.msra.mxu1 %v2951_v58  ;;  %v2999_v57 = vld [vmem:[#allocation2 + $0x288] ss:$16 sps:$4 sm:$0xff]   ;;  %v3004_v58 = vld [vmem:[#allocation2 + $0x6c] ss:$16 sps:$4 sm:$0xff]  }
  0x54   :  { %1042 = vmatprep.subr.bf16.mxu0 %v2956_v59  ;;  %1083 = vmatprep.subr.bf16.mxu1 %v2959_v60  ;;  %v3007_v59 = vld [vmem:[#allocation2 + $0x26c] ss:$16 sps:$4 sm:$0xff]   ;;  %v3002_v60 = vld [vmem:[#allocation2 + $0x68] ss:$16 sps:$4 sm:$0xff]  }
  0x57   :  { %1043 = vmatpush2.bf16.msra.mxu0 %v2954_v61  ;;  %1084 = vmatpush2.bf16.msra.mxu1 %v2957_v62  ;;  %v3005_v61 = vld [vmem:[#allocation2 + $0x268] ss:$16 sps:$4 sm:$0xff]   ;;  %v3010_v62 = vld [vmem:[#allocation2 + $0x4c] ss:$16 sps:$4 sm:$0xff]  }
  0x58   :  { %1044 = vmatprep.subr.bf16.mxu0 %v2962_v63  ;;  %1085 = vmatprep.subr.bf16.mxu1 %v2965_v0  ;;  %v3013_v63 = vld [vmem:[#allocation2 + $0x24c] ss:$16 sps:$4 sm:$0xff]   ;;  %v3008_v0 = vld [vmem:[#allocation2 + $0x48] ss:$16 sps:$4 sm:$0xff]  }
  0x5b   :  { %1045 = vmatpush2.bf16.msra.mxu0 %v2960_v1  ;;  %1086 = vmatpush2.bf16.msra.mxu1 %v2963_v2  ;;  %v3011_v1 = vld [vmem:[#allocation2 + $0x248] ss:$16 sps:$4 sm:$0xff]   ;;  %v3016_v2 = vld [vmem:[#allocation2 + $0x2c] ss:$16 sps:$4 sm:$0xff]  }
  0x5c   :  { %1046 = vmatprep.subr.bf16.mxu0 %v2968_v3  ;;  %1087 = vmatprep.subr.bf16.mxu1 %v2971_v4  ;;  %v3019_v3 = vld [vmem:[#allocation2 + $0x22c] ss:$16 sps:$4 sm:$0xff]   ;;  %v3014_v4 = vld [vmem:[#allocation2 + $0x28] ss:$16 sps:$4 sm:$0xff]  }
  0x5f   :  { %1047 = vmatpush2.bf16.msra.mxu0 %v2966_v5  ;;  %1088 = vmatpush2.bf16.msra.mxu1 %v2969_v6  ;;  %v3017_v5 = vld [vmem:[#allocation2 + $0x228] ss:$16 sps:$4 sm:$0xff]   ;;  %v3022_v6 = vld [vmem:[#allocation2 + $0xc] ss:$16 sps:$4 sm:$0xff]  }
  0x60   :  { %1048 = vmatprep.subr.bf16.mxu0 %v2974_v7  ;;  %1089 = vmatprep.subr.bf16.mxu1 %v2977_v8  ;;  %v3025_v7 = vld [vmem:[#allocation2 + $0x20c] ss:$16 sps:$4 sm:$0xff]   ;;  %v3020_v8 = vld [vmem:[#allocation2 + $0x8] ss:$16 sps:$4 sm:$0xff]  }
  0x63   :  { %1049 = vmatpush2.bf16.msra.mxu0 %v2972_v9  ;;  %1090 = vmatpush2.bf16.msra.mxu1 %v2975_v10  ;;  %v3023_v9 = vld [vmem:[#allocation2 + $0x208] ss:$16 sps:$4 sm:$0xff]   ;;  %v3028_v10 = vld [vmem:[#allocation2 + $0x1ec] ss:$16 sps:$4 sm:$0xff]  }
  0x64   :  { %1100 = vmatprep.subr.bf16.mxu0 %v2980_v11  ;;  %1141 = vmatprep.subr.bf16.mxu1 %v2983_v12  ;;  %v3031_v11 = vld [vmem:[#allocation2 + $0x3ec] ss:$16 sps:$4 sm:$0xff]   ;;  %v3026_v12 = vld [vmem:[#allocation2 + $0x1e8] ss:$16 sps:$4 sm:$0xff]  }
  0xe6   :  { %v172_v24 = vpop.f32.mrf.mxu0  ;;  %v213_v25 = vpop.f32.mrf.mxu1 }
  0xe7   :  { %v173_v26 = vadd.f32 %v172_v24, %v77_v20  ;;  %v214_v27 = vadd.f32 %v213_v25, %v85_v21  ;;  %v3037_v20 = vld [vmem:[#allocation2 + $0x3cc] ss:$16 sps:$4 sm:$0xff]   ;;  %v3032_v21 = vld [vmem:[#allocation2 + $0x1c8] ss:$16 sps:$4 sm:$0xff]  }
  0xe8   :  { %v174_v28 = vpop.f32.mrf.mxu0  ;;  %v215_v29 = vpop.f32.mrf.mxu1  ;;  %v3043_v24 = vld [vmem:[#allocation2 + $0x3ac] ss:$16 sps:$4 sm:$0xff]   ;;  %v3038_v25 = vld [vmem:[#allocation2 + $0x1a8] ss:$16 sps:$4 sm:$0xff]  }
  0xe9   :  { %v222_v30 = vmax.f32 %v214_v27, 0.0  ;;  %v175_v31 = vadd.f32 %v174_v28, %v81_v22  ;;  %v216_v32 = vadd.f32 %v215_v29, %v89_v23  ;;  %v220_v33 = vmax.f32 %v173_v26, 0.0  ;;  %v3035_v22 = vld [vmem:[#allocation2 + $0x3c8] ss:$16 sps:$4 sm:$0xff]   ;;  %v3040_v23 = vld [vmem:[#allocation2 + $0x1ac] ss:$16 sps:$4 sm:$0xff]  }
  0xea   :  { %v176_v34 = vpop.f32.mrf.mxu0  ;;  %v217_v35 = vpop.f32.mrf.mxu1  ;;  %v3041_v26 = vld [vmem:[#allocation2 + $0x3a8] ss:$16 sps:$4 sm:$0xff]   ;;  %v3046_v27 = vld [vmem:[#allocation2 + $0x18c] ss:$16 sps:$4 sm:$0xff]  }
  0xeb   :  { %v221_v36 = vmax.f32 %v175_v31, 0.0  ;;  %v223_v37 = vmax.f32 %v216_v32, 0.0  ;;  %v3471_v38 = vpack.c.bf16 %v222_v30, %v222_v30  ;;  %v3473_v45 = vpack.c.bf16 %v220_v33, %v220_v33  ;;  %v3049_v28 = vld [vmem:[#allocation2 + $0x38c] ss:$16 sps:$4 sm:$0xff]   ;;  %v3044_v29 = vld [vmem:[#allocation2 + $0x188] ss:$16 sps:$4 sm:$0xff]  }
  0xec   :  { %v177_v39 = vpop.f32.mrf.mxu0  ;;  %v218_v40 = vpop.f32.mrf.mxu1  ;;  %v3047_v30 = vld [vmem:[#allocation2 + $0x388] ss:$16 sps:$4 sm:$0xff]   ;;  %v3052_v31 = vld [vmem:[#allocation2 + $0x16c] ss:$16 sps:$4 sm:$0xff]  }
  0xed   :  { %v225_v41 = vpack.c.bf16 %v221_v36, %v221_v36  ;;  %v227_v42 = vpack.c.bf16 %v223_v37, %v223_v37  ;;  %v3055_v32 = vld [vmem:[#allocation2 + $0x36c] ss:$16 sps:$4 sm:$0xff]   ;;  %v3050_v33 = vld [vmem:[#allocation2 + $0x168] ss:$16 sps:$4 sm:$0xff]  }
  0xee   :  { %v3053_v34 = vld [vmem:[#allocation2 + $0x368] ss:$16 sps:$4 sm:$0xff]   ;;  %v3058_v35 = vld [vmem:[#allocation2 + $0x14c] ss:$16 sps:$4 sm:$0xff]  }
  0xef   :  { %1050 = vmatprep.mubr.bf16.mxu0 %v225_v41  ;;  %1091 = vmatprep.mubr.bf16.mxu1 %v227_v42  ;;  %v3061_v36 = vld [vmem:[#allocation2 + $0x34c] ss:$16 sps:$4 sm:$0xff]   ;;  %v3056_v37 = vld [vmem:[#allocation2 + $0x148] ss:$16 sps:$4 sm:$0xff]  }
  0xf0   :  { %1051 = vmatmul.mubr.bf16.vlgmr.msra.gmra.mxu0 %v3473_v45  ;;  %1092 = vmatmul.mubr.bf16.vlgmr.msra.gmra.mxu1 %v3471_v38  ;;  %v3059_v39 = vld [vmem:[#allocation2 + $0x348] ss:$16 sps:$4 sm:$0xff]   ;;  %v3064_v40 = vld [vmem:[#allocation2 + $0x12c] ss:$16 sps:$4 sm:$0xff]  }
  0xf1   :  { %1101 = vmatpush1.bf16.msra.mxu0 %v2978_v43  ;;  %1142 = vmatpush1.bf16.msra.mxu1 %v2981_v44  ;;  %v3065_v43 = vld [vmem:[#allocation2 + $0x328] ss:$16 sps:$4 sm:$0xff]   ;;  %v3070_v44 = vld [vmem:[#allocation2 + $0x10c] ss:$16 sps:$4 sm:$0xff]  }
  0xf2   :  { %1132 = vmatprep.mubr.bf16.mxu0 %v225_v41  ;;  %1173 = vmatprep.mubr.bf16.mxu1 %v227_v42  ;;  %v3067_v41 = vld [vmem:[#allocation2 + $0x32c] ss:$16 sps:$4 sm:$0xff]   ;;  %v3062_v42 = vld [vmem:[#allocation2 + $0x128] ss:$16 sps:$4 sm:$0xff]  }
  0xf3   :  { %1102 = vmatprep.subr.bf16.mxu0 %v2986_v46  ;;  %1143 = vmatprep.subr.bf16.mxu1 %v2989_v47  ;;  %v3073_v46 = vld [vmem:[#allocation2 + $0x30c] ss:$16 sps:$4 sm:$0xff]   ;;  %v3068_v47 = vld [vmem:[#allocation2 + $0x108] ss:$16 sps:$4 sm:$0xff]  }
  0xf5   :  { %1103 = vmatpush1.bf16.msra.mxu0 %v2984_v48  ;;  %1144 = vmatpush1.bf16.msra.mxu1 %v2987_v49  ;;  %v3071_v48 = vld [vmem:[#allocation2 + $0x308] ss:$16 sps:$4 sm:$0xff]   ;;  %v3076_v49 = vld [vmem:[#allocation5 + $0xe4] ss:$16 sps:$4 sm:$0xff]  }
  0xf6   :  { %1104 = vmatprep.subr.bf16.mxu0 %v2992_v50  ;;  %1145 = vmatprep.subr.bf16.mxu1 %v2995_v51  ;;  %v3074_v50 = vld [vmem:[#allocation5 + $0xe0] ss:$16 sps:$4 sm:$0xff]   ;;  %v3079_v51 = vld [vmem:[#allocation5 + $0xc4] ss:$16 sps:$4 sm:$0xff]  }
  0xf9   :  { %1105 = vmatpush1.bf16.msra.mxu0 %v2990_v52  ;;  %1146 = vmatpush1.bf16.msra.mxu1 %v2993_v53  ;;  %v3077_v52 = vld [vmem:[#allocation5 + $0xc0] ss:$16 sps:$4 sm:$0xff]   ;;  %v3082_v53 = vld [vmem:[#allocation5 + $0xa4] ss:$16 sps:$4 sm:$0xff]  }
  0xfa   :  { %1106 = vmatprep.subr.bf16.mxu0 %v2998_v54  ;;  %1147 = vmatprep.subr.bf16.mxu1 %v3001_v55  ;;  %v3080_v54 = vld [vmem:[#allocation5 + $0xa0] ss:$16 sps:$4 sm:$0xff]   ;;  %v3085_v55 = vld [vmem:[#allocation5 + $0x84] ss:$16 sps:$4 sm:$0xff]  }
  0xfd   :  { %1107 = vmatpush1.bf16.msra.mxu0 %v2996_v56  ;;  %1148 = vmatpush1.bf16.msra.mxu1 %v2999_v57  ;;  %v3083_v56 = vld [vmem:[#allocation5 + $0x80] ss:$16 sps:$4 sm:$0xff]  }
  0xfe   :  { %1108 = vmatprep.subr.bf16.mxu0 %v3004_v58  ;;  %1149 = vmatprep.subr.bf16.mxu1 %v3007_v59  ;;  %v3122_v57 = vld [vmem:[#allocation5 + $0x2e0] ss:$16 sps:$4 sm:$0xff]   ;;  %v3124_v58 = vld [vmem:[#allocation5 + $0x2e4] ss:$16 sps:$4 sm:$0xff]  }
  0xff   :  { %v3088_v59 = vld [vmem:[#allocation5 + $0x64] ss:$16 sps:$4 sm:$0xff]  }
 0x101   :  { %1109 = vmatpush1.bf16.msra.mxu0 %v3002_v60  ;;  %1150 = vmatpush1.bf16.msra.mxu1 %v3005_v61  ;;  %v3128_v60 = vld [vmem:[#allocation5 + $0x2c0] ss:$16 sps:$4 sm:$0xff]   ;;  %v3091_v61 = vld [vmem:[#allocation5 + $0x44] ss:$16 sps:$4 sm:$0xff]  }
 0x102   :  { %1110 = vmatprep.subr.bf16.mxu0 %v3010_v62  ;;  %1151 = vmatprep.subr.bf16.mxu1 %v3013_v63  ;;  %v3089_v62 = vld [vmem:[#allocation5 + $0x40] ss:$16 sps:$4 sm:$0xff]  }
 0x103   :  { %v3134_v63 = vld [vmem:[#allocation5 + $0x2a0] ss:$16 sps:$4 sm:$0xff]  }
 0x105   :  { %1111 = vmatpush1.bf16.msra.mxu0 %v3008_v0  ;;  %1152 = vmatpush1.bf16.msra.mxu1 %v3011_v1  ;;  %v3136_v0 = vld [vmem:[#allocation5 + $0x2a4] ss:$16 sps:$4 sm:$0xff]  }
 0x106   :  { %1112 = vmatprep.subr.bf16.mxu0 %v3016_v2  ;;  %1153 = vmatprep.subr.bf16.mxu1 %v3019_v3  ;;  %v3094_v1 = vld [vmem:[#allocation5 + $0x24] ss:$16 sps:$4 sm:$0xff]   ;;  %v3092_v2 = vld [vmem:[#allocation5 + $0x20] ss:$16 sps:$4 sm:$0xff]  }
 0x107   :  { %v3140_v3 = vld [vmem:[#allocation5 + $0x280] ss:$16 sps:$4 sm:$0xff]  }
 0x109   :  { %1113 = vmatpush1.bf16.msra.mxu0 %v3014_v4  ;;  %1154 = vmatpush1.bf16.msra.mxu1 %v3017_v5  ;;  %v3142_v4 = vld [vmem:[#allocation5 + $0x284] ss:$16 sps:$4 sm:$0xff]  }
 0x10a   :  { %1114 = vmatprep.subr.bf16.mxu0 %v3022_v6  ;;  %1155 = vmatprep.subr.bf16.mxu1 %v3025_v7  ;;  %v3097_v5 = vld [vmem:[#allocation5 + $0x4] ss:$16 sps:$4 sm:$0xff]   ;;  %v3095_v6 = vld [vmem:[#allocation5] ss:$16 sps:$4 sm:$0xff]  }
 0x10b   :  { %v3146_v7 = vld [vmem:[#allocation5 + $0x260] ss:$16 sps:$4 sm:$0xff]  }
 0x10d   :  { %1115 = vmatpush1.bf16.msra.mxu0 %v3020_v8  ;;  %1156 = vmatpush1.bf16.msra.mxu1 %v3023_v9  ;;  %v3148_v8 = vld [vmem:[#allocation5 + $0x264] ss:$16 sps:$4 sm:$0xff]  }
 0x10e   :  { %1116 = vmatprep.subr.bf16.mxu0 %v3028_v10  ;;  %1157 = vmatprep.subr.bf16.mxu1 %v3031_v11  ;;  %v3100_v9 = vld [vmem:[#allocation5 + $0x1e4] ss:$16 sps:$4 sm:$0xff]   ;;  %v3098_v10 = vld [vmem:[#allocation5 + $0x1e0] ss:$16 sps:$4 sm:$0xff]  }
 0x10f   :  { %v3152_v11 = vld [vmem:[#allocation5 + $0x240] ss:$16 sps:$4 sm:$0xff]  }
 0x111   :  { %1117 = vmatpush2.bf16.msra.mxu0 %v3026_v12  ;;  %1158 = vmatpush2.bf16.msra.mxu1 %v3029_v14  ;;  %v3154_v12 = vld [vmem:[#allocation5 + $0x244] ss:$16 sps:$4 sm:$0xff]  }
 0x112   :  { %1118 = vmatprep.subr.bf16.mxu0 %v3034_v17  ;;  %1159 = vmatprep.subr.bf16.mxu1 %v3037_v20  ;;  %v3103_v14 = vld [vmem:[#allocation5 + $0x1c4] ss:$16 sps:$4 sm:$0xff]   ;;  %v3101_v17 = vld [vmem:[#allocation5 + $0x1c0] ss:$16 sps:$4 sm:$0xff]  }
 0x113   :  { %v3158_v20 = vld [vmem:[#allocation5 + $0x220] ss:$16 sps:$4 sm:$0xff]  }
 0x115   :  { %1119 = vmatpush2.bf16.msra.mxu0 %v3032_v21  ;;  %1160 = vmatpush2.bf16.msra.mxu1 %v3035_v22  ;;  %v3160_v21 = vld [vmem:[#allocation5 + $0x224] ss:$16 sps:$4 sm:$0xff]  }
 0x116   :  { %1120 = vmatprep.subr.bf16.mxu0 %v3040_v23  ;;  %1161 = vmatprep.subr.bf16.mxu1 %v3043_v24  ;;  %v3106_v22 = vld [vmem:[#allocation5 + $0x1a4] ss:$16 sps:$4 sm:$0xff]   ;;  %v3104_v23 = vld [vmem:[#allocation5 + $0x1a0] ss:$16 sps:$4 sm:$0xff]  }
 0x117   :  { %v3164_v24 = vld [vmem:[#allocation5 + $0x200] ss:$16 sps:$4 sm:$0xff]  }
 0x119   :  { %1121 = vmatpush2.bf16.msra.mxu0 %v3038_v25  ;;  %1162 = vmatpush2.bf16.msra.mxu1 %v3041_v26  ;;  %v3166_v25 = vld [vmem:[#allocation5 + $0x204] ss:$16 sps:$4 sm:$0xff]  }
 0x11a   :  { %1122 = vmatprep.subr.bf16.mxu0 %v3046_v27  ;;  %1163 = vmatprep.subr.bf16.mxu1 %v3049_v28  ;;  %v3109_v26 = vld [vmem:[#allocation5 + $0x184] ss:$16 sps:$4 sm:$0xff]   ;;  %v3107_v27 = vld [vmem:[#allocation5 + $0x180] ss:$16 sps:$4 sm:$0xff]  }
 0x11b   :  { %v3170_v28 = vld [vmem:[#allocation5 + $0x3e0] ss:$16 sps:$4 sm:$0xff]  }
 0x11d   :  { %1123 = vmatpush2.bf16.msra.mxu0 %v3044_v29  ;;  %1164 = vmatpush2.bf16.msra.mxu1 %v3047_v30  ;;  %v3172_v29 = vld [vmem:[#allocation5 + $0x3e4] ss:$16 sps:$4 sm:$0xff]  }
 0x11e   :  { %1124 = vmatprep.subr.bf16.mxu0 %v3052_v31  ;;  %1165 = vmatprep.subr.bf16.mxu1 %v3055_v32  ;;  %v3112_v30 = vld [vmem:[#allocation5 + $0x164] ss:$16 sps:$4 sm:$0xff]   ;;  %v3110_v31 = vld [vmem:[#allocation5 + $0x160] ss:$16 sps:$4 sm:$0xff]  }
 0x11f   :  { %v3176_v32 = vld [vmem:[#allocation5 + $0x3c0] ss:$16 sps:$4 sm:$0xff]  }
 0x121   :  { %1125 = vmatpush2.bf16.msra.mxu0 %v3050_v33  ;;  %1166 = vmatpush2.bf16.msra.mxu1 %v3053_v34  ;;  %v3178_v33 = vld [vmem:[#allocation5 + $0x3c4] ss:$16 sps:$4 sm:$0xff]  }
 0x122   :  { %1126 = vmatprep.subr.bf16.mxu0 %v3058_v35  ;;  %1167 = vmatprep.subr.bf16.mxu1 %v3061_v36  ;;  %v3115_v34 = vld [vmem:[#allocation5 + $0x144] ss:$16 sps:$4 sm:$0xff]   ;;  %v3113_v35 = vld [vmem:[#allocation5 + $0x140] ss:$16 sps:$4 sm:$0xff]  }
 0x123   :  { %v3182_v36 = vld [vmem:[#allocation5 + $0x3a0] ss:$16 sps:$4 sm:$0xff]  }
 0x125   :  { %1127 = vmatpush2.bf16.msra.mxu0 %v3056_v37  ;;  %1168 = vmatpush2.bf16.msra.mxu1 %v3059_v39  ;;  %v3184_v37 = vld [vmem:[#allocation5 + $0x3a4] ss:$16 sps:$4 sm:$0xff]  }
 0x126   :  { %1128 = vmatprep.subr.bf16.mxu0 %v3064_v40  ;;  %1169 = vmatprep.subr.bf16.mxu1 %v3067_v41  ;;  %v3118_v39 = vld [vmem:[#allocation5 + $0x124] ss:$16 sps:$4 sm:$0xff]   ;;  %v3116_v40 = vld [vmem:[#allocation5 + $0x120] ss:$16 sps:$4 sm:$0xff]  }
 0x127   :  { %v3188_v41 = vld [vmem:[#allocation5 + $0x380] ss:$16 sps:$4 sm:$0xff]  }
 0x129   :  { %1129 = vmatpush2.bf16.msra.mxu0 %v3062_v42  ;;  %1170 = vmatpush2.bf16.msra.mxu1 %v3065_v43  ;;  %v3190_v42 = vld [vmem:[#allocation5 + $0x384] ss:$16 sps:$4 sm:$0xff]  }
 0x12a   :  { %1130 = vmatprep.subr.bf16.mxu0 %v3070_v44  ;;  %1171 = vmatprep.subr.bf16.mxu1 %v3073_v46  ;;  %v3121_v43 = vld [vmem:[#allocation5 + $0x104] ss:$16 sps:$4 sm:$0xff]   ;;  %v3119_v44 = vld [vmem:[#allocation5 + $0x100] ss:$16 sps:$4 sm:$0xff]  }
 0x12b   :  { %v3194_v46 = vld [vmem:[#allocation5 + $0x360] ss:$16 sps:$4 sm:$0xff]  }
 0x12d   :  { %1131 = vmatpush2.bf16.msra.mxu0 %v3068_v47  ;;  %1172 = vmatpush2.bf16.msra.mxu1 %v3071_v48  ;;  %v3196_v47 = vld [vmem:[#allocation5 + $0x364] ss:$16 sps:$4 sm:$0xff]   ;;  %v3127_v48 = vld [vmem:[#allocation5 + $0xec] ss:$16 sps:$4 sm:$0xff]  }
 0x12e   :  { %1980 = vmatprep.subr.bf16.mxu0 %v3076_v49  ;;  %2021 = vmatprep.subr.bf16.mxu1 %v3124_v58  ;;  %v3200_v49 = vld [vmem:[#allocation5 + $0x340] ss:$16 sps:$4 sm:$0xff]  }
 0x130   :  { %1133 = vmatmul.mubr.bf16.vlgmr.msra.gmra.mxu0 %v3473_v45  ;;  %1174 = vmatmul.mubr.bf16.vlgmr.msra.gmra.mxu1 %v3471_v38  ;;  %v3086_v45 = vld [vmem:[#allocation5 + $0x60] ss:$16 sps:$4 sm:$0xff]   ;;  %v3130_v38 = vld [vmem:[#allocation5 + $0x2c4] ss:$16 sps:$4 sm:$0xff]  }
 0x131   :  { %1981 = vmatpush1.bf16.msra.mxu0 %v3074_v50  ;;  %2022 = vmatpush1.bf16.msra.mxu1 %v3122_v57  ;;  %v3202_v50 = vld [vmem:[#allocation5 + $0x344] ss:$16 sps:$4 sm:$0xff]  }
 0x132   :  { %1982 = vmatprep.subr.bf16.mxu0 %v3079_v51  ;;  %2023 = vmatprep.subr.bf16.mxu1 %v3130_v38  ;;  %v3208_v51 = vld [vmem:[#allocation5 + $0x324] ss:$16 sps:$4 sm:$0xff]  }
 0x135   :  { %1983 = vmatpush1.bf16.msra.mxu0 %v3077_v52  ;;  %2024 = vmatpush1.bf16.msra.mxu1 %v3128_v60  ;;  %v3206_v52 = vld [vmem:[#allocation5 + $0x320] ss:$16 sps:$4 sm:$0xff]  }
 0x136   :  { %1984 = vmatprep.subr.bf16.mxu0 %v3082_v53  ;;  %2025 = vmatprep.subr.bf16.mxu1 %v3136_v0  ;;  %v3214_v53 = vld [vmem:[#allocation5 + $0x304] ss:$16 sps:$4 sm:$0xff]  }
 0x139   :  { %1985 = vmatpush1.bf16.msra.mxu0 %v3080_v54  ;;  %2026 = vmatpush1.bf16.msra.mxu1 %v3134_v63  ;;  %v3212_v54 = vld [vmem:[#allocation5 + $0x300] ss:$16 sps:$4 sm:$0xff]  }
 0x13a   :  { %1986 = vmatprep.subr.bf16.mxu0 %v3085_v55  ;;  %2027 = vmatprep.subr.bf16.mxu1 %v3142_v4  ;;  %v3220_v55 = vld [vmem:[#allocation5 + $0x2ec] ss:$16 sps:$4 sm:$0xff]  }
 0x13d   :  { %1987 = vmatpush1.bf16.msra.mxu0 %v3083_v56  ;;  %2028 = vmatpush1.bf16.msra.mxu1 %v3140_v3  ;;  %v3482_v56 = vld [vmem:[%s3614_s4] sm:$0xf] }
 0x13e   :  { %1988 = vmatprep.subr.bf16.mxu0 %v3088_v59  ;;  %2029 = vmatprep.subr.bf16.mxu1 %v3148_v8  ;;  %v361_v57 = vrot.slane %v3482_v56, %v3456_v15  ;;  %v365_v58 = vrot.slane %v3482_v56, %v3463_v18  ;;  %v3125_v8 = vld [vmem:[#allocation5 + $0xe8] ss:$16 sps:$4 sm:$0xff]  }
 0x141   :  { %1989 = vmatpush1.bf16.msra.mxu0 %v3086_v45  ;;  %2030 = vmatpush1.bf16.msra.mxu1 %v3146_v7 }
 0x142   :  { %1990 = vmatprep.subr.bf16.mxu0 %v3091_v61  ;;  %2031 = vmatprep.subr.bf16.mxu1 %v3154_v12  ;;  %v3139_v12 = vld [vmem:[#allocation5 + $0xac] ss:$16 sps:$4 sm:$0xff]  }
 0x145   :  { %1991 = vmatpush1.bf16.msra.mxu0 %v3089_v62  ;;  %2032 = vmatpush1.bf16.msra.mxu1 %v3152_v11  ;;  %v3131_v11 = vld [vmem:[#allocation5 + $0xc8] ss:$16 sps:$4 sm:$0xff]  }
 0x146   :  { %1992 = vmatprep.subr.bf16.mxu0 %v3094_v1  ;;  %2033 = vmatprep.subr.bf16.mxu1 %v3160_v21  ;;  %v3151_v21 = vld [vmem:[#allocation5 + $0x6c] ss:$16 sps:$4 sm:$0xff]  }
 0x149   :  { %1993 = vmatpush1.bf16.msra.mxu0 %v3092_v2  ;;  %2034 = vmatpush1.bf16.msra.mxu1 %v3158_v20  ;;  %v3143_v20 = vld [vmem:[#allocation5 + $0x88] ss:$16 sps:$4 sm:$0xff]  }
 0x14a   :  { %1994 = vmatprep.subr.bf16.mxu0 %v3097_v5  ;;  %2035 = vmatprep.subr.bf16.mxu1 %v3166_v25  ;;  %v3163_v25 = vld [vmem:[#allocation5 + $0x2c] ss:$16 sps:$4 sm:$0xff]  }
 0x14d   :  { %1995 = vmatpush1.bf16.msra.mxu0 %v3095_v6  ;;  %2036 = vmatpush1.bf16.msra.mxu1 %v3164_v24  ;;  %v3155_v24 = vld [vmem:[#allocation5 + $0x48] ss:$16 sps:$4 sm:$0xff]  }
 0x14e   :  { %1996 = vmatprep.subr.bf16.mxu0 %v3100_v9  ;;  %2037 = vmatprep.subr.bf16.mxu1 %v3172_v29  ;;  %v3175_v29 = vld [vmem:[#allocation5 + $0x1ec] ss:$16 sps:$4 sm:$0xff]  }
 0x151   :  { %1997 = vmatpush2.bf16.msra.mxu0 %v3098_v10  ;;  %2038 = vmatpush2.bf16.msra.mxu1 %v3170_v28  ;;  %v3133_v10 = vld [vmem:[#allocation5 + $0xcc] ss:$16 sps:$4 sm:$0xff]   ;;  %v3167_v28 = vld [vmem:[#allocation5 + $0x8] ss:$16 sps:$4 sm:$0xff]  }
 0x152   :  { %1998 = vmatprep.subr.bf16.mxu0 %v3103_v14  ;;  %2039 = vmatprep.subr.bf16.mxu1 %v3178_v33  ;;  %v3137_v14 = vld [vmem:[#allocation5 + $0xa8] ss:$16 sps:$4 sm:$0xff]   ;;  %v3187_v33 = vld [vmem:[#allocation5 + $0x1ac] ss:$16 sps:$4 sm:$0xff]  }
 0x155   :  { %1999 = vmatpush2.bf16.msra.mxu0 %v3101_v17  ;;  %2040 = vmatpush2.bf16.msra.mxu1 %v3176_v32  ;;  %v3145_v17 = vld [vmem:[#allocation5 + $0x8c] ss:$16 sps:$4 sm:$0xff]   ;;  %v3179_v32 = vld [vmem:[#allocation5 + $0x1c8] ss:$16 sps:$4 sm:$0xff]  }
 0x156   :  { %2000 = vmatprep.subr.bf16.mxu0 %v3106_v22  ;;  %2041 = vmatprep.subr.bf16.mxu1 %v3184_v37  ;;  %v3149_v22 = vld [vmem:[#allocation5 + $0x68] ss:$16 sps:$4 sm:$0xff]   ;;  %v3199_v37 = vld [vmem:[#allocation5 + $0x16c] ss:$16 sps:$4 sm:$0xff]  }
 0x159   :  { %2001 = vmatpush2.bf16.msra.mxu0 %v3104_v23  ;;  %2042 = vmatpush2.bf16.msra.mxu1 %v3182_v36  ;;  %v3157_v23 = vld [vmem:[#allocation5 + $0x4c] ss:$16 sps:$4 sm:$0xff]   ;;  %v3191_v36 = vld [vmem:[#allocation5 + $0x188] ss:$16 sps:$4 sm:$0xff]  }
 0x15a   :  { %2002 = vmatprep.subr.bf16.mxu0 %v3109_v26  ;;  %2043 = vmatprep.subr.bf16.mxu1 %v3190_v42  ;;  %v3161_v26 = vld [vmem:[#allocation5 + $0x28] ss:$16 sps:$4 sm:$0xff]  }
 0x15b   :  { %v3203_v42 = vld [vmem:[#allocation5 + $0x148] ss:$16 sps:$4 sm:$0xff]  }
 0x15d   :  { %2003 = vmatpush2.bf16.msra.mxu0 %v3107_v27  ;;  %2044 = vmatpush2.bf16.msra.mxu1 %v3188_v41  ;;  %v3169_v27 = vld [vmem:[#allocation5 + $0xc] ss:$16 sps:$4 sm:$0xff]   ;;  %v369_v41 = vrot.slane %v3482_v56, %v3458_v16 }
 0x15e   :  { %2004 = vmatprep.subr.bf16.mxu0 %v3112_v30  ;;  %2045 = vmatprep.subr.bf16.mxu1 %v3196_v47  ;;  %v3173_v30 = vld [vmem:[#allocation5 + $0x1e8] ss:$16 sps:$4 sm:$0xff]  }
 0x161   :  { %2005 = vmatpush2.bf16.msra.mxu0 %v3110_v31  ;;  %2046 = vmatpush2.bf16.msra.mxu1 %v3194_v46  ;;  %v3181_v31 = vld [vmem:[#allocation5 + $0x1cc] ss:$16 sps:$4 sm:$0xff]  }
 0x162   :  { %2006 = vmatprep.subr.bf16.mxu0 %v3115_v34  ;;  %2047 = vmatprep.subr.bf16.mxu1 %v3202_v50  ;;  %v3185_v34 = vld [vmem:[#allocation5 + $0x1a8] ss:$16 sps:$4 sm:$0xff]  }
 0x165   :  { %2007 = vmatpush2.bf16.msra.mxu0 %v3113_v35  ;;  %2048 = vmatpush2.bf16.msra.mxu1 %v3200_v49  ;;  %v3193_v35 = vld [vmem:[#allocation5 + $0x18c] ss:$16 sps:$4 sm:$0xff]   ;;  %v3209_v49 = vld [vmem:[#allocation5 + $0x128] ss:$16 sps:$4 sm:$0xff]  }
 0x166   :  { %2008 = vmatprep.subr.bf16.mxu0 %v3118_v39  ;;  %2049 = vmatprep.subr.bf16.mxu1 %v3208_v51  ;;  %v3197_v39 = vld [vmem:[#allocation5 + $0x168] ss:$16 sps:$4 sm:$0xff]  }
 0x169   :  { %2009 = vmatpush2.bf16.msra.mxu0 %v3116_v40  ;;  %2050 = vmatpush2.bf16.msra.mxu1 %v3206_v52  ;;  %v3205_v40 = vld [vmem:[#allocation5 + $0x14c] ss:$16 sps:$4 sm:$0xff]  }
 0x16a   :  { %2010 = vmatprep.subr.bf16.mxu0 %v3121_v43  ;;  %2051 = vmatprep.subr.bf16.mxu1 %v3214_v53  ;;  %v3211_v43 = vld [vmem:[#allocation5 + $0x12c] ss:$16 sps:$4 sm:$0xff]  }
 0x16b   :  { %v3217_v52 = vld [vmem:[#allocation5 + $0x10c] ss:$16 sps:$4 sm:$0xff]  }
 0x16d   :  { %2011 = vmatpush2.bf16.msra.mxu0 %v3119_v44  ;;  %2052 = vmatpush2.bf16.msra.mxu1 %v3212_v54  ;;  %v373_v44 = vrot.slane %v3482_v56, %v3465_v19 }
 0x16e   :  { %2062 = vmatprep.subr.bf16.mxu0 %v3127_v48  ;;  %2103 = vmatprep.subr.bf16.mxu1 %v3220_v55 }
 0x1b0   :  { %v1052_v59 = vpop.f32.mrf.mxu0  ;;  %v1093_v45 = vpop.f32.mrf.mxu1 }
 0x1b1   :  { %v1053_v60 = vadd.f32 %v1052_v59, %v361_v57  ;;  %v3215_v59 = vld [vmem:[#allocation5 + $0x108] ss:$16 sps:$4 sm:$0xff]  }
 0x1b2   :  { %v1054_v38 = vpop.f32.mrf.mxu0  ;;  %v1095_v61 = vpop.f32.mrf.mxu1 }
 0x1b3   :  { %v1094_v62 = vadd.f32 %v1093_v45, %v1053_v60  ;;  %v1055_v63 = vadd.f32 %v1054_v38, %v365_v58 }
 0x1b4   :  { %v1056_v0 = vpop.f32.mrf.mxu0  ;;  %v1097_v1 = vpop.f32.mrf.mxu1 }
 0x1b5   :  { %v1096_v2 = vadd.f32 %v1095_v61, %v1055_v63  ;;  %v1182_v3 = vmax.f32 %v1094_v62, 0.0  ;;  %v3218_v62 = vld [vmem:[#allocation5 + $0x2e8] ss:$16 sps:$4 sm:$0xff]   ;;  %v3223_v0 = vld [vmem:[#allocation5 + $0x2cc] ss:$16 sps:$4 sm:$0xff]  }
 0x1b6   :  { %v1057_v4 = vpop.f32.mrf.mxu0  ;;  %v1098_v5 = vpop.f32.mrf.mxu1  ;;  %v3221_v1 = vld [vmem:[#allocation5 + $0x2c8] ss:$16 sps:$4 sm:$0xff]  }
 0x1b7   :  { %v1183_v6 = vmax.f32 %v1096_v2, 0.0  ;;  %v3488_v9 = vpack.c.bf16 %v1182_v3, %v1182_v3  ;;  %v3226_v2 = vld [vmem:[#allocation5 + $0x2ac] ss:$16 sps:$4 sm:$0xff]   ;;  %v3224_v3 = vld [vmem:[#allocation5 + $0x2a8] ss:$16 sps:$4 sm:$0xff]  }
 0x1b8   :  { %v3229_v4 = vld [vmem:[#allocation5 + $0x28c] ss:$16 sps:$4 sm:$0xff]  }
 0x1b9   :  { %v1187_v7 = vpack.c.bf16 %v1183_v6, %v1183_v6  ;;  %v3266_v5 = vld [vmem:[%s3617_s7 + $0x78] sm:$0xff]  }
 0x1ba   :  { %v3267_v6 = vld [vmem:[%s3617_s7 + $0x38] sm:$0xff]  }
 0x1bb   :  { %2012 = vmatprep.mubr.bf16.mxu0 %v1187_v7 }
 0x1bc   :  { %2013 = vmatmul.mubr.bf16.vlgmr.msra.gmra.mxu0 %v3488_v9 }
 0x1bd   :  { %2063 = vmatpush1.bf16.msra.mxu0 %v3125_v8  ;;  %2094 = vmatprep.mubr.bf16.mxu0 %v1187_v7  ;;  %v3268_v7 = vld [vmem:[%s3617_s7 + $0x70] sm:$0xff]   ;;  %v3227_v8 = vld [vmem:[#allocation5 + $0x288] ss:$16 sps:$4 sm:$0xff]  }
 0x1be   :  { %2064 = vmatprep.subr.bf16.mxu0 %v3133_v10  ;;  %v3232_v10 = vld [vmem:[#allocation5 + $0x26c] ss:$16 sps:$4 sm:$0xff]  }
 0x1c1   :  { %2065 = vmatpush1.bf16.msra.mxu0 %v3131_v11  ;;  %v3270_v11 = vld [vmem:[%s3617_s7 + $0x68] sm:$0xff]  }
 0x1c2   :  { %2066 = vmatprep.subr.bf16.mxu0 %v3139_v12  ;;  %v3230_v12 = vld [vmem:[#allocation5 + $0x268] ss:$16 sps:$4 sm:$0xff]  }
 0x1c5   :  { %2067 = vmatpush1.bf16.msra.mxu0 %v3137_v14  ;;  %v3271_v14 = vld [vmem:[%s3617_s7 + $0x28] sm:$0xff]  }
 0x1c6   :  { %2068 = vmatprep.subr.bf16.mxu0 %v3145_v17  ;;  %v3235_v17 = vld [vmem:[#allocation5 + $0x24c] ss:$16 sps:$4 sm:$0xff]  }
 0x1c9   :  { %2069 = vmatpush1.bf16.msra.mxu0 %v3143_v20  ;;  %v3272_v20 = vld [vmem:[%s3617_s7 + $0x60] sm:$0xff]  }
 0x1ca   :  { %2070 = vmatprep.subr.bf16.mxu0 %v3151_v21  ;;  %v3233_v21 = vld [vmem:[#allocation5 + $0x248] ss:$16 sps:$4 sm:$0xff]  }
 0x1cd   :  { %2071 = vmatpush1.bf16.msra.mxu0 %v3149_v22  ;;  %v3273_v22 = vld [vmem:[%s3617_s7 + $0x20] sm:$0xff]  }
 0x1ce   :  { %2072 = vmatprep.subr.bf16.mxu0 %v3157_v23  ;;  %v3238_v23 = vld [vmem:[#allocation5 + $0x22c] ss:$16 sps:$4 sm:$0xff]  }
 0x1d1   :  { %2073 = vmatpush1.bf16.msra.mxu0 %v3155_v24  ;;  %v3274_v24 = vld [vmem:[%s3617_s7 + $0x58] sm:$0xff]  }
 0x1d2   :  { %2074 = vmatprep.subr.bf16.mxu0 %v3163_v25  ;;  %v3236_v25 = vld [vmem:[#allocation5 + $0x228] ss:$16 sps:$4 sm:$0xff]  }
 0x1d5   :  { %2075 = vmatpush1.bf16.msra.mxu0 %v3161_v26  ;;  %v3275_v26 = vld [vmem:[%s3617_s7 + $0x18] sm:$0xff]  }
 0x1d6   :  { %2076 = vmatprep.subr.bf16.mxu0 %v3169_v27  ;;  %v3241_v27 = vld [vmem:[#allocation5 + $0x20c] ss:$16 sps:$4 sm:$0xff]  }
 0x1d9   :  { %2077 = vmatpush1.bf16.msra.mxu0 %v3167_v28  ;;  %v3276_v28 = vld [vmem:[%s3617_s7 + $0x50] sm:$0xff]  }
 0x1da   :  { %2078 = vmatprep.subr.bf16.mxu0 %v3175_v29  ;;  %v3239_v29 = vld [vmem:[#allocation5 + $0x208] ss:$16 sps:$4 sm:$0xff]  }
 0x1dd   :  { %2079 = vmatpush2.bf16.msra.mxu0 %v3173_v30  ;;  %v3277_v30 = vld [vmem:[%s3617_s7 + $0x10] sm:$0xff]  }
 0x1de   :  { %2080 = vmatprep.subr.bf16.mxu0 %v3181_v31  ;;  %v3244_v31 = vld [vmem:[#allocation5 + $0x3ec] ss:$16 sps:$4 sm:$0xff]  }
 0x1e1   :  { %2081 = vmatpush2.bf16.msra.mxu0 %v3179_v32  ;;  %v3242_v32 = vld [vmem:[#allocation5 + $0x3e8] ss:$16 sps:$4 sm:$0xff]  }
 0x1e2   :  { %2082 = vmatprep.subr.bf16.mxu0 %v3187_v33  ;;  %v3247_v33 = vld [vmem:[#allocation5 + $0x3cc] ss:$16 sps:$4 sm:$0xff]  }
 0x1e5   :  { %2083 = vmatpush2.bf16.msra.mxu0 %v3185_v34  ;;  %v3245_v34 = vld [vmem:[#allocation5 + $0x3c8] ss:$16 sps:$4 sm:$0xff]  }
 0x1e6   :  { %2084 = vmatprep.subr.bf16.mxu0 %v3193_v35  ;;  %v3250_v35 = vld [vmem:[#allocation5 + $0x3ac] ss:$16 sps:$4 sm:$0xff]  }
 0x1e9   :  { %2085 = vmatpush2.bf16.msra.mxu0 %v3191_v36  ;;  %v3248_v36 = vld [vmem:[#allocation5 + $0x3a8] ss:$16 sps:$4 sm:$0xff]  }
 0x1ea   :  { %2086 = vmatprep.subr.bf16.mxu0 %v3199_v37  ;;  %v3253_v37 = vld [vmem:[#allocation5 + $0x38c] ss:$16 sps:$4 sm:$0xff]  }
 0x1ed   :  { %2087 = vmatpush2.bf16.msra.mxu0 %v3197_v39  ;;  %v3251_v39 = vld [vmem:[#allocation5 + $0x388] ss:$16 sps:$4 sm:$0xff]  }
 0x1ee   :  { %2088 = vmatprep.subr.bf16.mxu0 %v3205_v40  ;;  %v3256_v40 = vld [vmem:[#allocation5 + $0x36c] ss:$16 sps:$4 sm:$0xff]  }
 0x1f0   :  { %v1134_v46 = vpop.f32.mrf.mxu0  ;;  %v1175_v47 = vpop.f32.mrf.mxu1 }
 0x1f1   :  { %v1135_v48 = vadd.f32 %v1134_v46, %v369_v41  ;;  %2089 = vmatpush2.bf16.msra.mxu0 %v3203_v42  ;;  %v3254_v41 = vld [vmem:[#allocation5 + $0x368] ss:$16 sps:$4 sm:$0xff]   ;;  %v3259_v42 = vld [vmem:[#allocation5 + $0x34c] ss:$16 sps:$4 sm:$0xff]  }
 0x1f2   :  { %v1136_v50 = vpop.f32.mrf.mxu0  ;;  %v1177_v51 = vpop.f32.mrf.mxu1  ;;  %2090 = vmatprep.subr.bf16.mxu0 %v3211_v43  ;;  %v3257_v43 = vld [vmem:[#allocation5 + $0x348] ss:$16 sps:$4 sm:$0xff]  }
 0x1f3   :  { %v1176_v53 = vadd.f32 %v1175_v47, %v1135_v48  ;;  %v1137_v54 = vadd.f32 %v1136_v50, %v373_v44  ;;  %v3262_v44 = vld [vmem:[#allocation5 + $0x32c] ss:$16 sps:$4 sm:$0xff]   ;;  %v3260_v46 = vld [vmem:[#allocation5 + $0x328] ss:$16 sps:$4 sm:$0xff]  }
 0x1f4   :  { %v1138_v55 = vpop.f32.mrf.mxu0  ;;  %v1179_v57 = vpop.f32.mrf.mxu1  ;;  %v3265_v47 = vld [vmem:[#allocation5 + $0x30c] ss:$16 sps:$4 sm:$0xff]   ;;  %v3263_v48 = vld [vmem:[#allocation5 + $0x308] ss:$16 sps:$4 sm:$0xff]  }
 0x1f5   :  { %v1178_v58 = vadd.f32 %v1177_v51, %v1137_v54  ;;  %2091 = vmatpush2.bf16.msra.mxu0 %v3209_v49  ;;  %v1184_v45 = vmax.f32 %v1176_v53, 0.0  ;;  %v3278_v49 = vld [vmem:[%s3617_s7 + $0x48] sm:$0xff]   ;;  %v3280_v51 = vld [vmem:[%s3617_s7 + $0x40] sm:$0xff]   ;;  %v3282_v53 = vld [vmem:[%s3617_s7 + $0xf8] sm:$0xff]  }
 0x1f6   :  { %v1139_v60 = vpop.f32.mrf.mxu0  ;;  %v1180_v38 = vpop.f32.mrf.mxu1  ;;  %2092 = vmatprep.subr.bf16.mxu0 %v3217_v52  ;;  %v3279_v50 = vld [vmem:[%s3617_s7 + $0x8] sm:$0xff]   ;;  %v3281_v52 = vld [vmem:[%s3617_s7] sm:$0xff]   ;;  %v3283_v54 = vld [vmem:[%s3617_s7 + $0xb8] sm:$0xff]  }
 0x1f7   :  { %v1185_v56 = vmax.f32 %v1178_v58, 0.0  ;;  %v3495_v63 = vpack.c.bf16 %v1184_v45, %v1184_v45  ;;  %v3284_v55 = vld [vmem:[%s3617_s7 + $0xf0] sm:$0xff]   ;;  %v3286_v58 = vld [vmem:[%s3617_s7 + $0xe8] sm:$0xff]   ;;  %v3288_v45 = vld [vmem:[%s3617_s7 + $0xe0] sm:$0xff]  }
 0x1f8   :  { %v3285_v57 = vld [vmem:[%s3617_s7 + $0xb0] sm:$0xff]   ;;  %v3289_v60 = vld [vmem:[%s3617_s7 + $0xa0] sm:$0xff]   ;;  %v3290_v38 = vld [vmem:[%s3617_s7 + $0xd8] sm:$0xff]  }
 0x1f9   :  { %v1189_v61 = vpack.c.bf16 %v1185_v56, %v1185_v56  ;;  %2093 = vmatpush2.bf16.msra.mxu0 %v3215_v59  ;;  %v3287_v59 = vld [vmem:[%s3617_s7 + $0xa8] sm:$0xff]   ;;  %v3291_v56 = vld [vmem:[%s3617_s7 + $0x98] sm:$0xff]  }
 0x1fa   :  { %2820 = vmatprep.subr.bf16.mxu0 %v3266_v5  ;;  %v3297_v5 = vld [vmem:[%s3617_s7 + $0x80] sm:$0xff]  }
 0x1fb   :  { %2053 = vmatprep.mubr.bf16.mxu1 %v1189_v61 }
 0x1fc   :  { %2054 = vmatmul.mubr.bf16.vlgmr.msra.gmra.mxu1 %v3495_v63  ;;  %2095 = vmatmul.mubr.bf16.vlgmr.msra.gmra.mxu0 %v3488_v9  ;;  %v3269_v9 = vld [vmem:[%s3617_s7 + $0x30] sm:$0xff]  }
 0x1fd   :  { %2104 = vmatpush1.bf16.msra.mxu1 %v3218_v62  ;;  %2135 = vmatprep.mubr.bf16.mxu1 %v1189_v61  ;;  %v3292_v61 = vld [vmem:[%s3617_s7 + $0xd0] sm:$0xff]  }
 0x1fe   :  { %2105 = vmatprep.subr.bf16.mxu1 %v3223_v0  ;;  %2821 = vmatpush3.bf16.msra.mxu0 %v3267_v6  ;;  %v3293_v62 = vld [vmem:[%s3617_s7 + $0x90] sm:$0xff]   ;;  %v3294_v0 = vld [vmem:[%s3617_s7 + $0xc8] sm:$0xff]  }
 0x1ff   :  { %2822 = vmatprep.subr.bf16.mxu0 %v3268_v7  ;;  %v1318_v7 = vld [vmem:[%s3616_s6] sm:$0xf] }
 0x201   :  { %2106 = vmatpush1.bf16.msra.mxu1 %v3221_v1  ;;  %v3295_v1 = vld [vmem:[%s3617_s7 + $0x88] sm:$0xff]  }
 0x202   :  { %2107 = vmatprep.subr.bf16.mxu1 %v3226_v2  ;;  %2823 = vmatpush3.bf16.msra.mxu0 %v3269_v9  ;;  %v1327_v9 = vrot.slane %v1318_v7, %v3463_v18  ;;  %v1335_v18 = vrot.slane %v1318_v7, %v3465_v19  ;;  %v2787_v19 = vld [vmem:[%s3618_s8] ss:$0 sm:$0xff]  ;;  %s3340_s8 = scalar_lea.vmem %s2512_s27, 128 }
 0x203   :  { %2824 = vmatprep.subr.bf16.mxu0 %v3270_v11  ;;  %p3341_p10 = scmp.ne.s32.totalorder %s2512_s27, %s3340_s8  ;;  %p3346_p12 = scmp.lt.s32.totalorder %s3340_s8, %s3340_s8 }
 0x205   :  { %2108 = vmatpush1.bf16.msra.mxu1 %v3224_v3  ;;  %p3347_p13 = por %p3346_p12, %p3345_p11 }
 0x206   :  { %2109 = vmatprep.subr.bf16.mxu1 %v3229_v4  ;;  %2825 = vmatpush3.bf16.msra.mxu0 %v3271_v14  ;;  %v3296_v4 = vld [vmem:[%s3617_s7 + $0xc0] sm:$0xff]  }
 0x207   :  { %2826 = vmatprep.subr.bf16.mxu0 %v3272_v20  ;;  %p3348_p0 = pnand %p3347_p13, %p3341_p10 }
 0x209   :  { %2110 = vmatpush1.bf16.msra.mxu1 %v3227_v8  ;;  %v1323_v8 = vrot.slane %v1318_v7, %v3456_v15  ;;  %v1331_v15 = vrot.slane %v1318_v7, %v3458_v16 }
 0x20a   :  { %2111 = vmatprep.subr.bf16.mxu1 %v3232_v10  ;;  %2827 = vmatpush3.bf16.msra.mxu0 %v3273_v22 }
 0x20b   :  { %2828 = vmatprep.subr.bf16.mxu0 %v3274_v24 }
 0x20d   :  { %2112 = vmatpush1.bf16.msra.mxu1 %v3230_v12 }
 0x20e   :  { %2113 = vmatprep.subr.bf16.mxu1 %v3235_v17  ;;  %2829 = vmatpush3.bf16.msra.mxu0 %v3275_v26 }
 0x20f   :  { %2830 = vmatprep.subr.bf16.mxu0 %v3276_v28 }
 0x211   :  { %2114 = vmatpush1.bf16.msra.mxu1 %v3233_v21 }
 0x212   :  { %2115 = vmatprep.subr.bf16.mxu1 %v3238_v23  ;;  %2831 = vmatpush3.bf16.msra.mxu0 %v3277_v30 }
 0x213   :  { %2832 = vmatprep.subr.bf16.mxu0 %v3278_v49 }
 0x215   :  { %2116 = vmatpush1.bf16.msra.mxu1 %v3236_v25 }
 0x216   :  { %2117 = vmatprep.subr.bf16.mxu1 %v3241_v27  ;;  %2833 = vmatpush3.bf16.msra.mxu0 %v3279_v50 }
 0x217   :  { %2834 = vmatprep.subr.bf16.mxu0 %v3280_v51 }
 0x219   :  { %2118 = vmatpush1.bf16.msra.mxu1 %v3239_v29 }
 0x21a   :  { %2119 = vmatprep.subr.bf16.mxu1 %v3244_v31  ;;  %2835 = vmatpush3.bf16.msra.mxu0 %v3281_v52 }
 0x21d   :  { %2120 = vmatpush2.bf16.msra.mxu1 %v3242_v32 }
 0x21e   :  { %2121 = vmatprep.subr.bf16.mxu1 %v3247_v33 }
 0x221   :  { %2122 = vmatpush2.bf16.msra.mxu1 %v3245_v34 }
 0x222   :  { %2123 = vmatprep.subr.bf16.mxu1 %v3250_v35 }
 0x225   :  { %2124 = vmatpush2.bf16.msra.mxu1 %v3248_v36 }
 0x226   :  { %2125 = vmatprep.subr.bf16.mxu1 %v3253_v37 }
 0x229   :  { %2126 = vmatpush2.bf16.msra.mxu1 %v3251_v39 }
 0x22a   :  { %2127 = vmatprep.subr.bf16.mxu1 %v3256_v40 }
 0x22d   :  { %2128 = vmatpush2.bf16.msra.mxu1 %v3254_v41 }
 0x22e   :  { %2129 = vmatprep.subr.bf16.mxu1 %v3259_v42 }
 0x231   :  { %2130 = vmatpush2.bf16.msra.mxu1 %v3257_v43 }
 0x232   :  { %2131 = vmatprep.subr.bf16.mxu1 %v3262_v44 }
 0x235   :  { %2132 = vmatpush2.bf16.msra.mxu1 %v3260_v46 }
 0x236   :  { %2133 = vmatprep.subr.bf16.mxu1 %v3265_v47 }
 0x239   :  { %2134 = vmatpush2.bf16.msra.mxu1 %v3263_v48 }
 0x23a   :  { %2842 = vmatprep.subr.bf16.mxu1 %v3282_v53 }
 0x23c   :  { %2136 = vmatmul.mubr.bf16.vlgmr.msra.gmra.mxu1 %v3495_v63 }
 0x23d   :  { %2843 = vmatpush3.bf16.msra.mxu1 %v3283_v54 }
 0x23e   :  { %2844 = vmatprep.subr.bf16.mxu1 %v3284_v55 }
 0x241   :  { %2845 = vmatpush3.bf16.msra.mxu1 %v3285_v57 }
 0x242   :  { %2846 = vmatprep.subr.bf16.mxu1 %v3286_v58 }
 0x245   :  { %2847 = vmatpush3.bf16.msra.mxu1 %v3287_v59 }
 0x246   :  { %2848 = vmatprep.subr.bf16.mxu1 %v3288_v45  ;;  %v2496_v45 = vand.u32 127, %v74_v13 }
 0x248   :  { %vm2501_vm1 = vcmp.lt.s32.totalorder %v2496_v45, 8 }
 0x249   :  { %2849 = vmatpush3.bf16.msra.mxu1 %v3289_v60 }
 0x24a   :  { %2850 = vmatprep.subr.bf16.mxu1 %v3290_v38 }
 0x24d   :  { %2851 = vmatpush3.bf16.msra.mxu1 %v3291_v56 }
 0x24e   :  { %2852 = vmatprep.subr.bf16.mxu1 %v3292_v61 }
 0x251   :  { %2853 = vmatpush3.bf16.msra.mxu1 %v3293_v62 }
 0x252   :  { %2854 = vmatprep.subr.bf16.mxu1 %v3294_v0 }
 0x255   :  { %2855 = vmatpush3.bf16.msra.mxu1 %v3295_v1 }
 0x256   :  { %2856 = vmatprep.subr.bf16.mxu1 %v3296_v4 }
 0x259   :  { %2857 = vmatpush3.bf16.msra.mxu1 %v3297_v5 }
 0x27c   :  { %v2014_v63 = vpop.f32.mrf.mxu0 }
 0x27d   :  { %v2015_v10 = vadd.f32 %v2014_v63, %v1323_v8 }
 0x27e   :  { %v2016_v2 = vpop.f32.mrf.mxu0 }
 0x27f   :  { %v2017_v14 = vadd.f32 %v2016_v2, %v1327_v9 }
 0x280   :  { %v2018_v3 = vpop.f32.mrf.mxu0 }
 0x282   :  { %v2019_v6 = vpop.f32.mrf.mxu0 }
 0x2bc   :  { %v2055_v11 = vpop.f32.mrf.mxu1  ;;  %v2096_v12 = vpop.f32.mrf.mxu0 }
 0x2bd   :  { %v2056_v17 = vadd.f32 %v2055_v11, %v2015_v10  ;;  %v2097_v31 = vadd.f32 %v2096_v12, %v1331_v15 }
 0x2be   :  { %v2057_v20 = vpop.f32.mrf.mxu1  ;;  %v2098_v21 = vpop.f32.mrf.mxu0 }
 0x2bf   :  { %v2058_v22 = vadd.f32 %v2057_v20, %v2017_v14  ;;  %v2144_v23 = vmax.f32 %v2056_v17, 0.0  ;;  %v2099_v33 = vadd.f32 %v2098_v21, %v1335_v18 }
 0x2c0   :  { %v2059_v24 = vpop.f32.mrf.mxu1  ;;  %v2100_v25 = vpop.f32.mrf.mxu0 }
 0x2c1   :  { %v2145_v26 = vmax.f32 %v2058_v22, 0.0  ;;  %v2148_v30 = vpack.c.bf16 %v2144_v23, %v2144_v23 }
 0x2c2   :  { %v2060_v27 = vpop.f32.mrf.mxu1  ;;  %v2101_v28 = vpop.f32.mrf.mxu0 }
 0x2c3   :  { %v2149_v29 = vpack.c.bf16 %v2145_v26, %v2145_v26 }
 0x2c5   :  { %2447 = vmatprep.mubr.bf16.mxu0 %v2149_v29 }
 0x2c6   :  { %2448 = vmatmul.mubr.bf16.vlgmr.msra.gmra.mxu0 %v2148_v30 }
 0x2fc   :  { %v2137_v32 = vpop.f32.mrf.mxu1 }
 0x2fd   :  { %v2138_v34 = vadd.f32 %v2137_v32, %v2097_v31 }
 0x2fe   :  { %v2139_v35 = vpop.f32.mrf.mxu1 }
 0x2ff   :  { %v2140_v36 = vadd.f32 %v2139_v35, %v2099_v33  ;;  %v2146_v37 = vmax.f32 %v2138_v34, 0.0 }
 0x300   :  { %v2141_v39 = vpop.f32.mrf.mxu1 }
 0x301   :  { %v2147_v40 = vmax.f32 %v2140_v36, 0.0  ;;  %v2150_v43 = vpack.c.bf16 %v2146_v37, %v2146_v37 }
 0x302   :  { %v2142_v41 = vpop.f32.mrf.mxu1 }
 0x303   :  { %v2151_v42 = vpack.c.bf16 %v2147_v40, %v2147_v40 }
 0x305   :  { %2487 = vmatprep.mubr.bf16.mxu1 %v2151_v42 }
 0x306   :  { %2488 = vmatmul.mubr.bf16.vlgmr.msra.gmra.mxu1 %v2150_v43 }
 0x386   :  { %v2836_v44 = vpop.f32.mrf.mxu0 }
 0x388   :  { %v2837_v46 = vpop.f32.mrf.mxu0 }
 0x389   :  { %v2838_v48 = vadd.f32 %v2837_v46, %v2836_v44 }
 0x38a   :  { %v2839_v47 = vpop.f32.mrf.mxu0 }
 0x38b   :  { %v2450_v51 = vadd.f32 %v2838_v48, %v2787_v19 }
 0x38c   :  { %v2840_v16 = vpop.f32.mrf.mxu0 }
 0x3c6   :  { %v2858_v49 = vpop.f32.mrf.mxu1 }
 0x3c8   :  { %v2859_v50 = vpop.f32.mrf.mxu1 }
 0x3c9   :  { %v2860_v52 = vadd.f32 %v2859_v50, %v2858_v49 }
 0x3ca   :  { %v2861_v53 = vpop.f32.mrf.mxu1 }
 0x3cb   :  { %v2490_v54 = vadd.f32 %v2860_v52, %v2450_v51 }
 0x3cc   :  { %v2862_v55 = vpop.f32.mrf.mxu1 }
 0x3cd   :  { %v2497_v57 = vmax.f32 %v2490_v54, -20.0 }
 0x3cf   :  { %v2498_v58 = vmin.f32 %v2497_v57, 2.0 }
 0x3d1   :  { %v2499_v59 = vmul.f32 1.442695, %v2498_v58 }
 0x3d3   :  { %3298 = vpow2.f32 %v2499_v59 }
 0x3e0   :  { %v3299_v60 = vpop.eup %3298 }
 0x3e1   :  { %v2502_v38 = vsel %vm2501_vm1, %v2490_v54, %v3299_v60 }
 0x3e2   :  { %2504 = vst.msk [vmem:[#allocation7] sm:$0xff] %vm2503_vm2, %v2502_v38 }
 0x3e3   :  { %3351 = shalt.err (!%p3348_p0)
}
 0x3e4   :  { %2514 = dma.vmem_to_hbm [thread:$0]  %s2512_s27, 128, %s3619_s9, [#allocation4]  }
 0x3e5   :  { %3364 = dma.done.wait [#allocation4], 128  }
 0x3e6   :  { %3365 = vsyncadd [#allocation4], 4294967168 }
 0x3e7   :  { %2518 = vsyncpa [#allocation3], 1 }
 0x3e8   :  { %2519 = vsyncpa [#allocation6], 1 }
 0x3e9   :  { %2520 = vsyncpa [#allocation4], 1 }

// kernel: tpu_custom_call.1
= control target key start
LH: loop header
LB: loop body
LE: loop exit
PB: predicated region body
PF: predicated region fallthrough
CT: control target
= control target key end

     0   :  { %14 = vsyncpa [#allocation3], 0  ;;  %s3610_s0 = inlined_call_operand.vmem [shape: f32[8,32], index: 0, kind: input, shape index: {}]   ;;  %s3611_s1 = inlined_call_operand.vmem [shape: bf16[32,512], index: 1, kind: input, shape index: {}]   ;;  %s3612_s2 = inlined_call_operand.vmem [shape: f32[1,512], index: 2, kind: input, shape index: {}]   ;;  %s3613_s3 = inlined_call_operand.hbm [shape: bf16[512,512], index: 3, kind: input, shape index: {}]   ;;  %s3614_s4 = inlined_call_operand.vmem [shape: f32[1,512], index: 4, kind: input, shape index: {}]   ;;  %s3615_s5 = inlined_call_operand.hbm [shape: bf16[512,512], index: 5, kind: input, shape index: {}]   ;;  %s3616_s6 = inlined_call_operand.vmem [shape: f32[1,512], index: 6, kind: input, shape index: {}]   ;;  %s3617_s7 = inlined_call_operand.vmem [shape: bf16[512,16], index: 7, kind: input, shape index: {}]   ;;  %s3618_s8 = inlined_call_operand.vmem [shape: f32[1,16], index: 8, kind: input, shape index: {}]   ;;  %s3619_s9 = inlined_call_operand.hbm [shape: f32[8,16], index: 9, kind: output, shape index: {}]  }
   0x1   :  { %15 = vsyncpa [#allocation6], 0 }
   0x2   :  { %16 = vsyncpa [#allocation4], 0  ;;  %s3366_s30 = smov [#allocation2]  }
   0x3   :  { %s28_s10 = sshll.u32 %s3366_s30, 4  ;;  %s29_s10 = int_to_ptr.vmem [resolvable:$true] %s28_s10 }
   0x4   :  { %s3308_s11 = scalar_lea.vmem %s29_s10, 16384  ;;  %p3313_p1 = scmp.lt.s32.totalorder %s29_s10, %s29_s10 }
   0x5   :  { %p3309_p0 = scmp.ne.s32.totalorder %s29_s10, %s3308_s11  ;;  %p3314_p2 = scmp.lt.s32.totalorder %s3308_s11, %s3308_s11 }
   0x7   :  { %p3315_p3 = por %p3314_p2, %p3313_p1 }
   0x9   :  { %p3316_p4 = pnand %p3315_p3, %p3309_p0 }
   0xb   :  { %3319 = shalt.err (!%p3316_p4)
}
   0xc   :  { %s3367_s12 = smov 256   ;;  %s3368_s13 = smov 16  }
   0xd   :  { %34 = dma.hbm_to_vmem [thread:$0]  %s3613_s3, 16384, %s29_s10, [#allocation3], %s3367_s12, %s3367_s12, %s3368_s13  }
   0xe   :  { %s3369_s16 = smov [#allocation5]  }
   0xf   :  { %s42_s17 = sshll.u32 %s3369_s16, 4  ;;  %s43_s17 = int_to_ptr.vmem [resolvable:$true] %s42_s17 }
  0x10   :  { %s3328_s18 = scalar_lea.vmem %s43_s17, 16384  ;;  %p3333_p6 = scmp.lt.s32.totalorder %s43_s17, %s43_s17 }
  0x11   :  { %p3329_p5 = scmp.ne.s32.totalorder %s43_s17, %s3328_s18  ;;  %p3334_p7 = scmp.lt.s32.totalorder %s3328_s18, %s3328_s18 }
  0x13   :  { %p3335_p8 = por %p3334_p7, %p3333_p6 }
  0x15   :  { %p3336_p9 = pnand %p3335_p8, %p3329_p5 }
  0x17   :  { %3339 = shalt.err (!%p3336_p9)
}
  0x18   :  { %48 = dma.hbm_to_vmem [thread:$0]  %s3615_s5, 16384, %s43_s17, [#allocation6], %s3367_s12, %s3367_s12, %s3368_s13  }
  0x19   :  { %3360 = dma.done.wait [#allocation3], 16384  }
  0x1a   :  { %3361 = vsyncadd [#allocation3], 4294950912 }
  0x1b   :  { %3362 = dma.done.wait [#allocation6], 16384  }
  0x1c   :  { %3363 = vsyncadd [#allocation6], 4294950912  ;;  %v3370_v0 = vmov 0   ;;  %v2870_v1 = vld [vmem:[%s3611_s1 + $0x24] ss:$16 sps:$4 sm:$0xff]   ;;  %vm134_vm0 = vcmask 261120  }
  0x1d   :  { %170 = vmatprep.mubr.bf16.mxu0 %v3370_v0  ;;  %211 = vmatprep.mubr.bf16.mxu1 %v3370_v0  ;;  %v2872_v2 = vld [vmem:[%s3611_s1 + $0x2c] ss:$16 sps:$4 sm:$0xff]   ;;  %v2874_v3 = vld [vmem:[%s3611_s1 + $0x20] ss:$16 sps:$4 sm:$0xff]   ;;  %v2875_v4 = vld [vmem:[%s3611_s1 + $0x28] ss:$16 sps:$4 sm:$0xff]  }
  0x1e   :  { %150 = vmatprep.subr.bf16.mxu0 %v2870_v1  ;;  %191 = vmatprep.subr.bf16.mxu1 %v2872_v2  ;;  %v2876_v5 = vld [vmem:[%s3611_s1 + $0x4] ss:$16 sps:$4 sm:$0xff]   ;;  %v2878_v6 = vld [vmem:[%s3611_s1 + $0xc] ss:$16 sps:$4 sm:$0xff]   ;;  %v2880_v7 = vld [vmem:[%s3611_s1] ss:$16 sps:$4 sm:$0xff]  }
  0x1f   :  { %151 = vmatpush1.bf16.msra.mxu0 %v2874_v3  ;;  %192 = vmatpush1.bf16.msra.mxu1 %v2875_v4  ;;  %v2881_v8 = vld [vmem:[%s3611_s1 + $0x8] ss:$16 sps:$4 sm:$0xff]   ;;  %v62_v9 = vld [vmem:[%s3610_s0] sm:$0xff]  ;;  %s3371_s26 = smov [#allocation7]   ;;  %vm2503_vm2 = vcmask 130048  }
  0x20   :  { %152 = vmatprep.subr.bf16.mxu0 %v2876_v5  ;;  %193 = vmatprep.subr.bf16.mxu1 %v2878_v6  ;;  %v2882_v10 = vld [vmem:[#allocation2 + $0xe0] ss:$16 sps:$4 sm:$0xff]   ;;  %v2884_v11 = vld [vmem:[#allocation2 + $0xe4] ss:$16 sps:$4 sm:$0xff]   ;;  %v63_v12 = vpack.c.bf16 %v62_v9, %v62_v9  ;;  %s2511_s27 = sshll.u32 %s3371_s26, 4  ;;  %s2512_s27 = int_to_ptr.vmem [resolvable:$true] %s2511_s27 }
  0x21   :  { %v2885_v13 = vld [vmem:[#allocation2 + $0x2e0] ss:$16 sps:$4 sm:$0xff]   ;;  %v2887_v14 = vld [vmem:[#allocation2 + $0x2e4] ss:$16 sps:$4 sm:$0xff]   ;;  %p3345_p11 = scmp.lt.s32.totalorder %s2512_s27, %s2512_s27 }
  0x22   :  { %v2890_v15 = vld [vmem:[#allocation2 + $0xc4] ss:$16 sps:$4 sm:$0xff]   ;;  %v2888_v17 = vld [vmem:[#allocation2 + $0xc0] ss:$16 sps:$4 sm:$0xff]  }
  0x23   :  { %153 = vmatpush1.bf16.msra.mxu0 %v2880_v7  ;;  %194 = vmatpush1.bf16.msra.mxu1 %v2881_v8  ;;  %v2893_v16 = vld [vmem:[#allocation2 + $0x2c4] ss:$16 sps:$4 sm:$0xff]   ;;  %v2891_v18 = vld [vmem:[#allocation2 + $0x2c0] ss:$16 sps:$4 sm:$0xff]  }
  0x24   :  { %1018 = vmatprep.subr.bf16.mxu0 %v2884_v11  ;;  %1059 = vmatprep.subr.bf16.mxu1 %v2887_v14  ;;  %v2896_v19 = vld [vmem:[#allocation2 + $0xa4] ss:$16 sps:$4 sm:$0xff]   ;;  %v2894_v21 = vld [vmem:[#allocation2 + $0xa0] ss:$16 sps:$4 sm:$0xff]   ;;  %v2980_v11 = vld [vmem:[#allocation2 + $0xec] ss:$16 sps:$4 sm:$0xff]  }
  0x25   :  { %v2899_v20 = vld [vmem:[#allocation2 + $0x2a4] ss:$16 sps:$4 sm:$0xff]   ;;  %v2897_v22 = vld [vmem:[#allocation2 + $0x2a0] ss:$16 sps:$4 sm:$0xff]  }
  0x26   :  { %2529 = vmatmul.mubr.msk.bf16.vlgmr.msra.gmra.mxu0 %vm134_vm0, %v63_v12  ;;  %2530 = vmatmul.mubr.msk.bf16.vlgmr.msra.gmra.mxu1 %vm134_vm0, %v63_v12  ;;  %v2902_v23 = vld [vmem:[#allocation2 + $0x84] ss:$16 sps:$4 sm:$0xff]   ;;  %v2900_v25 = vld [vmem:[#allocation2 + $0x80] ss:$16 sps:$4 sm:$0xff]   ;;  %v2983_v12 = vld [vmem:[#allocation2 + $0x2ec] ss:$16 sps:$4 sm:$0xff]  }
  0x27   :  { %1019 = vmatpush1.bf16.msra.mxu0 %v2882_v10  ;;  %1060 = vmatpush1.bf16.msra.mxu1 %v2885_v13  ;;  %v2905_v24 = vld [vmem:[#allocation2 + $0x284] ss:$16 sps:$4 sm:$0xff]   ;;  %v2903_v26 = vld [vmem:[#allocation2 + $0x280] ss:$16 sps:$4 sm:$0xff]   ;;  %v74_v13 = vlaneseq }
  0x28   :  { %1020 = vmatprep.subr.bf16.mxu0 %v2890_v15  ;;  %1061 = vmatprep.subr.bf16.mxu1 %v2893_v16  ;;  %v2908_v27 = vld [vmem:[#allocation2 + $0x64] ss:$16 sps:$4 sm:$0xff]   ;;  %v2906_v29 = vld [vmem:[#allocation2 + $0x60] ss:$16 sps:$4 sm:$0xff]  }
  0x29   :  { %v2911_v28 = vld [vmem:[#allocation2 + $0x264] ss:$16 sps:$4 sm:$0xff]   ;;  %v2909_v30 = vld [vmem:[#allocation2 + $0x260] ss:$16 sps:$4 sm:$0xff]   ;;  %v75_v14 = vshrl.u32 %v74_v13, 7 }
  0x2a   :  { %v2914_v31 = vld [vmem:[#allocation2 + $0x44] ss:$16 sps:$4 sm:$0xff]   ;;  %v2912_v33 = vld [vmem:[#allocation2 + $0x40] ss:$16 sps:$4 sm:$0xff]  }
  0x2b   :  { %1021 = vmatpush1.bf16.msra.mxu0 %v2888_v17  ;;  %1062 = vmatpush1.bf16.msra.mxu1 %v2891_v18  ;;  %v2917_v32 = vld [vmem:[#allocation2 + $0x244] ss:$16 sps:$4 sm:$0xff]   ;;  %v2915_v34 = vld [vmem:[#allocation2 + $0x240] ss:$16 sps:$4 sm:$0xff]   ;;  %v3456_v15 = vsub.s32 0, %v75_v14  ;;  %v3458_v16 = vsub.s32 2, %v75_v14 }
  0x2c   :  { %1022 = vmatprep.subr.bf16.mxu0 %v2896_v19  ;;  %1063 = vmatprep.subr.bf16.mxu1 %v2899_v20  ;;  %v2920_v35 = vld [vmem:[#allocation2 + $0x24] ss:$16 sps:$4 sm:$0xff]   ;;  %v2918_v37 = vld [vmem:[#allocation2 + $0x20] ss:$16 sps:$4 sm:$0xff]   ;;  %v3463_v18 = vsub.s32 1, %v75_v14  ;;  %v3465_v19 = vsub.s32 3, %v75_v14 }
  0x2d   :  { %v2923_v36 = vld [vmem:[#allocation2 + $0x224] ss:$16 sps:$4 sm:$0xff]   ;;  %v2921_v38 = vld [vmem:[#allocation2 + $0x220] ss:$16 sps:$4 sm:$0xff]   ;;  %v3029_v14 = vld [vmem:[#allocation2 + $0x3e8] ss:$16 sps:$4 sm:$0xff]  }
  0x2e   :  { %v2926_v39 = vld [vmem:[#allocation2 + $0x4] ss:$16 sps:$4 sm:$0xff]   ;;  %v2924_v41 = vld [vmem:[#allocation2] ss:$16 sps:$4 sm:$0xff]  }
  0x2f   :  { %1023 = vmatpush1.bf16.msra.mxu0 %v2894_v21  ;;  %1064 = vmatpush1.bf16.msra.mxu1 %v2897_v22  ;;  %v2929_v40 = vld [vmem:[#allocation2 + $0x204] ss:$16 sps:$4 sm:$0xff]   ;;  %v2927_v42 = vld [vmem:[#allocation2 + $0x200] ss:$16 sps:$4 sm:$0xff]  }
  0x30   :  { %1024 = vmatprep.subr.bf16.mxu0 %v2902_v23  ;;  %1065 = vmatprep.subr.bf16.mxu1 %v2905_v24  ;;  %v2932_v43 = vld [vmem:[#allocation2 + $0x1e4] ss:$16 sps:$4 sm:$0xff]   ;;  %v2930_v45 = vld [vmem:[#allocation2 + $0x1e0] ss:$16 sps:$4 sm:$0xff]  }
  0x31   :  { %v2935_v44 = vld [vmem:[#allocation2 + $0x3e4] ss:$16 sps:$4 sm:$0xff]   ;;  %v2933_v46 = vld [vmem:[#allocation2 + $0x3e0] ss:$16 sps:$4 sm:$0xff]  }
  0x32   :  { %v2938_v47 = vld [vmem:[#allocation2 + $0x1c4] ss:$16 sps:$4 sm:$0xff]   ;;  %v2936_v49 = vld [vmem:[#allocation2 + $0x1c0] ss:$16 sps:$4 sm:$0xff]  }
  0x33   :  { %1025 = vmatpush1.bf16.msra.mxu0 %v2900_v25  ;;  %1066 = vmatpush1.bf16.msra.mxu1 %v2903_v26  ;;  %v2941_v48 = vld [vmem:[#allocation2 + $0x3c4] ss:$16 sps:$4 sm:$0xff]   ;;  %v2939_v50 = vld [vmem:[#allocation2 + $0x3c0] ss:$16 sps:$4 sm:$0xff]  }
  0x34   :  { %1026 = vmatprep.subr.bf16.mxu0 %v2908_v27  ;;  %1067 = vmatprep.subr.bf16.mxu1 %v2911_v28  ;;  %v2944_v51 = vld [vmem:[#allocation2 + $0x1a4] ss:$16 sps:$4 sm:$0xff]   ;;  %v2942_v53 = vld [vmem:[#allocation2 + $0x1a0] ss:$16 sps:$4 sm:$0xff]  }
  0x35   :  { %v2947_v52 = vld [vmem:[#allocation2 + $0x3a4] ss:$16 sps:$4 sm:$0xff]   ;;  %v2945_v54 = vld [vmem:[#allocation2 + $0x3a0] ss:$16 sps:$4 sm:$0xff]  }
  0x36   :  { %v2950_v55 = vld [vmem:[#allocation2 + $0x184] ss:$16 sps:$4 sm:$0xff]   ;;  %v2948_v57 = vld [vmem:[#allocation2 + $0x180] ss:$16 sps:$4 sm:$0xff]  }
  0x37   :  { %1027 = vmatpush1.bf16.msra.mxu0 %v2906_v29  ;;  %1068 = vmatpush1.bf16.msra.mxu1 %v2909_v30  ;;  %v2953_v56 = vld [vmem:[#allocation2 + $0x384] ss:$16 sps:$4 sm:$0xff]   ;;  %v2951_v58 = vld [vmem:[#allocation2 + $0x380] ss:$16 sps:$4 sm:$0xff]  }
  0x38   :  { %1028 = vmatprep.subr.bf16.mxu0 %v2914_v31  ;;  %1069 = vmatprep.subr.bf16.mxu1 %v2917_v32  ;;  %v2956_v59 = vld [vmem:[#allocation2 + $0x164] ss:$16 sps:$4 sm:$0xff]   ;;  %v2954_v61 = vld [vmem:[#allocation2 + $0x160] ss:$16 sps:$4 sm:$0xff]  }
  0x39   :  { %v2959_v60 = vld [vmem:[#allocation2 + $0x364] ss:$16 sps:$4 sm:$0xff]   ;;  %v2957_v62 = vld [vmem:[#allocation2 + $0x360] ss:$16 sps:$4 sm:$0xff]  }
  0x3a   :  { %v2962_v63 = vld [vmem:[#allocation2 + $0x144] ss:$16 sps:$4 sm:$0xff]   ;;  %v2960_v1 = vld [vmem:[#allocation2 + $0x140] ss:$16 sps:$4 sm:$0xff]  }
  0x3b   :  { %1029 = vmatpush1.bf16.msra.mxu0 %v2912_v33  ;;  %1070 = vmatpush1.bf16.msra.mxu1 %v2915_v34  ;;  %v2965_v0 = vld [vmem:[#allocation2 + $0x344] ss:$16 sps:$4 sm:$0xff]   ;;  %v2963_v2 = vld [vmem:[#allocation2 + $0x340] ss:$16 sps:$4 sm:$0xff]  }
  0x3c   :  { %1030 = vmatprep.subr.bf16.mxu0 %v2920_v35  ;;  %1071 = vmatprep.subr.bf16.mxu1 %v2923_v36  ;;  %v2968_v3 = vld [vmem:[#allocation2 + $0x124] ss:$16 sps:$4 sm:$0xff]   ;;  %v2966_v5 = vld [vmem:[#allocation2 + $0x120] ss:$16 sps:$4 sm:$0xff]  }
  0x3d   :  { %v2971_v4 = vld [vmem:[#allocation2 + $0x324] ss:$16 sps:$4 sm:$0xff]   ;;  %v2969_v6 = vld [vmem:[#allocation2 + $0x320] ss:$16 sps:$4 sm:$0xff]  }
  0x3e   :  { %v2974_v7 = vld [vmem:[#allocation2 + $0x104] ss:$16 sps:$4 sm:$0xff]   ;;  %v2972_v9 = vld [vmem:[#allocation2 + $0x100] ss:$16 sps:$4 sm:$0xff]  }
  0x3f   :  { %1031 = vmatpush1.bf16.msra.mxu0 %v2918_v37  ;;  %1072 = vmatpush1.bf16.msra.mxu1 %v2921_v38  ;;  %v2977_v8 = vld [vmem:[#allocation2 + $0x304] ss:$16 sps:$4 sm:$0xff]   ;;  %v2975_v10 = vld [vmem:[#allocation2 + $0x300] ss:$16 sps:$4 sm:$0xff]  }
  0x40   :  { %1032 = vmatprep.subr.bf16.mxu0 %v2926_v39  ;;  %1073 = vmatprep.subr.bf16.mxu1 %v2929_v40  ;;  %v72_v17 = vld [vmem:[%s3612_s2] sm:$0xf] }
  0x41   :  { %v77_v20 = vrot.slane %v72_v17, %v3456_v15  ;;  %v85_v21 = vrot.slane %v72_v17, %v3458_v16  ;;  %v81_v22 = vrot.slane %v72_v17, %v3463_v18  ;;  %v89_v23 = vrot.slane %v72_v17, %v3465_v19  ;;  %v3034_v17 = vld [vmem:[#allocation2 + $0x1cc] ss:$16 sps:$4 sm:$0xff]  }
  0x43   :  { %1033 = vmatpush1.bf16.msra.mxu0 %v2924_v41  ;;  %1074 = vmatpush1.bf16.msra.mxu1 %v2927_v42 }
  0x44   :  { %1034 = vmatprep.subr.bf16.mxu0 %v2932_v43  ;;  %1075 = vmatprep.subr.bf16.mxu1 %v2935_v44  ;;  %v2978_v43 = vld [vmem:[#allocation2 + $0xe8] ss:$16 sps:$4 sm:$0xff]  }
  0x45   :  { %v2981_v44 = vld [vmem:[#allocation2 + $0x2e8] ss:$16 sps:$4 sm:$0xff]  }
  0x47   :  { %1035 = vmatpush2.bf16.msra.mxu0 %v2930_v45  ;;  %1076 = vmatpush2.bf16.msra.mxu1 %v2933_v46  ;;  %v2986_v46 = vld [vmem:[#allocation2 + $0xcc] ss:$16 sps:$4 sm:$0xff]  }
  0x48   :  { %1036 = vmatprep.subr.bf16.mxu0 %v2938_v47  ;;  %1077 = vmatprep.subr.bf16.mxu1 %v2941_v48  ;;  %v2989_v47 = vld [vmem:[#allocation2 + $0x2cc] ss:$16 sps:$4 sm:$0xff]   ;;  %v2984_v48 = vld [vmem:[#allocation2 + $0xc8] ss:$16 sps:$4 sm:$0xff]  }
  0x4b   :  { %1037 = vmatpush2.bf16.msra.mxu0 %v2936_v49  ;;  %1078 = vmatpush2.bf16.msra.mxu1 %v2939_v50  ;;  %v2987_v49 = vld [vmem:[#allocation2 + $0x2c8] ss:$16 sps:$4 sm:$0xff]   ;;  %v2992_v50 = vld [vmem:[#allocation2 + $0xac] ss:$16 sps:$4 sm:$0xff]  }
  0x4c   :  { %1038 = vmatprep.subr.bf16.mxu0 %v2944_v51  ;;  %1079 = vmatprep.subr.bf16.mxu1 %v2947_v52  ;;  %v2995_v51 = vld [vmem:[#allocation2 + $0x2ac] ss:$16 sps:$4 sm:$0xff]   ;;  %v2990_v52 = vld [vmem:[#allocation2 + $0xa8] ss:$16 sps:$4 sm:$0xff]  }
  0x4f   :  { %1039 = vmatpush2.bf16.msra.mxu0 %v2942_v53  ;;  %1080 = vmatpush2.bf16.msra.mxu1 %v2945_v54  ;;  %v2993_v53 = vld [vmem:[#allocation2 + $0x2a8] ss:$16 sps:$4 sm:$0xff]   ;;  %v2998_v54 = vld [vmem:[#allocation2 + $0x8c] ss:$16 sps:$4 sm:$0xff]  }
  0x50   :  { %1040 = vmatprep.subr.bf16.mxu0 %v2950_v55  ;;  %1081 = vmatprep.subr.bf16.mxu1 %v2953_v56  ;;  %v3001_v55 = vld [vmem:[#allocation2 + $0x28c] ss:$16 sps:$4 sm:$0xff]   ;;  %v2996_v56 = vld [vmem:[#allocation2 + $0x88] ss:$16 sps:$4 sm:$0xff]  }
  0x53   :  { %1041 = vmatpush2.bf16.msra.mxu0 %v2948_v57  ;;  %1082 = vmatpush2.bf16.msra.mxu1 %v2951_v58  ;;  %v2999_v57 = vld [vmem:[#allocation2 + $0x288] ss:$16 sps:$4 sm:$0xff]   ;;  %v3004_v58 = vld [vmem:[#allocation2 + $0x6c] ss:$16 sps:$4 sm:$0xff]  }
  0x54   :  { %1042 = vmatprep.subr.bf16.mxu0 %v2956_v59  ;;  %1083 = vmatprep.subr.bf16.mxu1 %v2959_v60  ;;  %v3007_v59 = vld [vmem:[#allocation2 + $0x26c] ss:$16 sps:$4 sm:$0xff]   ;;  %v3002_v60 = vld [vmem:[#allocation2 + $0x68] ss:$16 sps:$4 sm:$0xff]  }
  0x57   :  { %1043 = vmatpush2.bf16.msra.mxu0 %v2954_v61  ;;  %1084 = vmatpush2.bf16.msra.mxu1 %v2957_v62  ;;  %v3005_v61 = vld [vmem:[#allocation2 + $0x268] ss:$16 sps:$4 sm:$0xff]   ;;  %v3010_v62 = vld [vmem:[#allocation2 + $0x4c] ss:$16 sps:$4 sm:$0xff]  }
  0x58   :  { %1044 = vmatprep.subr.bf16.mxu0 %v2962_v63  ;;  %1085 = vmatprep.subr.bf16.mxu1 %v2965_v0  ;;  %v3013_v63 = vld [vmem:[#allocation2 + $0x24c] ss:$16 sps:$4 sm:$0xff]   ;;  %v3008_v0 = vld [vmem:[#allocation2 + $0x48] ss:$16 sps:$4 sm:$0xff]  }
  0x5b   :  { %1045 = vmatpush2.bf16.msra.mxu0 %v2960_v1  ;;  %1086 = vmatpush2.bf16.msra.mxu1 %v2963_v2  ;;  %v3011_v1 = vld [vmem:[#allocation2 + $0x248] ss:$16 sps:$4 sm:$0xff]   ;;  %v3016_v2 = vld [vmem:[#allocation2 + $0x2c] ss:$16 sps:$4 sm:$0xff]  }
  0x5c   :  { %1046 = vmatprep.subr.bf16.mxu0 %v2968_v3  ;;  %1087 = vmatprep.subr.bf16.mxu1 %v2971_v4  ;;  %v3019_v3 = vld [vmem:[#allocation2 + $0x22c] ss:$16 sps:$4 sm:$0xff]   ;;  %v3014_v4 = vld [vmem:[#allocation2 + $0x28] ss:$16 sps:$4 sm:$0xff]  }
  0x5f   :  { %1047 = vmatpush2.bf16.msra.mxu0 %v2966_v5  ;;  %1088 = vmatpush2.bf16.msra.mxu1 %v2969_v6  ;;  %v3017_v5 = vld [vmem:[#allocation2 + $0x228] ss:$16 sps:$4 sm:$0xff]   ;;  %v3022_v6 = vld [vmem:[#allocation2 + $0xc] ss:$16 sps:$4 sm:$0xff]  }
  0x60   :  { %1048 = vmatprep.subr.bf16.mxu0 %v2974_v7  ;;  %1089 = vmatprep.subr.bf16.mxu1 %v2977_v8  ;;  %v3025_v7 = vld [vmem:[#allocation2 + $0x20c] ss:$16 sps:$4 sm:$0xff]   ;;  %v3020_v8 = vld [vmem:[#allocation2 + $0x8] ss:$16 sps:$4 sm:$0xff]  }
  0x63   :  { %1049 = vmatpush2.bf16.msra.mxu0 %v2972_v9  ;;  %1090 = vmatpush2.bf16.msra.mxu1 %v2975_v10  ;;  %v3023_v9 = vld [vmem:[#allocation2 + $0x208] ss:$16 sps:$4 sm:$0xff]   ;;  %v3028_v10 = vld [vmem:[#allocation2 + $0x1ec] ss:$16 sps:$4 sm:$0xff]  }
  0x64   :  { %1100 = vmatprep.subr.bf16.mxu0 %v2980_v11  ;;  %1141 = vmatprep.subr.bf16.mxu1 %v2983_v12  ;;  %v3031_v11 = vld [vmem:[#allocation2 + $0x3ec] ss:$16 sps:$4 sm:$0xff]   ;;  %v3026_v12 = vld [vmem:[#allocation2 + $0x1e8] ss:$16 sps:$4 sm:$0xff]  }
  0xe6   :  { %v172_v24 = vpop.f32.mrf.mxu0  ;;  %v213_v25 = vpop.f32.mrf.mxu1 }
  0xe7   :  { %v173_v26 = vadd.f32 %v172_v24, %v77_v20  ;;  %v214_v27 = vadd.f32 %v213_v25, %v85_v21  ;;  %v3037_v20 = vld [vmem:[#allocation2 + $0x3cc] ss:$16 sps:$4 sm:$0xff]   ;;  %v3032_v21 = vld [vmem:[#allocation2 + $0x1c8] ss:$16 sps:$4 sm:$0xff]  }
  0xe8   :  { %v174_v28 = vpop.f32.mrf.mxu0  ;;  %v215_v29 = vpop.f32.mrf.mxu1  ;;  %v3043_v24 = vld [vmem:[#allocation2 + $0x3ac] ss:$16 sps:$4 sm:$0xff]   ;;  %v3038_v25 = vld [vmem:[#allocation2 + $0x1a8] ss:$16 sps:$4 sm:$0xff]  }
  0xe9   :  { %v222_v30 = vmax.f32 %v214_v27, 0.0  ;;  %v175_v31 = vadd.f32 %v174_v28, %v81_v22  ;;  %v216_v32 = vadd.f32 %v215_v29, %v89_v23  ;;  %v220_v33 = vmax.f32 %v173_v26, 0.0  ;;  %v3035_v22 = vld [vmem:[#allocation2 + $0x3c8] ss:$16 sps:$4 sm:$0xff]   ;;  %v3040_v23 = vld [vmem:[#allocation2 + $0x1ac] ss:$16 sps:$4 sm:$0xff]  }
  0xea   :  { %v176_v34 = vpop.f32.mrf.mxu0  ;;  %v217_v35 = vpop.f32.mrf.mxu1  ;;  %v3041_v26 = vld [vmem:[#allocation2 + $0x3a8] ss:$16 sps:$4 sm:$0xff]   ;;  %v3046_v27 = vld [vmem:[#allocation2 + $0x18c] ss:$16 sps:$4 sm:$0xff]  }
  0xeb   :  { %v221_v36 = vmax.f32 %v175_v31, 0.0  ;;  %v223_v37 = vmax.f32 %v216_v32, 0.0  ;;  %v3471_v38 = vpack.c.bf16 %v222_v30, %v222_v30  ;;  %v3473_v45 = vpack.c.bf16 %v220_v33, %v220_v33  ;;  %v3049_v28 = vld [vmem:[#allocation2 + $0x38c] ss:$16 sps:$4 sm:$0xff]   ;;  %v3044_v29 = vld [vmem:[#allocation2 + $0x188] ss:$16 sps:$4 sm:$0xff]  }
  0xec   :  { %v177_v39 = vpop.f32.mrf.mxu0  ;;  %v218_v40 = vpop.f32.mrf.mxu1  ;;  %v3047_v30 = vld [vmem:[#allocation2 + $0x388] ss:$16 sps:$4 sm:$0xff]   ;;  %v3052_v31 = vld [vmem:[#allocation2 + $0x16c] ss:$16 sps:$4 sm:$0xff]  }
  0xed   :  { %v225_v41 = vpack.c.bf16 %v221_v36, %v221_v36  ;;  %v227_v42 = vpack.c.bf16 %v223_v37, %v223_v37  ;;  %v3055_v32 = vld [vmem:[#allocation2 + $0x36c] ss:$16 sps:$4 sm:$0xff]   ;;  %v3050_v33 = vld [vmem:[#allocation2 + $0x168] ss:$16 sps:$4 sm:$0xff]  }
  0xee   :  { %v3053_v34 = vld [vmem:[#allocation2 + $0x368] ss:$16 sps:$4 sm:$0xff]   ;;  %v3058_v35 = vld [vmem:[#allocation2 + $0x14c] ss:$16 sps:$4 sm:$0xff]  }
  0xef   :  { %1050 = vmatprep.mubr.bf16.mxu0 %v225_v41  ;;  %1091 = vmatprep.mubr.bf16.mxu1 %v227_v42  ;;  %v3061_v36 = vld [vmem:[#allocation2 + $0x34c] ss:$16 sps:$4 sm:$0xff]   ;;  %v3056_v37 = vld [vmem:[#allocation2 + $0x148] ss:$16 sps:$4 sm:$0xff]  }
  0xf0   :  { %1051 = vmatmul.mubr.bf16.vlgmr.msra.gmra.mxu0 %v3473_v45  ;;  %1092 = vmatmul.mubr.bf16.vlgmr.msra.gmra.mxu1 %v3471_v38  ;;  %v3059_v39 = vld [vmem:[#allocation2 + $0x348] ss:$16 sps:$4 sm:$0xff]   ;;  %v3064_v40 = vld [vmem:[#allocation2 + $0x12c] ss:$16 sps:$4 sm:$0xff]  }
  0xf1   :  { %1101 = vmatpush1.bf16.msra.mxu0 %v2978_v43  ;;  %1142 = vmatpush1.bf16.msra.mxu1 %v2981_v44  ;;  %v3065_v43 = vld [vmem:[#allocation2 + $0x328] ss:$16 sps:$4 sm:$0xff]   ;;  %v3070_v44 = vld [vmem:[#allocation2 + $0x10c] ss:$16 sps:$4 sm:$0xff]  }
  0xf2   :  { %1132 = vmatprep.mubr.bf16.mxu0 %v225_v41  ;;  %1173 = vmatprep.mubr.bf16.mxu1 %v227_v42  ;;  %v3067_v41 = vld [vmem:[#allocation2 + $0x32c] ss:$16 sps:$4 sm:$0xff]   ;;  %v3062_v42 = vld [vmem:[#allocation2 + $0x128] ss:$16 sps:$4 sm:$0xff]  }
  0xf3   :  { %1102 = vmatprep.subr.bf16.mxu0 %v2986_v46  ;;  %1143 = vmatprep.subr.bf16.mxu1 %v2989_v47  ;;  %v3073_v46 = vld [vmem:[#allocation2 + $0x30c] ss:$16 sps:$4 sm:$0xff]   ;;  %v3068_v47 = vld [vmem:[#allocation2 + $0x108] ss:$16 sps:$4 sm:$0xff]  }
  0xf5   :  { %1103 = vmatpush1.bf16.msra.mxu0 %v2984_v48  ;;  %1144 = vmatpush1.bf16.msra.mxu1 %v2987_v49  ;;  %v3071_v48 = vld [vmem:[#allocation2 + $0x308] ss:$16 sps:$4 sm:$0xff]   ;;  %v3076_v49 = vld [vmem:[#allocation5 + $0xe4] ss:$16 sps:$4 sm:$0xff]  }
  0xf6   :  { %1104 = vmatprep.subr.bf16.mxu0 %v2992_v50  ;;  %1145 = vmatprep.subr.bf16.mxu1 %v2995_v51  ;;  %v3074_v50 = vld [vmem:[#allocation5 + $0xe0] ss:$16 sps:$4 sm:$0xff]   ;;  %v3079_v51 = vld [vmem:[#allocation5 + $0xc4] ss:$16 sps:$4 sm:$0xff]  }
  0xf9   :  { %1105 = vmatpush1.bf16.msra.mxu0 %v2990_v52  ;;  %1146 = vmatpush1.bf16.msra.mxu1 %v2993_v53  ;;  %v3077_v52 = vld [vmem:[#allocation5 + $0xc0] ss:$16 sps:$4 sm:$0xff]   ;;  %v3082_v53 = vld [vmem:[#allocation5 + $0xa4] ss:$16 sps:$4 sm:$0xff]  }
  0xfa   :  { %1106 = vmatprep.subr.bf16.mxu0 %v2998_v54  ;;  %1147 = vmatprep.subr.bf16.mxu1 %v3001_v55  ;;  %v3080_v54 = vld [vmem:[#allocation5 + $0xa0] ss:$16 sps:$4 sm:$0xff]   ;;  %v3085_v55 = vld [vmem:[#allocation5 + $0x84] ss:$16 sps:$4 sm:$0xff]  }
  0xfd   :  { %1107 = vmatpush1.bf16.msra.mxu0 %v2996_v56  ;;  %1148 = vmatpush1.bf16.msra.mxu1 %v2999_v57  ;;  %v3083_v56 = vld [vmem:[#allocation5 + $0x80] ss:$16 sps:$4 sm:$0xff]  }
  0xfe   :  { %1108 = vmatprep.subr.bf16.mxu0 %v3004_v58  ;;  %1149 = vmatprep.subr.bf16.mxu1 %v3007_v59  ;;  %v3122_v57 = vld [vmem:[#allocation5 + $0x2e0] ss:$16 sps:$4 sm:$0xff]   ;;  %v3124_v58 = vld [vmem:[#allocation5 + $0x2e4] ss:$16 sps:$4 sm:$0xff]  }
  0xff   :  { %v3088_v59 = vld [vmem:[#allocation5 + $0x64] ss:$16 sps:$4 sm:$0xff]  }
 0x101   :  { %1109 = vmatpush1.bf16.msra.mxu0 %v3002_v60  ;;  %1150 = vmatpush1.bf16.msra.mxu1 %v3005_v61  ;;  %v3128_v60 = vld [vmem:[#allocation5 + $0x2c0] ss:$16 sps:$4 sm:$0xff]   ;;  %v3091_v61 = vld [vmem:[#allocation5 + $0x44] ss:$16 sps:$4 sm:$0xff]  }
 0x102   :  { %1110 = vmatprep.subr.bf16.mxu0 %v3010_v62  ;;  %1151 = vmatprep.subr.bf16.mxu1 %v3013_v63  ;;  %v3089_v62 = vld [vmem:[#allocation5 + $0x40] ss:$16 sps:$4 sm:$0xff]  }
 0x103   :  { %v3134_v63 = vld [vmem:[#allocation5 + $0x2a0] ss:$16 sps:$4 sm:$0xff]  }
 0x105   :  { %1111 = vmatpush1.bf16.msra.mxu0 %v3008_v0  ;;  %1152 = vmatpush1.bf16.msra.mxu1 %v3011_v1  ;;  %v3136_v0 = vld [vmem:[#allocation5 + $0x2a4] ss:$16 sps:$4 sm:$0xff]  }
 0x106   :  { %1112 = vmatprep.subr.bf16.mxu0 %v3016_v2  ;;  %1153 = vmatprep.subr.bf16.mxu1 %v3019_v3  ;;  %v3094_v1 = vld [vmem:[#allocation5 + $0x24] ss:$16 sps:$4 sm:$0xff]   ;;  %v3092_v2 = vld [vmem:[#allocation5 + $0x20] ss:$16 sps:$4 sm:$0xff]  }
 0x107   :  { %v3140_v3 = vld [vmem:[#allocation5 + $0x280] ss:$16 sps:$4 sm:$0xff]  }
 0x109   :  { %1113 = vmatpush1.bf16.msra.mxu0 %v3014_v4  ;;  %1154 = vmatpush1.bf16.msra.mxu1 %v3017_v5  ;;  %v3142_v4 = vld [vmem:[#allocation5 + $0x284] ss:$16 sps:$4 sm:$0xff]  }
 0x10a   :  { %1114 = vmatprep.subr.bf16.mxu0 %v3022_v6  ;;  %1155 = vmatprep.subr.bf16.mxu1 %v3025_v7  ;;  %v3097_v5 = vld [vmem:[#allocation5 + $0x4] ss:$16 sps:$4 sm:$0xff]   ;;  %v3095_v6 = vld [vmem:[#allocation5] ss:$16 sps:$4 sm:$0xff]  }
 0x10b   :  { %v3146_v7 = vld [vmem:[#allocation5 + $0x260] ss:$16 sps:$4 sm:$0xff]  }
 0x10d   :  { %1115 = vmatpush1.bf16.msra.mxu0 %v3020_v8  ;;  %1156 = vmatpush1.bf16.msra.mxu1 %v3023_v9  ;;  %v3148_v8 = vld [vmem:[#allocation5 + $0x264] ss:$16 sps:$4 sm:$0xff]  }
 0x10e   :  { %1116 = vmatprep.subr.bf16.mxu0 %v3028_v10  ;;  %1157 = vmatprep.subr.bf16.mxu1 %v3031_v11  ;;  %v3100_v9 = vld [vmem:[#allocation5 + $0x1e4] ss:$16 sps:$4 sm:$0xff]   ;;  %v3098_v10 = vld [vmem:[#allocation5 + $0x1e0] ss:$16 sps:$4 sm:$0xff]  }
 0x10f   :  { %v3152_v11 = vld [vmem:[#allocation5 + $0x240] ss:$16 sps:$4 sm:$0xff]  }
 0x111   :  { %1117 = vmatpush2.bf16.msra.mxu0 %v3026_v12  ;;  %1158 = vmatpush2.bf16.msra.mxu1 %v3029_v14  ;;  %v3154_v12 = vld [vmem:[#allocation5 + $0x244] ss:$16 sps:$4 sm:$0xff]  }
 0x112   :  { %1118 = vmatprep.subr.bf16.mxu0 %v3034_v17  ;;  %1159 = vmatprep.subr.bf16.mxu1 %v3037_v20  ;;  %v3103_v14 = vld [vmem:[#allocation5 + $0x1c4] ss:$16 sps:$4 sm:$0xff]   ;;  %v3101_v17 = vld [vmem:[#allocation5 + $0x1c0] ss:$16 sps:$4 sm:$0xff]  }
 0x113   :  { %v3158_v20 = vld [vmem:[#allocation5 + $0x220] ss:$16 sps:$4 sm:$0xff]  }
 0x115   :  { %1119 = vmatpush2.bf16.msra.mxu0 %v3032_v21  ;;  %1160 = vmatpush2.bf16.msra.mxu1 %v3035_v22  ;;  %v3160_v21 = vld [vmem:[#allocation5 + $0x224] ss:$16 sps:$4 sm:$0xff]  }
 0x116   :  { %1120 = vmatprep.subr.bf16.mxu0 %v3040_v23  ;;  %1161 = vmatprep.subr.bf16.mxu1 %v3043_v24  ;;  %v3106_v22 = vld [vmem:[#allocation5 + $0x1a4] ss:$16 sps:$4 sm:$0xff]   ;;  %v3104_v23 = vld [vmem:[#allocation5 + $0x1a0] ss:$16 sps:$4 sm:$0xff]  }
 0x117   :  { %v3164_v24 = vld [vmem:[#allocation5 + $0x200] ss:$16 sps:$4 sm:$0xff]  }
 0x119   :  { %1121 = vmatpush2.bf16.msra.mxu0 %v3038_v25  ;;  %1162 = vmatpush2.bf16.msra.mxu1 %v3041_v26  ;;  %v3166_v25 = vld [vmem:[#allocation5 + $0x204] ss:$16 sps:$4 sm:$0xff]  }
 0x11a   :  { %1122 = vmatprep.subr.bf16.mxu0 %v3046_v27  ;;  %1163 = vmatprep.subr.bf16.mxu1 %v3049_v28  ;;  %v3109_v26 = vld [vmem:[#allocation5 + $0x184] ss:$16 sps:$4 sm:$0xff]   ;;  %v3107_v27 = vld [vmem:[#allocation5 + $0x180] ss:$16 sps:$4 sm:$0xff]  }
 0x11b   :  { %v3170_v28 = vld [vmem:[#allocation5 + $0x3e0] ss:$16 sps:$4 sm:$0xff]  }
 0x11d   :  { %1123 = vmatpush2.bf16.msra.mxu0 %v3044_v29  ;;  %1164 = vmatpush2.bf16.msra.mxu1 %v3047_v30  ;;  %v3172_v29 = vld [vmem:[#allocation5 + $0x3e4] ss:$16 sps:$4 sm:$0xff]  }
 0x11e   :  { %1124 = vmatprep.subr.bf16.mxu0 %v3052_v31  ;;  %1165 = vmatprep.subr.bf16.mxu1 %v3055_v32  ;;  %v3112_v30 = vld [vmem:[#allocation5 + $0x164] ss:$16 sps:$4 sm:$0xff]   ;;  %v3110_v31 = vld [vmem:[#allocation5 + $0x160] ss:$16 sps:$4 sm:$0xff]  }
 0x11f   :  { %v3176_v32 = vld [vmem:[#allocation5 + $0x3c0] ss:$16 sps:$4 sm:$0xff]  }
 0x121   :  { %1125 = vmatpush2.bf16.msra.mxu0 %v3050_v33  ;;  %1166 = vmatpush2.bf16.msra.mxu1 %v3053_v34  ;;  %v3178_v33 = vld [vmem:[#allocation5 + $0x3c4] ss:$16 sps:$4 sm:$0xff]  }
 0x122   :  { %1126 = vmatprep.subr.bf16.mxu0 %v3058_v35  ;;  %1167 = vmatprep.subr.bf16.mxu1 %v3061_v36  ;;  %v3115_v34 = vld [vmem:[#allocation5 + $0x144] ss:$16 sps:$4 sm:$0xff]   ;;  %v3113_v35 = vld [vmem:[#allocation5 + $0x140] ss:$16 sps:$4 sm:$0xff]  }
 0x123   :  { %v3182_v36 = vld [vmem:[#allocation5 + $0x3a0] ss:$16 sps:$4 sm:$0xff]  }
 0x125   :  { %1127 = vmatpush2.bf16.msra.mxu0 %v3056_v37  ;;  %1168 = vmatpush2.bf16.msra.mxu1 %v3059_v39  ;;  %v3184_v37 = vld [vmem:[#allocation5 + $0x3a4] ss:$16 sps:$4 sm:$0xff]  }
 0x126   :  { %1128 = vmatprep.subr.bf16.mxu0 %v3064_v40  ;;  %1169 = vmatprep.subr.bf16.mxu1 %v3067_v41  ;;  %v3118_v39 = vld [vmem:[#allocation5 + $0x124] ss:$16 sps:$4 sm:$0xff]   ;;  %v3116_v40 = vld [vmem:[#allocation5 + $0x120] ss:$16 sps:$4 sm:$0xff]  }
 0x127   :  { %v3188_v41 = vld [vmem:[#allocation5 + $0x380] ss:$16 sps:$4 sm:$0xff]  }
 0x129   :  { %1129 = vmatpush2.bf16.msra.mxu0 %v3062_v42  ;;  %1170 = vmatpush2.bf16.msra.mxu1 %v3065_v43  ;;  %v3190_v42 = vld [vmem:[#allocation5 + $0x384] ss:$16 sps:$4 sm:$0xff]  }
 0x12a   :  { %1130 = vmatprep.subr.bf16.mxu0 %v3070_v44  ;;  %1171 = vmatprep.subr.bf16.mxu1 %v3073_v46  ;;  %v3121_v43 = vld [vmem:[#allocation5 + $0x104] ss:$16 sps:$4 sm:$0xff]   ;;  %v3119_v44 = vld [vmem:[#allocation5 + $0x100] ss:$16 sps:$4 sm:$0xff]  }
 0x12b   :  { %v3194_v46 = vld [vmem:[#allocation5 + $0x360] ss:$16 sps:$4 sm:$0xff]  }
 0x12d   :  { %1131 = vmatpush2.bf16.msra.mxu0 %v3068_v47  ;;  %1172 = vmatpush2.bf16.msra.mxu1 %v3071_v48  ;;  %v3196_v47 = vld [vmem:[#allocation5 + $0x364] ss:$16 sps:$4 sm:$0xff]   ;;  %v3127_v48 = vld [vmem:[#allocation5 + $0xec] ss:$16 sps:$4 sm:$0xff]  }
 0x12e   :  { %1980 = vmatprep.subr.bf16.mxu0 %v3076_v49  ;;  %2021 = vmatprep.subr.bf16.mxu1 %v3124_v58  ;;  %v3200_v49 = vld [vmem:[#allocation5 + $0x340] ss:$16 sps:$4 sm:$0xff]  }
 0x130   :  { %1133 = vmatmul.mubr.bf16.vlgmr.msra.gmra.mxu0 %v3473_v45  ;;  %1174 = vmatmul.mubr.bf16.vlgmr.msra.gmra.mxu1 %v3471_v38  ;;  %v3086_v45 = vld [vmem:[#allocation5 + $0x60] ss:$16 sps:$4 sm:$0xff]   ;;  %v3130_v38 = vld [vmem:[#allocation5 + $0x2c4] ss:$16 sps:$4 sm:$0xff]  }
 0x131   :  { %1981 = vmatpush1.bf16.msra.mxu0 %v3074_v50  ;;  %2022 = vmatpush1.bf16.msra.mxu1 %v3122_v57  ;;  %v3202_v50 = vld [vmem:[#allocation5 + $0x344] ss:$16 sps:$4 sm:$0xff]  }
 0x132   :  { %1982 = vmatprep.subr.bf16.mxu0 %v3079_v51  ;;  %2023 = vmatprep.subr.bf16.mxu1 %v3130_v38  ;;  %v3208_v51 = vld [vmem:[#allocation5 + $0x324] ss:$16 sps:$4 sm:$0xff]  }
 0x135   :  { %1983 = vmatpush1.bf16.msra.mxu0 %v3077_v52  ;;  %2024 = vmatpush1.bf16.msra.mxu1 %v3128_v60  ;;  %v3206_v52 = vld [vmem:[#allocation5 + $0x320] ss:$16 sps:$4 sm:$0xff]  }
 0x136   :  { %1984 = vmatprep.subr.bf16.mxu0 %v3082_v53  ;;  %2025 = vmatprep.subr.bf16.mxu1 %v3136_v0  ;;  %v3214_v53 = vld [vmem:[#allocation5 + $0x304] ss:$16 sps:$4 sm:$0xff]  }
 0x139   :  { %1985 = vmatpush1.bf16.msra.mxu0 %v3080_v54  ;;  %2026 = vmatpush1.bf16.msra.mxu1 %v3134_v63  ;;  %v3212_v54 = vld [vmem:[#allocation5 + $0x300] ss:$16 sps:$4 sm:$0xff]  }
 0x13a   :  { %1986 = vmatprep.subr.bf16.mxu0 %v3085_v55  ;;  %2027 = vmatprep.subr.bf16.mxu1 %v3142_v4  ;;  %v3220_v55 = vld [vmem:[#allocation5 + $0x2ec] ss:$16 sps:$4 sm:$0xff]  }
 0x13d   :  { %1987 = vmatpush1.bf16.msra.mxu0 %v3083_v56  ;;  %2028 = vmatpush1.bf16.msra.mxu1 %v3140_v3  ;;  %v3482_v56 = vld [vmem:[%s3614_s4] sm:$0xf] }
 0x13e   :  { %1988 = vmatprep.subr.bf16.mxu0 %v3088_v59  ;;  %2029 = vmatprep.subr.bf16.mxu1 %v3148_v8  ;;  %v361_v57 = vrot.slane %v3482_v56, %v3456_v15  ;;  %v365_v58 = vrot.slane %v3482_v56, %v3463_v18  ;;  %v3125_v8 = vld [vmem:[#allocation5 + $0xe8] ss:$16 sps:$4 sm:$0xff]  }
 0x141   :  { %1989 = vmatpush1.bf16.msra.mxu0 %v3086_v45  ;;  %2030 = vmatpush1.bf16.msra.mxu1 %v3146_v7 }
 0x142   :  { %1990 = vmatprep.subr.bf16.mxu0 %v3091_v61  ;;  %2031 = vmatprep.subr.bf16.mxu1 %v3154_v12  ;;  %v3139_v12 = vld [vmem:[#allocation5 + $0xac] ss:$16 sps:$4 sm:$0xff]  }
 0x145   :  { %1991 = vmatpush1.bf16.msra.mxu0 %v3089_v62  ;;  %2032 = vmatpush1.bf16.msra.mxu1 %v3152_v11  ;;  %v3131_v11 = vld [vmem:[#allocation5 + $0xc8] ss:$16 sps:$4 sm:$0xff]  }
 0x146   :  { %1992 = vmatprep.subr.bf16.mxu0 %v3094_v1  ;;  %2033 = vmatprep.subr.bf16.mxu1 %v3160_v21  ;;  %v3151_v21 = vld [vmem:[#allocation5 + $0x6c] ss:$16 sps:$4 sm:$0xff]  }
 0x149   :  { %1993 = vmatpush1.bf16.msra.mxu0 %v3092_v2  ;;  %2034 = vmatpush1.bf16.msra.mxu1 %v3158_v20  ;;  %v3143_v20 = vld [vmem:[#allocation5 + $0x88] ss:$16 sps:$4 sm:$0xff]  }
 0x14a   :  { %1994 = vmatprep.subr.bf16.mxu0 %v3097_v5  ;;  %2035 = vmatprep.subr.bf16.mxu1 %v3166_v25  ;;  %v3163_v25 = vld [vmem:[#allocation5 + $0x2c] ss:$16 sps:$4 sm:$0xff]  }
 0x14d   :  { %1995 = vmatpush1.bf16.msra.mxu0 %v3095_v6  ;;  %2036 = vmatpush1.bf16.msra.mxu1 %v3164_v24  ;;  %v3155_v24 = vld [vmem:[#allocation5 + $0x48] ss:$16 sps:$4 sm:$0xff]  }
 0x14e   :  { %1996 = vmatprep.subr.bf16.mxu0 %v3100_v9  ;;  %2037 = vmatprep.subr.bf16.mxu1 %v3172_v29  ;;  %v3175_v29 = vld [vmem:[#allocation5 + $0x1ec] ss:$16 sps:$4 sm:$0xff]  }
 0x151   :  { %1997 = vmatpush2.bf16.msra.mxu0 %v3098_v10  ;;  %2038 = vmatpush2.bf16.msra.mxu1 %v3170_v28  ;;  %v3133_v10 = vld [vmem:[#allocation5 + $0xcc] ss:$16 sps:$4 sm:$0xff]   ;;  %v3167_v28 = vld [vmem:[#allocation5 + $0x8] ss:$16 sps:$4 sm:$0xff]  }
 0x152   :  { %1998 = vmatprep.subr.bf16.mxu0 %v3103_v14  ;;  %2039 = vmatprep.subr.bf16.mxu1 %v3178_v33  ;;  %v3137_v14 = vld [vmem:[#allocation5 + $0xa8] ss:$16 sps:$4 sm:$0xff]   ;;  %v3187_v33 = vld [vmem:[#allocation5 + $0x1ac] ss:$16 sps:$4 sm:$0xff]  }
 0x155   :  { %1999 = vmatpush2.bf16.msra.mxu0 %v3101_v17  ;;  %2040 = vmatpush2.bf16.msra.mxu1 %v3176_v32  ;;  %v3145_v17 = vld [vmem:[#allocation5 + $0x8c] ss:$16 sps:$4 sm:$0xff]   ;;  %v3179_v32 = vld [vmem:[#allocation5 + $0x1c8] ss:$16 sps:$4 sm:$0xff]  }
 0x156   :  { %2000 = vmatprep.subr.bf16.mxu0 %v3106_v22  ;;  %2041 = vmatprep.subr.bf16.mxu1 %v3184_v37  ;;  %v3149_v22 = vld [vmem:[#allocation5 + $0x68] ss:$16 sps:$4 sm:$0xff]   ;;  %v3199_v37 = vld [vmem:[#allocation5 + $0x16c] ss:$16 sps:$4 sm:$0xff]  }
 0x159   :  { %2001 = vmatpush2.bf16.msra.mxu0 %v3104_v23  ;;  %2042 = vmatpush2.bf16.msra.mxu1 %v3182_v36  ;;  %v3157_v23 = vld [vmem:[#allocation5 + $0x4c] ss:$16 sps:$4 sm:$0xff]   ;;  %v3191_v36 = vld [vmem:[#allocation5 + $0x188] ss:$16 sps:$4 sm:$0xff]  }
 0x15a   :  { %2002 = vmatprep.subr.bf16.mxu0 %v3109_v26  ;;  %2043 = vmatprep.subr.bf16.mxu1 %v3190_v42  ;;  %v3161_v26 = vld [vmem:[#allocation5 + $0x28] ss:$16 sps:$4 sm:$0xff]  }
 0x15b   :  { %v3203_v42 = vld [vmem:[#allocation5 + $0x148] ss:$16 sps:$4 sm:$0xff]  }
 0x15d   :  { %2003 = vmatpush2.bf16.msra.mxu0 %v3107_v27  ;;  %2044 = vmatpush2.bf16.msra.mxu1 %v3188_v41  ;;  %v3169_v27 = vld [vmem:[#allocation5 + $0xc] ss:$16 sps:$4 sm:$0xff]   ;;  %v369_v41 = vrot.slane %v3482_v56, %v3458_v16 }
 0x15e   :  { %2004 = vmatprep.subr.bf16.mxu0 %v3112_v30  ;;  %2045 = vmatprep.subr.bf16.mxu1 %v3196_v47  ;;  %v3173_v30 = vld [vmem:[#allocation5 + $0x1e8] ss:$16 sps:$4 sm:$0xff]  }
 0x161   :  { %2005 = vmatpush2.bf16.msra.mxu0 %v3110_v31  ;;  %2046 = vmatpush2.bf16.msra.mxu1 %v3194_v46  ;;  %v3181_v31 = vld [vmem:[#allocation5 + $0x1cc] ss:$16 sps:$4 sm:$0xff]  }
 0x162   :  { %2006 = vmatprep.subr.bf16.mxu0 %v3115_v34  ;;  %2047 = vmatprep.subr.bf16.mxu1 %v3202_v50  ;;  %v3185_v34 = vld [vmem:[#allocation5 + $0x1a8] ss:$16 sps:$4 sm:$0xff]  }
 0x165   :  { %2007 = vmatpush2.bf16.msra.mxu0 %v3113_v35  ;;  %2048 = vmatpush2.bf16.msra.mxu1 %v3200_v49  ;;  %v3193_v35 = vld [vmem:[#allocation5 + $0x18c] ss:$16 sps:$4 sm:$0xff]   ;;  %v3209_v49 = vld [vmem:[#allocation5 + $0x128] ss:$16 sps:$4 sm:$0xff]  }
 0x166   :  { %2008 = vmatprep.subr.bf16.mxu0 %v3118_v39  ;;  %2049 = vmatprep.subr.bf16.mxu1 %v3208_v51  ;;  %v3197_v39 = vld [vmem:[#allocation5 + $0x168] ss:$16 sps:$4 sm:$0xff]  }
 0x169   :  { %2009 = vmatpush2.bf16.msra.mxu0 %v3116_v40  ;;  %2050 = vmatpush2.bf16.msra.mxu1 %v3206_v52  ;;  %v3205_v40 = vld [vmem:[#allocation5 + $0x14c] ss:$16 sps:$4 sm:$0xff]  }
 0x16a   :  { %2010 = vmatprep.subr.bf16.mxu0 %v3121_v43  ;;  %2051 = vmatprep.subr.bf16.mxu1 %v3214_v53  ;;  %v3211_v43 = vld [vmem:[#allocation5 + $0x12c] ss:$16 sps:$4 sm:$0xff]  }
 0x16b   :  { %v3217_v52 = vld [vmem:[#allocation5 + $0x10c] ss:$16 sps:$4 sm:$0xff]  }
 0x16d   :  { %2011 = vmatpush2.bf16.msra.mxu0 %v3119_v44  ;;  %2052 = vmatpush2.bf16.msra.mxu1 %v3212_v54  ;;  %v373_v44 = vrot.slane %v3482_v56, %v3465_v19 }
 0x16e   :  { %2062 = vmatprep.subr.bf16.mxu0 %v3127_v48  ;;  %2103 = vmatprep.subr.bf16.mxu1 %v3220_v55 }
 0x1b0   :  { %v1052_v59 = vpop.f32.mrf.mxu0  ;;  %v1093_v45 = vpop.f32.mrf.mxu1 }
 0x1b1   :  { %v1053_v60 = vadd.f32 %v1052_v59, %v361_v57  ;;  %v3215_v59 = vld [vmem:[#allocation5 + $0x108] ss:$16 sps:$4 sm:$0xff]  }
 0x1b2   :  { %v1054_v38 = vpop.f32.mrf.mxu0  ;;  %v1095_v61 = vpop.f32.mrf.mxu1 }
 0x1b3   :  { %v1094_v62 = vadd.f32 %v1093_v45, %v1053_v60  ;;  %v1055_v63 = vadd.f32 %v1054_v38, %v365_v58 }
 0x1b4   :  { %v1056_v0 = vpop.f32.mrf.mxu0  ;;  %v1097_v1 = vpop.f32.mrf.mxu1 }
 0x1b5   :  { %v1096_v2 = vadd.f32 %v1095_v61, %v1055_v63  ;;  %v1182_v3 = vmax.f32 %v1094_v62, 0.0  ;;  %v3218_v62 = vld [vmem:[#allocation5 + $0x2e8] ss:$16 sps:$4 sm:$0xff]   ;;  %v3223_v0 = vld [vmem:[#allocation5 + $0x2cc] ss:$16 sps:$4 sm:$0xff]  }
 0x1b6   :  { %v1057_v4 = vpop.f32.mrf.mxu0  ;;  %v1098_v5 = vpop.f32.mrf.mxu1  ;;  %v3221_v1 = vld [vmem:[#allocation5 + $0x2c8] ss:$16 sps:$4 sm:$0xff]  }
 0x1b7   :  { %v1183_v6 = vmax.f32 %v1096_v2, 0.0  ;;  %v3488_v9 = vpack.c.bf16 %v1182_v3, %v1182_v3  ;;  %v3226_v2 = vld [vmem:[#allocation5 + $0x2ac] ss:$16 sps:$4 sm:$0xff]   ;;  %v3224_v3 = vld [vmem:[#allocation5 + $0x2a8] ss:$16 sps:$4 sm:$0xff]  }
 0x1b8   :  { %v3229_v4 = vld [vmem:[#allocation5 + $0x28c] ss:$16 sps:$4 sm:$0xff]  }
 0x1b9   :  { %v1187_v7 = vpack.c.bf16 %v1183_v6, %v1183_v6  ;;  %v3266_v5 = vld [vmem:[%s3617_s7 + $0x78] sm:$0xff]  }
 0x1ba   :  { %v3267_v6 = vld [vmem:[%s3617_s7 + $0x38] sm:$0xff]  }
 0x1bb   :  { %2012 = vmatprep.mubr.bf16.mxu0 %v1187_v7 }
 0x1bc   :  { %2013 = vmatmul.mubr.bf16.vlgmr.msra.gmra.mxu0 %v3488_v9 }
 0x1bd   :  { %2063 = vmatpush1.bf16.msra.mxu0 %v3125_v8  ;;  %2094 = vmatprep.mubr.bf16.mxu0 %v1187_v7  ;;  %v3268_v7 = vld [vmem:[%s3617_s7 + $0x70] sm:$0xff]   ;;  %v3227_v8 = vld [vmem:[#allocation5 + $0x288] ss:$16 sps:$4 sm:$0xff]  }
 0x1be   :  { %2064 = vmatprep.subr.bf16.mxu0 %v3133_v10  ;;  %v3232_v10 = vld [vmem:[#allocation5 + $0x26c] ss:$16 sps:$4 sm:$0xff]  }
 0x1c1   :  { %2065 = vmatpush1.bf16.msra.mxu0 %v3131_v11  ;;  %v3270_v11 = vld [vmem:[%s3617_s7 + $0x68] sm:$0xff]  }
 0x1c2   :  { %2066 = vmatprep.subr.bf16.mxu0 %v3139_v12  ;;  %v3230_v12 = vld [vmem:[#allocation5 + $0x268] ss:$16 sps:$4 sm:$0xff]  }
 0x1c5   :  { %2067 = vmatpush1.bf16.msra.mxu0 %v3137_v14  ;;  %v3271_v14 = vld [vmem:[%s3617_s7 + $0x28] sm:$0xff]  }
 0x1c6   :  { %2068 = vmatprep.subr.bf16.mxu0 %v3145_v17  ;;  %v3235_v17 = vld [vmem:[#allocation5 + $0x24c] ss:$16 sps:$4 sm:$0xff]  }
 0x1c9   :  { %2069 = vmatpush1.bf16.msra.mxu0 %v3143_v20  ;;  %v3272_v20 = vld [vmem:[%s3617_s7 + $0x60] sm:$0xff]  }
 0x1ca   :  { %2070 = vmatprep.subr.bf16.mxu0 %v3151_v21  ;;  %v3233_v21 = vld [vmem:[#allocation5 + $0x248] ss:$16 sps:$4 sm:$0xff]  }
 0x1cd   :  { %2071 = vmatpush1.bf16.msra.mxu0 %v3149_v22  ;;  %v3273_v22 = vld [vmem:[%s3617_s7 + $0x20] sm:$0xff]  }
 0x1ce   :  { %2072 = vmatprep.subr.bf16.mxu0 %v3157_v23  ;;  %v3238_v23 = vld [vmem:[#allocation5 + $0x22c] ss:$16 sps:$4 sm:$0xff]  }
 0x1d1   :  { %2073 = vmatpush1.bf16.msra.mxu0 %v3155_v24  ;;  %v3274_v24 = vld [vmem:[%s3617_s7 + $0x58] sm:$0xff]  }
 0x1d2   :  { %2074 = vmatprep.subr.bf16.mxu0 %v3163_v25  ;;  %v3236_v25 = vld [vmem:[#allocation5 + $0x228] ss:$16 sps:$4 sm:$0xff]  }
 0x1d5   :  { %2075 = vmatpush1.bf16.msra.mxu0 %v3161_v26  ;;  %v3275_v26 = vld [vmem:[%s3617_s7 + $0x18] sm:$0xff]  }
 0x1d6   :  { %2076 = vmatprep.subr.bf16.mxu0 %v3169_v27  ;;  %v3241_v27 = vld [vmem:[#allocation5 + $0x20c] ss:$16 sps:$4 sm:$0xff]  }
 0x1d9   :  { %2077 = vmatpush1.bf16.msra.mxu0 %v3167_v28  ;;  %v3276_v28 = vld [vmem:[%s3617_s7 + $0x50] sm:$0xff]  }
 0x1da   :  { %2078 = vmatprep.subr.bf16.mxu0 %v3175_v29  ;;  %v3239_v29 = vld [vmem:[#allocation5 + $0x208] ss:$16 sps:$4 sm:$0xff]  }
 0x1dd   :  { %2079 = vmatpush2.bf16.msra.mxu0 %v3173_v30  ;;  %v3277_v30 = vld [vmem:[%s3617_s7 + $0x10] sm:$0xff]  }
 0x1de   :  { %2080 = vmatprep.subr.bf16.mxu0 %v3181_v31  ;;  %v3244_v31 = vld [vmem:[#allocation5 + $0x3ec] ss:$16 sps:$4 sm:$0xff]  }
 0x1e1   :  { %2081 = vmatpush2.bf16.msra.mxu0 %v3179_v32  ;;  %v3242_v32 = vld [vmem:[#allocation5 + $0x3e8] ss:$16 sps:$4 sm:$0xff]  }
 0x1e2   :  { %2082 = vmatprep.subr.bf16.mxu0 %v3187_v33  ;;  %v3247_v33 = vld [vmem:[#allocation5 + $0x3cc] ss:$16 sps:$4 sm:$0xff]  }
 0x1e5   :  { %2083 = vmatpush2.bf16.msra.mxu0 %v3185_v34  ;;  %v3245_v34 = vld [vmem:[#allocation5 + $0x3c8] ss:$16 sps:$4 sm:$0xff]  }
 0x1e6   :  { %2084 = vmatprep.subr.bf16.mxu0 %v3193_v35  ;;  %v3250_v35 = vld [vmem:[#allocation5 + $0x3ac] ss:$16 sps:$4 sm:$0xff]  }
 0x1e9   :  { %2085 = vmatpush2.bf16.msra.mxu0 %v3191_v36  ;;  %v3248_v36 = vld [vmem:[#allocation5 + $0x3a8] ss:$16 sps:$4 sm:$0xff]  }
 0x1ea   :  { %2086 = vmatprep.subr.bf16.mxu0 %v3199_v37  ;;  %v3253_v37 = vld [vmem:[#allocation5 + $0x38c] ss:$16 sps:$4 sm:$0xff]  }
 0x1ed   :  { %2087 = vmatpush2.bf16.msra.mxu0 %v3197_v39  ;;  %v3251_v39 = vld [vmem:[#allocation5 + $0x388] ss:$16 sps:$4 sm:$0xff]  }
 0x1ee   :  { %2088 = vmatprep.subr.bf16.mxu0 %v3205_v40  ;;  %v3256_v40 = vld [vmem:[#allocation5 + $0x36c] ss:$16 sps:$4 sm:$0xff]  }
 0x1f0   :  { %v1134_v46 = vpop.f32.mrf.mxu0  ;;  %v1175_v47 = vpop.f32.mrf.mxu1 }
 0x1f1   :  { %v1135_v48 = vadd.f32 %v1134_v46, %v369_v41  ;;  %2089 = vmatpush2.bf16.msra.mxu0 %v3203_v42  ;;  %v3254_v41 = vld [vmem:[#allocation5 + $0x368] ss:$16 sps:$4 sm:$0xff]   ;;  %v3259_v42 = vld [vmem:[#allocation5 + $0x34c] ss:$16 sps:$4 sm:$0xff]  }
 0x1f2   :  { %v1136_v50 = vpop.f32.mrf.mxu0  ;;  %v1177_v51 = vpop.f32.mrf.mxu1  ;;  %2090 = vmatprep.subr.bf16.mxu0 %v3211_v43  ;;  %v3257_v43 = vld [vmem:[#allocation5 + $0x348] ss:$16 sps:$4 sm:$0xff]  }
 0x1f3   :  { %v1176_v53 = vadd.f32 %v1175_v47, %v1135_v48  ;;  %v1137_v54 = vadd.f32 %v1136_v50, %v373_v44  ;;  %v3262_v44 = vld [vmem:[#allocation5 + $0x32c] ss:$16 sps:$4 sm:$0xff]   ;;  %v3260_v46 = vld [vmem:[#allocation5 + $0x328] ss:$16 sps:$4 sm:$0xff]  }
 0x1f4   :  { %v1138_v55 = vpop.f32.mrf.mxu0  ;;  %v1179_v57 = vpop.f32.mrf.mxu1  ;;  %v3265_v47 = vld [vmem:[#allocation5 + $0x30c] ss:$16 sps:$4 sm:$0xff]   ;;  %v3263_v48 = vld [vmem:[#allocation5 + $0x308] ss:$16 sps:$4 sm:$0xff]  }
 0x1f5   :  { %v1178_v58 = vadd.f32 %v1177_v51, %v1137_v54  ;;  %2091 = vmatpush2.bf16.msra.mxu0 %v3209_v49  ;;  %v1184_v45 = vmax.f32 %v1176_v53, 0.0  ;;  %v3278_v49 = vld [vmem:[%s3617_s7 + $0x48] sm:$0xff]   ;;  %v3280_v51 = vld [vmem:[%s3617_s7 + $0x40] sm:$0xff]   ;;  %v3282_v53 = vld [vmem:[%s3617_s7 + $0xf8] sm:$0xff]  }
 0x1f6   :  { %v1139_v60 = vpop.f32.mrf.mxu0  ;;  %v1180_v38 = vpop.f32.mrf.mxu1  ;;  %2092 = vmatprep.subr.bf16.mxu0 %v3217_v52  ;;  %v3279_v50 = vld [vmem:[%s3617_s7 + $0x8] sm:$0xff]   ;;  %v3281_v52 = vld [vmem:[%s3617_s7] sm:$0xff]   ;;  %v3283_v54 = vld [vmem:[%s3617_s7 + $0xb8] sm:$0xff]  }
 0x1f7   :  { %v1185_v56 = vmax.f32 %v1178_v58, 0.0  ;;  %v3495_v63 = vpack.c.bf16 %v1184_v45, %v1184_v45  ;;  %v3284_v55 = vld [vmem:[%s3617_s7 + $0xf0] sm:$0xff]   ;;  %v3286_v58 = vld [vmem:[%s3617_s7 + $0xe8] sm:$0xff]   ;;  %v3288_v45 = vld [vmem:[%s3617_s7 + $0xe0] sm:$0xff]  }
 0x1f8   :  { %v3285_v57 = vld [vmem:[%s3617_s7 + $0xb0] sm:$0xff]   ;;  %v3289_v60 = vld [vmem:[%s3617_s7 + $0xa0] sm:$0xff]   ;;  %v3290_v38 = vld [vmem:[%s3617_s7 + $0xd8] sm:$0xff]  }
 0x1f9   :  { %v1189_v61 = vpack.c.bf16 %v1185_v56, %v1185_v56  ;;  %2093 = vmatpush2.bf16.msra.mxu0 %v3215_v59  ;;  %v3287_v59 = vld [vmem:[%s3617_s7 + $0xa8] sm:$0xff]   ;;  %v3291_v56 = vld [vmem:[%s3617_s7 + $0x98] sm:$0xff]  }
 0x1fa   :  { %2820 = vmatprep.subr.bf16.mxu0 %v3266_v5  ;;  %v3297_v5 = vld [vmem:[%s3617_s7 + $0x80] sm:$0xff]  }
 0x1fb   :  { %2053 = vmatprep.mubr.bf16.mxu1 %v1189_v61 }
 0x1fc   :  { %2054 = vmatmul.mubr.bf16.vlgmr.msra.gmra.mxu1 %v3495_v63  ;;  %2095 = vmatmul.mubr.bf16.vlgmr.msra.gmra.mxu0 %v3488_v9  ;;  %v3269_v9 = vld [vmem:[%s3617_s7 + $0x30] sm:$0xff]  }
 0x1fd   :  { %2104 = vmatpush1.bf16.msra.mxu1 %v3218_v62  ;;  %2135 = vmatprep.mubr.bf16.mxu1 %v1189_v61  ;;  %v3292_v61 = vld [vmem:[%s3617_s7 + $0xd0] sm:$0xff]  }
 0x1fe   :  { %2105 = vmatprep.subr.bf16.mxu1 %v3223_v0  ;;  %2821 = vmatpush3.bf16.msra.mxu0 %v3267_v6  ;;  %v3293_v62 = vld [vmem:[%s3617_s7 + $0x90] sm:$0xff]   ;;  %v3294_v0 = vld [vmem:[%s3617_s7 + $0xc8] sm:$0xff]  }
 0x1ff   :  { %2822 = vmatprep.subr.bf16.mxu0 %v3268_v7  ;;  %v1318_v7 = vld [vmem:[%s3616_s6] sm:$0xf] }
 0x201   :  { %2106 = vmatpush1.bf16.msra.mxu1 %v3221_v1  ;;  %v3295_v1 = vld [vmem:[%s3617_s7 + $0x88] sm:$0xff]  }
 0x202   :  { %2107 = vmatprep.subr.bf16.mxu1 %v3226_v2  ;;  %2823 = vmatpush3.bf16.msra.mxu0 %v3269_v9  ;;  %v1327_v9 = vrot.slane %v1318_v7, %v3463_v18  ;;  %v1335_v18 = vrot.slane %v1318_v7, %v3465_v19  ;;  %v2787_v19 = vld [vmem:[%s3618_s8] ss:$0 sm:$0xff]  ;;  %s3340_s8 = scalar_lea.vmem %s2512_s27, 128 }
 0x203   :  { %2824 = vmatprep.subr.bf16.mxu0 %v3270_v11  ;;  %p3341_p10 = scmp.ne.s32.totalorder %s2512_s27, %s3340_s8  ;;  %p3346_p12 = scmp.lt.s32.totalorder %s3340_s8, %s3340_s8 }
 0x205   :  { %2108 = vmatpush1.bf16.msra.mxu1 %v3224_v3  ;;  %p3347_p13 = por %p3346_p12, %p3345_p11 }
 0x206   :  { %2109 = vmatprep.subr.bf16.mxu1 %v3229_v4  ;;  %2825 = vmatpush3.bf16.msra.mxu0 %v3271_v14  ;;  %v3296_v4 = vld [vmem:[%s3617_s7 + $0xc0] sm:$0xff]  }
 0x207   :  { %2826 = vmatprep.subr.bf16.mxu0 %v3272_v20  ;;  %p3348_p0 = pnand %p3347_p13, %p3341_p10 }
 0x209   :  { %2110 = vmatpush1.bf16.msra.mxu1 %v3227_v8  ;;  %v1323_v8 = vrot.slane %v1318_v7, %v3456_v15  ;;  %v1331_v15 = vrot.slane %v1318_v7, %v3458_v16 }
 0x20a   :  { %2111 = vmatprep.subr.bf16.mxu1 %v3232_v10  ;;  %2827 = vmatpush3.bf16.msra.mxu0 %v3273_v22 }
 0x20b   :  { %2828 = vmatprep.subr.bf16.mxu0 %v3274_v24 }
 0x20d   :  { %2112 = vmatpush1.bf16.msra.mxu1 %v3230_v12 }
 0x20e   :  { %2113 = vmatprep.subr.bf16.mxu1 %v3235_v17  ;;  %2829 = vmatpush3.bf16.msra.mxu0 %v3275_v26 }
 0x20f   :  { %2830 = vmatprep.subr.bf16.mxu0 %v3276_v28 }
 0x211   :  { %2114 = vmatpush1.bf16.msra.mxu1 %v3233_v21 }
 0x212   :  { %2115 = vmatprep.subr.bf16.mxu1 %v3238_v23  ;;  %2831 = vmatpush3.bf16.msra.mxu0 %v3277_v30 }
 0x213   :  { %2832 = vmatprep.subr.bf16.mxu0 %v3278_v49 }
 0x215   :  { %2116 = vmatpush1.bf16.msra.mxu1 %v3236_v25 }
 0x216   :  { %2117 = vmatprep.subr.bf16.mxu1 %v3241_v27  ;;  %2833 = vmatpush3.bf16.msra.mxu0 %v3279_v50 }
 0x217   :  { %2834 = vmatprep.subr.bf16.mxu0 %v3280_v51 }
 0x219   :  { %2118 = vmatpush1.bf16.msra.mxu1 %v3239_v29 }
 0x21a   :  { %2119 = vmatprep.subr.bf16.mxu1 %v3244_v31  ;;  %2835 = vmatpush3.bf16.msra.mxu0 %v3281_v52 }
 0x21d   :  { %2120 = vmatpush2.bf16.msra.mxu1 %v3242_v32 }
 0x21e   :  { %2121 = vmatprep.subr.bf16.mxu1 %v3247_v33 }
 0x221   :  { %2122 = vmatpush2.bf16.msra.mxu1 %v3245_v34 }
 0x222   :  { %2123 = vmatprep.subr.bf16.mxu1 %v3250_v35 }
 0x225   :  { %2124 = vmatpush2.bf16.msra.mxu1 %v3248_v36 }
 0x226   :  { %2125 = vmatprep.subr.bf16.mxu1 %v3253_v37 }
 0x229   :  { %2126 = vmatpush2.bf16.msra.mxu1 %v3251_v39 }
 0x22a   :  { %2127 = vmatprep.subr.bf16.mxu1 %v3256_v40 }
 0x22d   :  { %2128 = vmatpush2.bf16.msra.mxu1 %v3254_v41 }
 0x22e   :  { %2129 = vmatprep.subr.bf16.mxu1 %v3259_v42 }
 0x231   :  { %2130 = vmatpush2.bf16.msra.mxu1 %v3257_v43 }
 0x232   :  { %2131 = vmatprep.subr.bf16.mxu1 %v3262_v44 }
 0x235   :  { %2132 = vmatpush2.bf16.msra.mxu1 %v3260_v46 }
 0x236   :  { %2133 = vmatprep.subr.bf16.mxu1 %v3265_v47 }
 0x239   :  { %2134 = vmatpush2.bf16.msra.mxu1 %v3263_v48 }
 0x23a   :  { %2842 = vmatprep.subr.bf16.mxu1 %v3282_v53 }
 0x23c   :  { %2136 = vmatmul.mubr.bf16.vlgmr.msra.gmra.mxu1 %v3495_v63 }
 0x23d   :  { %2843 = vmatpush3.bf16.msra.mxu1 %v3283_v54 }
 0x23e   :  { %2844 = vmatprep.subr.bf16.mxu1 %v3284_v55 }
 0x241   :  { %2845 = vmatpush3.bf16.msra.mxu1 %v3285_v57 }
 0x242   :  { %2846 = vmatprep.subr.bf16.mxu1 %v3286_v58 }
 0x245   :  { %2847 = vmatpush3.bf16.msra.mxu1 %v3287_v59 }
 0x246   :  { %2848 = vmatprep.subr.bf16.mxu1 %v3288_v45  ;;  %v2496_v45 = vand.u32 127, %v74_v13 }
 0x248   :  { %vm2501_vm1 = vcmp.lt.s32.totalorder %v2496_v45, 8 }
 0x249   :  { %2849 = vmatpush3.bf16.msra.mxu1 %v3289_v60 }
 0x24a   :  { %2850 = vmatprep.subr.bf16.mxu1 %v3290_v38 }
 0x24d   :  { %2851 = vmatpush3.bf16.msra.mxu1 %v3291_v56 }
 0x24e   :  { %2852 = vmatprep.subr.bf16.mxu1 %v3292_v61 }
 0x251   :  { %2853 = vmatpush3.bf16.msra.mxu1 %v3293_v62 }
 0x252   :  { %2854 = vmatprep.subr.bf16.mxu1 %v3294_v0 }
 0x255   :  { %2855 = vmatpush3.bf16.msra.mxu1 %v3295_v1 }
 0x256   :  { %2856 = vmatprep.subr.bf16.mxu1 %v3296_v4 }
 0x259   :  { %2857 = vmatpush3.bf16.msra.mxu1 %v3297_v5 }
 0x27c   :  { %v2014_v63 = vpop.f32.mrf.mxu0 }
 0x27d   :  { %v2015_v10 = vadd.f32 %v2014_v63, %v1323_v8 }
 0x27e   :  { %v2016_v2 = vpop.f32.mrf.mxu0 }
 0x27f   :  { %v2017_v14 = vadd.f32 %v2016_v2, %v1327_v9 }
 0x280   :  { %v2018_v3 = vpop.f32.mrf.mxu0 }
 0x282   :  { %v2019_v6 = vpop.f32.mrf.mxu0 }
 0x2bc   :  { %v2055_v11 = vpop.f32.mrf.mxu1  ;;  %v2096_v12 = vpop.f32.mrf.mxu0 }
 0x2bd   :  { %v2056_v17 = vadd.f32 %v2055_v11, %v2015_v10  ;;  %v2097_v31 = vadd.f32 %v2096_v12, %v1331_v15 }
 0x2be   :  { %v2057_v20 = vpop.f32.mrf.mxu1  ;;  %v2098_v21 = vpop.f32.mrf.mxu0 }
 0x2bf   :  { %v2058_v22 = vadd.f32 %v2057_v20, %v2017_v14  ;;  %v2144_v23 = vmax.f32 %v2056_v17, 0.0  ;;  %v2099_v33 = vadd.f32 %v2098_v21, %v1335_v18 }
 0x2c0   :  { %v2059_v24 = vpop.f32.mrf.mxu1  ;;  %v2100_v25 = vpop.f32.mrf.mxu0 }
 0x2c1   :  { %v2145_v26 = vmax.f32 %v2058_v22, 0.0  ;;  %v2148_v30 = vpack.c.bf16 %v2144_v23, %v2144_v23 }
 0x2c2   :  { %v2060_v27 = vpop.f32.mrf.mxu1  ;;  %v2101_v28 = vpop.f32.mrf.mxu0 }
 0x2c3   :  { %v2149_v29 = vpack.c.bf16 %v2145_v26, %v2145_v26 }
 0x2c5   :  { %2447 = vmatprep.mubr.bf16.mxu0 %v2149_v29 }
 0x2c6   :  { %2448 = vmatmul.mubr.bf16.vlgmr.msra.gmra.mxu0 %v2148_v30 }
 0x2fc   :  { %v2137_v32 = vpop.f32.mrf.mxu1 }
 0x2fd   :  { %v2138_v34 = vadd.f32 %v2137_v32, %v2097_v31 }
 0x2fe   :  { %v2139_v35 = vpop.f32.mrf.mxu1 }
 0x2ff   :  { %v2140_v36 = vadd.f32 %v2139_v35, %v2099_v33  ;;  %v2146_v37 = vmax.f32 %v2138_v34, 0.0 }
 0x300   :  { %v2141_v39 = vpop.f32.mrf.mxu1 }
 0x301   :  { %v2147_v40 = vmax.f32 %v2140_v36, 0.0  ;;  %v2150_v43 = vpack.c.bf16 %v2146_v37, %v2146_v37 }
 0x302   :  { %v2142_v41 = vpop.f32.mrf.mxu1 }
 0x303   :  { %v2151_v42 = vpack.c.bf16 %v2147_v40, %v2147_v40 }
 0x305   :  { %2487 = vmatprep.mubr.bf16.mxu1 %v2151_v42 }
 0x306   :  { %2488 = vmatmul.mubr.bf16.vlgmr.msra.gmra.mxu1 %v2150_v43 }
 0x386   :  { %v2836_v44 = vpop.f32.mrf.mxu0 }
 0x388   :  { %v2837_v46 = vpop.f32.mrf.mxu0 }
 0x389   :  { %v2838_v48 = vadd.f32 %v2837_v46, %v2836_v44 }
 0x38a   :  { %v2839_v47 = vpop.f32.mrf.mxu0 }
 0x38b   :  { %v2450_v51 = vadd.f32 %v2838_v48, %v2787_v19 }
 0x38c   :  { %v2840_v16 = vpop.f32.mrf.mxu0 }
 0x3c6   :  { %v2858_v49 = vpop.f32.mrf.mxu1 }
 0x3c8   :  { %v2859_v50 = vpop.f32.mrf.mxu1 }
 0x3c9   :  { %v2860_v52 = vadd.f32 %v2859_v50, %v2858_v49 }
 0x3ca   :  { %v2861_v53 = vpop.f32.mrf.mxu1 }
 0x3cb   :  { %v2490_v54 = vadd.f32 %v2860_v52, %v2450_v51 }
 0x3cc   :  { %v2862_v55 = vpop.f32.mrf.mxu1 }
 0x3cd   :  { %v2497_v57 = vmax.f32 %v2490_v54, -20.0 }
 0x3cf   :  { %v2498_v58 = vmin.f32 %v2497_v57, 2.0 }
 0x3d1   :  { %v2499_v59 = vmul.f32 1.442695, %v2498_v58 }
 0x3d3   :  { %3298 = vpow2.f32 %v2499_v59 }
 0x3e0   :  { %v3299_v60 = vpop.eup %3298 }
 0x3e1   :  { %v2502_v38 = vsel %vm2501_vm1, %v2490_v54, %v3299_v60 }
 0x3e2   :  { %2504 = vst.msk [vmem:[#allocation7] sm:$0xff] %vm2503_vm2, %v2502_v38 }
 0x3e3   :  { %3351 = shalt.err (!%p3348_p0)
}
 0x3e4   :  { %2514 = dma.vmem_to_hbm [thread:$0]  %s2512_s27, 128, %s3619_s9, [#allocation4]  }
 0x3e5   :  { %3364 = dma.done.wait [#allocation4], 128  }
 0x3e6   :  { %3365 = vsyncadd [#allocation4], 4294967168 }
 0x3e7   :  { %2518 = vsyncpa [#allocation3], 1 }
 0x3e8   :  { %2519 = vsyncpa [#allocation6], 1 }
 0x3e9   :  { %2520 = vsyncpa [#allocation4], 1 }

</bundles_post_ra>
